<compile_context>
chip_gen: v7x
topology: tpu7x:2x2x1
jax: 0.10.0
libtpu: 0.0.40
codegen_flags: <defaults>
</compile_context>

<pallas_src>
import functools
import math
from operator import itemgetter

import jax
import jax.numpy as jnp
from jax.experimental import pallas as pl
from jax.experimental.pallas import tpu as pltpu


# ----------------------------------------------------------------------------
# PermuteToFrom helper logic (identical semantics to the PyTorch module)
# ----------------------------------------------------------------------------
def map_el_ind(arr, ind):
    return list(map(itemgetter(ind), arr))


def sort_and_return_indices(arr):
    indices = [ind for ind in range(len(arr))]
    arr = zip(arr, indices)
    arr = sorted(arr)
    return (map_el_ind(arr, 0), map_el_ind(arr, 1))


def _round_up(x, m):
    return -(-x // m) * m


# ----------------------------------------------------------------------------
# Pallas kernel: batched single-head self-attention over a tile of sequences
#   block: (TB, t, d); weights are lane-padded so per-projection slices of the
#   fused QKV result sit at multiples of 128 lanes.
# ----------------------------------------------------------------------------
def _attn_kernel(x_ref, wqkv_ref, wo_ref, o_ref, *, dp):
    hp = jax.lax.Precision.HIGHEST
    tb, t, d = x_ref.shape

    x = x_ref[...]                         # (TB, t, d), native dtype
    wqkv = wqkv_ref[...]                   # (d, 3*dp), 1/sqrt(d) folded into q cols
    wo = wo_ref[...]                       # (dp, d)

    cdt = x.dtype                          # MXU operand dtype (bf16 stays bf16)

    # Fused Q/K/V projection: one MXU pass, f32 accumulation.
    qkv = jnp.dot(x.reshape(tb * t, d), wqkv,
                  preferred_element_type=jnp.float32, precision=hp)
    qkv = qkv.reshape(tb, t, 3 * dp)
    # dp is a multiple of 128 -> lane-aligned slices (no cross-lane relayout).
    q = qkv[:, :, 0 * dp:1 * dp].astype(cdt)
    k = qkv[:, :, 1 * dp:2 * dp].astype(cdt)
    v = qkv[:, :, 2 * dp:3 * dp].astype(cdt)

    # Scores: contract on the last axis of both operands (no k.T relayout).
    # The zero-padded columns of q/k contribute exactly 0.
    s = jnp.einsum('bqd,bkd->bqk', q, k,
                   preferred_element_type=jnp.float32, precision=hp)

    # Numerically stable softmax; exact normalization for parity with the
    # reference (pl.reciprocal(approx=True) was ~1e-3 off -> assert failure).
    s = s - jnp.max(s, axis=-1, keepdims=True)
    p = jnp.exp(s)
    p = p / jnp.sum(p, axis=-1, keepdims=True)

    # TODO(synk): for t >= ~256 switch to a KV-tiled online-softmax (flash)
    # accumulator so the (t, t) f32 score tile never materializes (matters on
    # v7x's 64 MiB VMEM).
    pv = jnp.einsum('bqk,bkd->bqd', p.astype(cdt), v,
                    preferred_element_type=jnp.float32, precision=hp)

    out = jnp.dot(pv.reshape(tb * t, dp).astype(cdt), wo,
                  preferred_element_type=jnp.float32, precision=hp)
    o_ref[...] = out.reshape(tb, t, d).astype(o_ref.dtype)


# ----------------------------------------------------------------------------
# Tiling policy
# ----------------------------------------------------------------------------
def _vmem_capacity_bytes():
    try:
        return int(pltpu.get_tpu_info().vmem_capacity_bytes)
    except Exception:
        return 64 * 1024 * 1024            # conservative (v7x per-core figure)


def _choose_batch_tile(bf, t, d, dp, itemsize):
    """Sequences per grid step from a generation-aware VMEM budget, while
    keeping the grid multi-step so pipelining / megacore sharding engage."""
    lane, sub = 128, 8
    t_sub = _round_up(t, sub)
    t_lane = _round_up(t, lane)
    d_lane = _round_up(d, lane)

    # Per-sequence footprint: double-buffered in/out tiles (native dtype) +
    # f32 intermediates (qkv, q/k/v, pv/out, scores+probs).
    io = 2 * 2 * t_sub * d_lane * itemsize
    f32 = (3 * dp + 3 * dp + 2 * dp) * t_sub * 4
    f32 += 2 * t_sub * t_lane * 4
    per_seq = io + f32

    weights = 2 * (d * 3 * dp + dp * d) * itemsize   # double-buffered weights

    cap = _vmem_capacity_bytes()
    budget = max(per_seq, int(cap * 0.45) - weights)
    tb_cap = max(1, budget // per_seq)
    # At least ~4 grid steps when the batch allows (pipeline overlap + v7x TCs).
    tb_cap = int(min(tb_cap, max(1, bf // 4), 256))

    # Prefer a tile that divides bf exactly (avoids pad + slice HBM passes).
    tb = 1
    for cand in range(min(tb_cap, bf), 0, -1):
        if bf % cand == 0:
            tb = cand
            break
    if tb < max(1, tb_cap // 2) and bf > tb_cap:
        tb = tb_cap                                   # accept padding instead
    return tb, cap


# ----------------------------------------------------------------------------
# fn: axial self-attention over (Bf, t, d) via the Pallas kernel
# ----------------------------------------------------------------------------
def axial_self_attention(axial, wq, wk, wv, wo):
    bf, t, d = axial.shape
    dtype = axial.dtype
    dp = _round_up(d, 128)

    # One-time weight prep: pad each projection's columns to a lane-aligned
    # dp block and fold the 1/sqrt(d) softmax scale into the q columns.
    scale = 1.0 / math.sqrt(d)
    pad_c = ((0, 0), (0, dp - d))
    wqkv_p = jnp.concatenate(
        [jnp.pad(wq * scale, pad_c), jnp.pad(wk, pad_c), jnp.pad(wv, pad_c)],
        axis=1).astype(dtype)                          # (d, 3*dp)
    wo_p = jnp.pad(wo, ((0, dp - d), (0, 0))).astype(dtype)   # (dp, d)

    tb, vmem_cap = _choose_batch_tile(bf, t, d, dp, dtype.itemsize)
    bf_pad = _round_up(bf, tb)
    if bf_pad != bf:
        x_in = jnp.pad(axial, ((0, bf_pad - bf), (0, 0), (0, 0)))
    else:
        x_in = axial

    kernel = functools.partial(_attn_kernel, dp=dp)

    flops = 2 * bf_pad * t * (3 * d * dp + 2 * t * dp + dp * d)
    bytes_accessed = (2 * bf_pad * t * d * dtype.itemsize
                      + (d * 3 * dp + dp * d) * dtype.itemsize)
    cost = pl.CostEstimate(flops=flops,
                           transcendentals=bf_pad * t * t,
                           bytes_accessed=bytes_accessed)

    out = pl.pallas_call(
        kernel,
        out_shape=jax.ShapeDtypeStruct((bf_pad, t, d), dtype),
        grid_spec=pltpu.PrefetchScalarGridSpec(
            num_scalar_prefetch=0,
            grid=(bf_pad // tb,),
            in_specs=[
                pl.BlockSpec((tb, t, d), lambda i: (i, 0, 0)),
                # TODO(synk): single-buffer these constant weight specs
                # (pipeline_mode=pl.Buffered(1)) for large d to reclaim their
                # dead double-buffer VMEM on v7x.
                pl.BlockSpec((d, 3 * dp), lambda i: (0, 0)),
                pl.BlockSpec((dp, d), lambda i: (0, 0)),
            ],
            out_specs=pl.BlockSpec((tb, t, d), lambda i: (i, 0, 0)),
        ),
        compiler_params=pltpu.CompilerParams(
            dimension_semantics=("parallel",),         # shards across TCs on v7x
            vmem_limit_bytes=int(vmem_cap * 3 // 4)),
        cost_estimate=cost,
    )(x_in, wqkv_p, wo_p)

    if bf_pad != bf:
        out = out[:bf]
    return out


# ----------------------------------------------------------------------------
# PermuteToFrom forward (glue in plain JAX, fn is the Pallas kernel)
# ----------------------------------------------------------------------------
def permute_to_from(x, permutation, fn):
    _, inv_permutation = sort_and_return_indices(permutation)
    # TODO(synk): keep activations channel-last upstream (or fuse the producing
    # transpose into the pallas_call input) to drop these two full HBM passes.
    axial = jnp.transpose(x, permutation)          # x.permute(*permutation)
    shape = axial.shape
    t, d = shape[-2], shape[-1]
    axial = axial.reshape(-1, t, d)                # (-1, t, d)
    axial = fn(axial)                              # self.fn(axial)
    axial = axial.reshape(shape)
    axial = jnp.transpose(axial, inv_permutation)  # permute back
    return axial


if __name__ == "__main__":
    # Deterministic inputs / parameters.
    key = jax.random.PRNGKey(0)
    kx, kq, kk, kv, ko = jax.random.split(key, 5)

    b, c, h, w = 2, 4, 16, 16
    x = jax.random.normal(kx, (b, c, h, w), dtype=jnp.float32)   # NCHW

    d = c  # embedding dim = channels (attention over the height axis)
    init = 1.0 / math.sqrt(d)
    wq = jax.random.normal(kq, (d, d), dtype=jnp.float32) * init
    wk = jax.random.normal(kk, (d, d), dtype=jnp.float32) * init
    wv = jax.random.normal(kv, (d, d), dtype=jnp.float32) * init
    wo = jax.random.normal(ko, (d, d), dtype=jnp.float32) * init

    # permutation (0, 3, 2, 1): (b, c, h, w) -> (b, w, h, c); t = h, d = c
    permutation = (0, 3, 2, 1)
    fn = lambda a: axial_self_attention(a, wq, wk, wv, wo)

    out = permute_to_from(x, permutation, fn)
    out = jax.block_until_ready(out)
    assert out.shape == x.shape and out.dtype == x.dtype

    # Pure-JAX reference check of the kernel's attention math.
    hp = jax.lax.Precision.HIGHEST

    def ref_fn(a):
        q = jnp.matmul(a, wq, precision=hp)
        k = jnp.matmul(a, wk, precision=hp)
        v = jnp.matmul(a, wv, precision=hp)
        s = jnp.matmul(q, jnp.swapaxes(k, -1, -2), precision=hp) / math.sqrt(d)
        p = jax.nn.softmax(s, axis=-1)
        return jnp.matmul(jnp.matmul(p, v, precision=hp), wo, precision=hp)

    ref = permute_to_from(x, permutation, ref_fn)
    assert jnp.allclose(out, ref, atol=1e-3, rtol=1e-3), (
        float(jnp.max(jnp.abs(out - ref))))

    print("KERNEL_OK")
</pallas_src>

<mosaic_0001>
module attributes {stable_mosaic.version = 11 : i64} {
  func.func @_attn_kernel(%arg0: i32, %arg1: memref<8x16x4xf32, #tpu.memory_space<vmem>>, %arg2: memref<4x384xf32, #tpu.memory_space<vmem>>, %arg3: memref<128x4xf32, #tpu.memory_space<vmem>>, %arg4: memref<8x16x4xf32, #tpu.memory_space<vmem>>) attributes {dimension_semantics = [#tpu.dimension_semantics<parallel>], iteration_bounds = array<i64: 4>, scalar_prefetch = 0 : i64, scratch_operands = 0 : i64, tpu.core_type = #tpu.core_type<tc>, window_params = [{transform_indices = @transform_0, window_bounds = array<i64: 8, 16, 4>}, {pipeline_mode = #tpu.pipeline_mode<synchronous>, transform_indices = @transform_1, window_bounds = array<i64: 4, 384>}, {pipeline_mode = #tpu.pipeline_mode<synchronous>, transform_indices = @transform_2, window_bounds = array<i64: 128, 4>}, {transform_indices = @transform_3, window_bounds = array<i64: 8, 16, 4>}]} {
    %c0 = arith.constant 0 : index
    %c0_0 = arith.constant 0 : index
    %c0_1 = arith.constant 0 : index
    %0 = vector.load %arg1[%c0, %c0_0, %c0_1] : memref<8x16x4xf32, #tpu.memory_space<vmem>>, vector<8x16x4xf32>
    %c0_2 = arith.constant 0 : index
    %c0_3 = arith.constant 0 : index
    %1 = vector.load %arg2[%c0_2, %c0_3] : memref<4x384xf32, #tpu.memory_space<vmem>>, vector<4x384xf32>
    %c0_4 = arith.constant 0 : index
    %c0_5 = arith.constant 0 : index
    %2 = vector.load %arg3[%c0_4, %c0_5] : memref<128x4xf32, #tpu.memory_space<vmem>>, vector<128x4xf32>
    %3 = vector.shape_cast %0 : vector<8x16x4xf32> to vector<128x4xf32>
    %cst = arith.constant dense<0.000000e+00> : vector<128x384xf32>
    %4 = tpu.matmul %3, %1, %cst {dimension_numbers = #tpu.dot_dimension_numbers<[1], [0], [0], [1], [0, 0, 1, 1], [], []>, precision = #tpu.contract_precision<fp32>} : vector<128x4xf32>, vector<4x384xf32>, vector<128x384xf32> -> vector<128x384xf32>
    %5 = vector.shape_cast %4 : vector<128x384xf32> to vector<8x16x384xf32>
    %6 = vector.extract_strided_slice %5 {offsets = [0, 0, 0], sizes = [8, 16, 128], strides = [1, 1, 1]} : vector<8x16x384xf32> to vector<8x16x128xf32>
    %7 = vector.extract_strided_slice %5 {offsets = [0, 0, 128], sizes = [8, 16, 128], strides = [1, 1, 1]} : vector<8x16x384xf32> to vector<8x16x128xf32>
    %8 = vector.extract_strided_slice %5 {offsets = [0, 0, 256], sizes = [8, 16, 128], strides = [1, 1, 1]} : vector<8x16x384xf32> to vector<8x16x128xf32>
    "tpu.trace_start"() <{level = 10 : i32, message = "bqd,bkd->bqk"}> : () -> ()
    %cst_6 = arith.constant dense<0.000000e+00> : vector<8x16x16xf32>
    %9 = tpu.matmul %6, %7, %cst_6 {dimension_numbers = #tpu.dot_dimension_numbers<[2], [2], [1], [1], [0, 0, 0, 1, 1, 1], [0], [0]>, precision = #tpu.contract_precision<fp32>} : vector<8x16x128xf32>, vector<8x16x128xf32>, vector<8x16x16xf32> -> vector<8x16x16xf32>
    "tpu.trace_stop"() : () -> ()
    %cst_7 = arith.constant dense<0xFF800000> : vector<8x16xf32>
    %10 = vector.multi_reduction <maximumf>, %9, %cst_7 [2] : vector<8x16x16xf32> to vector<8x16xf32>
    %11 = vector.shape_cast %10 : vector<8x16xf32> to vector<8x16x1xf32>
    %12 = vector.broadcast %11 : vector<8x16x1xf32> to vector<8x16x16xf32>
    %13 = arith.subf %9, %12 : vector<8x16x16xf32>
    %14 = math.exp %13 : vector<8x16x16xf32>
    %cst_8 = arith.constant dense<0.000000e+00> : vector<8x16xf32>
    %15 = vector.multi_reduction <add>, %14, %cst_8 [2] : vector<8x16x16xf32> to vector<8x16xf32>
    %16 = vector.shape_cast %15 : vector<8x16xf32> to vector<8x16x1xf32>
    %17 = vector.broadcast %16 : vector<8x16x1xf32> to vector<8x16x16xf32>
    %18 = arith.divf %14, %17 : vector<8x16x16xf32>
    "tpu.trace_start"() <{level = 10 : i32, message = "bqk,bkd->bqd"}> : () -> ()
    %cst_9 = arith.constant dense<0.000000e+00> : vector<8x16x128xf32>
    %19 = tpu.matmul %18, %8, %cst_9 {dimension_numbers = #tpu.dot_dimension_numbers<[2], [1], [1], [2], [0, 0, 0, 1, 1, 2], [0], [0]>, precision = #tpu.contract_precision<fp32>} : vector<8x16x16xf32>, vector<8x16x128xf32>, vector<8x16x128xf32> -> vector<8x16x128xf32>
    "tpu.trace_stop"() : () -> ()
    %20 = vector.shape_cast %19 : vector<8x16x128xf32> to vector<128x128xf32>
    %cst_10 = arith.constant dense<0.000000e+00> : vector<128x4xf32>
    %21 = tpu.matmul %20, %2, %cst_10 {dimension_numbers = #tpu.dot_dimension_numbers<[1], [0], [0], [1], [0, 0, 1, 1], [], []>, precision = #tpu.contract_precision<fp32>} : vector<128x128xf32>, vector<128x4xf32>, vector<128x4xf32> -> vector<128x4xf32>
    %22 = vector.shape_cast %21 : vector<128x4xf32> to vector<8x16x4xf32>
    %c0_11 = arith.constant 0 : index
    %c0_12 = arith.constant 0 : index
    %c0_13 = arith.constant 0 : index
    %23 = vector.load %arg4[%c0_11, %c0_12, %c0_13] : memref<8x16x4xf32, #tpu.memory_space<vmem>>, vector<8x16x4xf32>
    tpu.vector_store %arg4[%c0_11, %c0_12, %c0_13], %22 {strides = array<i32>} : memref<8x16x4xf32, #tpu.memory_space<vmem>>, vector<8x16x4xf32>,
    return
  }
  func.func @transform_0(%arg0: i32) -> (i32, i32, i32) {
    %c0_i32 = arith.constant 0 : i32
    %c0_i32_0 = arith.constant 0 : i32
    %c0_i32_1 = arith.constant 0 : i32
    return %arg0, %c0_i32, %c0_i32_0 : i32, i32, i32
  }
  func.func @transform_1(%arg0: i32) -> (i32, i32) {
    %c0_i32 = arith.constant 0 : i32
    %c0_i32_0 = arith.constant 0 : i32
    %c0_i32_1 = arith.constant 0 : i32
    return %c0_i32, %c0_i32_0 : i32, i32
  }
  func.func @transform_2(%arg0: i32) -> (i32, i32) {
    %c0_i32 = arith.constant 0 : i32
    %c0_i32_0 = arith.constant 0 : i32
    %c0_i32_1 = arith.constant 0 : i32
    return %c0_i32, %c0_i32_0 : i32, i32
  }
  func.func @transform_3(%arg0: i32) -> (i32, i32, i32) {
    %c0_i32 = arith.constant 0 : i32
    %c0_i32_0 = arith.constant 0 : i32
    %c0_i32_1 = arith.constant 0 : i32
    return %arg0, %c0_i32, %c0_i32_0 : i32, i32, i32
  }
}

</mosaic_0001>

<bundles_post_ra>
// kernel: tpu_custom_call.1
= control target key start
LH: loop header
LB: loop body
LE: loop exit
PB: predicated region body
PF: predicated region fallthrough
CT: control target
= control target key end

     0   :  { %s15198_s12 = smov 0   ;;  %s17438_s0 = inlined_call_operand.vmem [shape: f32[32,16,4], index: 0, kind: input, shape index: {}]   ;;  %s17439_s1 = inlined_call_operand.vmem [shape: f32[4,384], index: 1, kind: input, shape index: {}]   ;;  %s17440_s2 = inlined_call_operand.vmem [shape: f32[128,4], index: 2, kind: input, shape index: {}]   ;;  %s17441_s3 = inlined_call_operand.vmem [shape: f32[32,16,4], index: 3, kind: output, shape index: {}]  }
   0x1 LB: > { %s12180_s13 = sadd.s32 4294967295, %s15175_s12   ;;  %p12184_p0 = scmp.ge.s32.totalorder %s15175_s12, 1  ;;  %s15175_s12 = sphi %s15198_s12, %s13_s12  }
   0x2   : > { %p139_p1 = scmp.lt.s32.totalorder %s15175_s12, 5 }
   0x4   : > { %p140_p2 = pnand %p12184_p0, %p139_p1 }
   0x6   : > { %143 = sbr.rel (%p140_p2) target bundleno = 1936 (0x790), region = 32 }
   0xd   : > { %v195_v0 = vld [vmem:[%s17439_s1] sm:$0xff]  ;;  %vm265_vm0 = vcmask 1043456   ;;  %s12185_s16 = sshll.u32 %s12180_s13, 3  ;;  %v15177_v3 = vmov 0.0   ;;  %vm216_vm1 = vcmask 31744   ;;  %vm6579_vm2 = vcmask 130048  }
   0xe   : > { %v215_v1 = vcombine.high %v195_v0, %v195_v0  ;;  %v266_v2 = vsel %vm265_vm0, %v195_v0, 0  ;;  %589 = vmatprep.mubr.f32.mxu0 %v15177_v3  ;;  %p166_p3 = scmp.lt.s32.totalorder %s12185_s16, 31  ;;  %338 = vmatprep.mubr.f32.mxu1 %v15177_v3  ;;  %v196_v26 = vld [vmem:[%s17439_s1 + $0x8] sm:$0xf] }
   0xf   : > { %v15212_v4 = vand.u32 4294901760, %v266_v2  ;;  %v15281_v36 = vsel %vm265_vm0, %v196_v26, 0 }
  0x10   : > { %v268_v5 = vsel %vm265_vm0, %v215_v1, 0  ;;  %s17683_s16 = smov (!%p166_p3, %s12185_s16), 31  ;;  %v15304_v45 = vand.u32 4294901760, %v15281_v36 }
  0x11   : > { %v15217_v6 = vand.u32 4294901760, %v268_v5  ;;  %v15220_v7 = vsub.f32 %v266_v2, %v15212_v4  ;;  %s12193_s17 = sshll.u32 %s17683_s16, 4 }
  0x12   : > { %s15232_s20 = scalar_lea.vmem %s17438_s0, %s12193_s17  ;;  %s17401_s6 = scalar_lea.vmem %s17441_s3, %s12193_s17 }
  0x13   : > { %v15224_v8 = vsub.f32 %v268_v5, %v15217_v6  ;;  %v17442_v9 = vand.u32 4294901760, %v15220_v7  ;;  %273 = vmatprep.subr.mxu1 %v15217_v6  ;;  %v179_v10 = vld [vmem:[%s15232_s20] sm:$0xff]  ;;  %v180_v11 = vld [vmem:[%s15232_s20 + $0x8] sm:$0xff]  ;;  %v181_v12 = vld [vmem:[%s15232_s20 + $0x10] sm:$0xff] }
  0x14   : > { %275 = vmatpush1.msra.mxu1 %v15212_v4  ;;  %v218_v15 = vsel %vm216_vm1, %v179_v10, 0  ;;  %v221_v16 = vsel %vm216_vm1, %v180_v11, 0  ;;  %v182_v17 = vld [vmem:[%s15232_s20 + $0x18] sm:$0xff]  ;;  %v224_v20 = vsel %vm216_vm1, %v181_v12, 0  ;;  %v183_v22 = vld [vmem:[%s15232_s20 + $0x20] sm:$0xff]  ;;  %v184_v30 = vld [vmem:[%s15232_s20 + $0x28] sm:$0xff] }
  0x15   : > { %v517_v13 = vand.u32 4294901760, %v15224_v8  ;;  %v524_v14 = vsub.f32 %v15220_v7, %v17442_v9  ;;  %v15246_v18 = vand.u32 4294901760, %v218_v15  ;;  %v15248_v19 = vand.u32 4294901760, %v221_v16  ;;  %v185_v43 = vld [vmem:[%s15232_s20 + $0x30] sm:$0xff]  ;;  %v186_v52 = vld [vmem:[%s15232_s20 + $0x38] sm:$0xff]  ;;  %v187_v59 = vld [vmem:[%s15232_s20 + $0x40] sm:$0xff] }
  0x16   : > { %v227_v21 = vsel %vm216_vm1, %v182_v17, 0  ;;  %v15256_v24 = vand.u32 4294901760, %v224_v20  ;;  %v230_v33 = vsel %vm216_vm1, %v183_v22, 0  ;;  %v233_v38 = vsel %vm216_vm1, %v184_v30, 0  ;;  %v188_v2 = vld [vmem:[%s15232_s20 + $0x48] sm:$0xff]  ;;  %v190_v26 = vld [vmem:[%s15232_s20 + $0x58] sm:$0xff] }
  0x17   : > { %v518_v23 = vsub.f32 %v15224_v8, %v517_v13  ;;  %v15258_v25 = vand.u32 4294901760, %v227_v21  ;;  %v525_v27 = vand.u32 4294901760, %v524_v14  ;;  %v15264_v28 = vsub.f32 %v218_v15, %v15246_v18 }
  0x18   : > { %v15267_v29 = vsub.f32 %v221_v16, %v15248_v19  ;;  %v15271_v32 = vsub.f32 %v224_v20, %v15256_v24  ;;  %v15294_v42 = vand.u32 4294901760, %v230_v33  ;;  %v15306_v46 = vand.u32 4294901760, %v233_v38  ;;  %v189_v16 = vld [vmem:[%s15232_s20 + $0x50] sm:$0xff] }
  0x19   : > { %17530 = vst [vmem:[#allocation2_spill] sm:$0xff] %v15264_v28  ;;  %v519_v31 = vand.u32 4294901760, %v518_v23  ;;  %v15275_v34 = vand.u32 4294901760, %v15264_v28  ;;  %v15284_v37 = vsub.f32 %v227_v21, %v15258_v25  ;;  %v236_v47 = vsel %vm216_vm1, %v185_v43, 0  ;;  %v191_v43 = vld [vmem:[%s15232_s20 + $0x60] sm:$0xff] }
  0x1a   : > { %17531 = vst [vmem:[#allocation3_spill] sm:$0xff] %v15267_v29  ;;  %17532 = vst [vmem:[#allocation4_spill] sm:$0xff] %v15271_v32  ;;  %v15278_v35 = vand.u32 4294901760, %v15267_v29  ;;  %v15292_v41 = vand.u32 4294901760, %v15271_v32  ;;  %v15319_v51 = vsub.f32 %v230_v33, %v15294_v42  ;;  %v15325_v53 = vand.u32 4294901760, %v236_v47 }
  0x1b   : > { %520 = vmatprep.subr.mxu0 %v519_v31  ;;  %17533 = vst [vmem:[#allocation5_spill] sm:$0xff] %v15284_v37  ;;  %14613 = vmatprep.subr.mxu1 %v519_v31  ;;  %v342_v39 = vsub.f32 %v15264_v28, %v15275_v34  ;;  %v15316_v50 = vand.u32 4294901760, %v15284_v37  ;;  %v15337_v57 = vsub.f32 %v233_v38, %v15306_v46  ;;  %v239_v58 = vsel %vm216_vm1, %v186_v52, 0 }
  0x1c   : > { %526 = vmatpush1.msra.mxu0 %v525_v27  ;;  %v353_v40 = vsub.f32 %v15267_v29, %v15278_v35  ;;  %v364_v49 = vsub.f32 %v15271_v32, %v15292_v41  ;;  %17534 = vst [vmem:[#allocation6_spill] sm:$0xff] %v15319_v51  ;;  %v15334_v56 = vand.u32 4294901760, %v15319_v51  ;;  %v15345_v60 = vsub.f32 %v236_v47, %v15325_v53 }
  0x1d   : > { %591 = vmatmul.mubr.f32.vlgmr.msra.gmra.mrb[0].mxu0 %v15246_v18  ;;  %704 = vmatprep.subr.mxu0 %v15224_v8  ;;  %v15299_v44 = vand.u32 4294901760, %v342_v39  ;;  %v375_v55 = vsub.f32 %v15284_v37, %v15316_v50  ;;  %17535 = vst [vmem:[#allocation7_spill] sm:$0xff] %v15337_v57  ;;  %v15353_v63 = vand.u32 4294901760, %v15337_v57  ;;  %v15355_v0 = vand.u32 4294901760, %v239_v58 }
  0x1e   : > { %596 = vmatprep.mubr.f32.mxu0 %v15177_v3  ;;  %707 = vmatpush1.msra.mxu0 %v15220_v7  ;;  %v15311_v48 = vand.u32 4294901760, %v353_v40  ;;  %v15329_v54 = vand.u32 4294901760, %v364_v49  ;;  %17536 = vst [vmem:[#allocation8_spill] sm:$0xff] %v15345_v60  ;;  %v386_v62 = vsub.f32 %v15319_v51, %v15334_v56  ;;  %v242_v1 = vsel %vm216_vm1, %v187_v59, 0 }
  0x1f   : > { %900 = vmatprep.subr.mxu0 %v15217_v6  ;;  %344 = vmatmul.mubr.f32.vlgmr.msra.gmra.mrb[0].mxu1 %v15299_v44  ;;  %v15348_v61 = vand.u32 4294901760, %v375_v55  ;;  %v15363_v5 = vand.u32 4294901760, %v15345_v60  ;;  %v397_v11 = vsub.f32 %v15337_v57, %v15353_v63  ;;  %v15371_v12 = vsub.f32 %v239_v58, %v15355_v0  ;;  %v192_v58 = vld [vmem:[%s15232_s20 + $0x68] sm:$0xff] }
  0x20   : > { %349 = vmatprep.mubr.f32.mxu1 %v15177_v3  ;;  %14614 = vmatpush1.msra.mxu1 %v525_v27  ;;  %v15366_v10 = vand.u32 4294901760, %v386_v62  ;;  %v15373_v14 = vand.u32 4294901760, %v242_v1  ;;  %v245_v15 = vsel %vm216_vm1, %v188_v2, 0  ;;  %v248_v27 = vsel %vm216_vm1, %v189_v16, 0  ;;  %v193_v16 = vld [vmem:[%s15232_s20 + $0x70] sm:$0xff] }
  0x21   : > { %598 = vmatmul.mubr.f32.gmra.mrb[2].mxu0 %v15248_v19  ;;  %12873 = vmatprep.subr.mxu1 %v15304_v45  ;;  %17537 = vst [vmem:[#allocation9_spill] sm:$0xff] %v15371_v12  ;;  %v408_v17 = vsub.f32 %v15345_v60, %v15363_v5  ;;  %v15383_v20 = vand.u32 4294901760, %v397_v11  ;;  %v15386_v21 = vand.u32 4294901760, %v15371_v12  ;;  %v15391_v23 = vand.u32 4294901760, %v245_v15 }
  0x22   : > { %603 = vmatprep.mubr.f32.mxu0 %v15177_v3  ;;  %v15389_v22 = vsub.f32 %v242_v1, %v15373_v14  ;;  %v251_v31 = vsel %vm216_vm1, %v190_v26, 0  ;;  %v15413_v40 = vand.u32 4294901760, %v248_v27  ;;  %v257_v62 = vsel %vm216_vm1, %v192_v58, 0 }
  0x23   : > { %355 = vmatmul.mubr.f32.gmra.mrb[2].mxu1 %v15311_v48  ;;  %v15399_v30 = vand.u32 4294901760, %v408_v17  ;;  %v419_v33 = vsub.f32 %v15371_v12, %v15386_v21  ;;  %v15411_v39 = vsub.f32 %v245_v15, %v15391_v23  ;;  %v15419_v8 = vand.u32 4294901760, %v251_v31 }
  0x24   : > { %360 = vmatprep.mubr.f32.mxu1 %v15177_v3  ;;  %17538 = vst [vmem:[#allocation10_spill] sm:$0xff] %v15389_v22  ;;  %v15408_v38 = vand.u32 4294901760, %v15389_v22  ;;  %v15431_v55 = vsub.f32 %v248_v27, %v15413_v40  ;;  %v15455_v17 = vand.u32 4294901760, %v257_v62 }
  0x25   : > { %605 = vmatmul.mubr.f32.gmra.mrb[4].mxu0 %v15256_v24  ;;  %17539 = vst [vmem:[#allocation11_spill] sm:$0xff] %v15411_v39  ;;  %v15423_v47 = vand.u32 4294901760, %v419_v33  ;;  %v15428_v52 = vand.u32 4294901760, %v15411_v39  ;;  %v15449_v15 = vsub.f32 %v251_v31, %v15419_v8 }
  0x26   : > { %610 = vmatprep.mubr.f32.mxu0 %v15177_v3  ;;  %v430_v49 = vsub.f32 %v15389_v22, %v15408_v38  ;;  %v15446_v11 = vand.u32 4294901760, %v15431_v55  ;;  %v15474_v58 = vsub.f32 %v257_v62, %v15455_v17 }
  0x27   : > { %366 = vmatmul.mubr.f32.gmra.mrb[4].mxu1 %v15329_v54  ;;  %v441_v2 = vsub.f32 %v15411_v39, %v15428_v52  ;;  %v15463_v33 = vand.u32 4294901760, %v15449_v15 }
  0x28   : > { %371 = vmatprep.mubr.f32.mxu1 %v15177_v3  ;;  %v15441_v1 = vand.u32 4294901760, %v430_v49  ;;  %v452_v27 = vsub.f32 %v15431_v55, %v15446_v11  ;;  %v194_v49 = vld [vmem:[%s15232_s20 + $0x78] sm:$0xff]  ;;  %v15491_v62 = vand.u32 4294901760, %v15474_v58 }
  0x29   : > { %612 = vmatmul.mubr.f32.gmra.mrb[6].mxu0 %v15258_v25  ;;  %v15458_v26 = vand.u32 4294901760, %v441_v2 }
  0x2a   : > { %617 = vmatprep.mubr.f32.mxu0 %v15177_v3  ;;  %v15477_v2 = vand.u32 4294901760, %v452_v27 }
  0x2b   : > { %377 = vmatmul.mubr.f32.gmra.mrb[6].mxu1 %v15348_v61 }
  0x2c   : > { %382 = vmatprep.mubr.f32.mxu1 %v15177_v3 }
  0x2d   : > { %619 = vmatmul.mubr.f32.gmra.mrb[8].mxu0 %v15294_v42 }
  0x2e   : > { %770 = vmatprep.mubr.f32.mxu0 %v15177_v3 }
  0x2f   : > { %388 = vmatmul.mubr.f32.gmra.mrb[8].mxu1 %v15366_v10 }
  0x30   : > { %393 = vmatprep.mubr.f32.mxu1 %v15177_v3 }
  0x31   : > { %773 = vmatmul.mubr.f32.vlgmr.msra.gmra.mrb[0].mxu0 %v15264_v28 }
  0x32   : > { %778 = vmatprep.mubr.f32.mxu0 %v15177_v3  ;;  %902 = vmatpush1.msra.mxu0 %v15212_v4 }
  0x33   : > { %1113 = vmatprep.subr.mxu0 %v517_v13  ;;  %399 = vmatmul.mubr.f32.gmra.mrb[10].mxu1 %v15383_v20  ;;  %v254_v13 = vsel %vm216_vm1, %v191_v43, 0  ;;  %v260_v43 = vsel %vm216_vm1, %v193_v16, 0  ;;  %v263_v16 = vsel %vm216_vm1, %v194_v49, 0 }
  0x34   : > { %404 = vmatprep.mubr.f32.mxu1 %v15177_v3  ;;  %v15437_v59 = vand.u32 4294901760, %v254_v13 }
  0x35   : > { %781 = vmatmul.mubr.f32.gmra.mrb[2].mxu0 %v15267_v29 }
  0x36   : > { %786 = vmatprep.mubr.f32.mxu0 %v15177_v3  ;;  %v15466_v31 = vsub.f32 %v254_v13, %v15437_v59  ;;  %v463_v13 = vsub.f32 %v15449_v15, %v15463_v33 }
  0x37   : > { %410 = vmatmul.mubr.f32.gmra.mrb[12].mxu1 %v15399_v30 }
  0x38   : > { %415 = vmatprep.mubr.f32.mxu1 %v15177_v3  ;;  %v15482_v9 = vand.u32 4294901760, %v15466_v31  ;;  %v15494_v27 = vand.u32 4294901760, %v463_v13  ;;  %v485_v13 = vsub.f32 %v15474_v58, %v15491_v62 }
  0x39   : > { %789 = vmatmul.mubr.f32.gmra.mrb[4].mxu0 %v15271_v32 }
  0x3a   : > { %794 = vmatprep.mubr.f32.mxu0 %v15177_v3 }
  0x3b   : > { %421 = vmatmul.mubr.f32.gmra.mrb[14].mxu1 %v15423_v47 }
  0x3c   : > { %426 = vmatprep.mubr.f32.mxu1 %v15177_v3 }
  0x3d   : > { %797 = vmatmul.mubr.f32.gmra.mrb[6].mxu0 %v15284_v37  ;;  %v474_v37 = vsub.f32 %v15466_v31, %v15482_v9 }
  0x3e   : > { %802 = vmatprep.mubr.f32.mxu0 %v15177_v3 }
  0x3f   : > { %432 = vmatmul.mubr.f32.gmra.mrb[16].mxu1 %v15441_v1  ;;  %v15507_v49 = vand.u32 4294901760, %v474_v37 }
  0x40   : > { %437 = vmatprep.mubr.f32.mxu1 %v15177_v3 }
  0x41   : > { %805 = vmatmul.mubr.f32.gmra.mrb[8].mxu0 %v15319_v51  ;;  %v15484_v51 = vand.u32 4294901760, %v260_v43 }
  0x42   : > { %810 = vmatprep.mubr.f32.mxu0 %v15177_v3 }
  0x43   : > { %443 = vmatmul.mubr.f32.gmra.mrb[18].mxu1 %v15458_v26  ;;  %v15499_v32 = vsub.f32 %v260_v43, %v15484_v51 }
  0x44   : > { %448 = vmatprep.mubr.f32.mxu1 %v15177_v3 }
  0x45   : > { %813 = vmatmul.mubr.f32.gmra.mrb[10].mxu0 %v15337_v57  ;;  %v15501_v57 = vand.u32 4294901760, %v263_v16  ;;  %v15512_v29 = vand.u32 4294901760, %v15499_v32 }
  0x46   : > { %818 = vmatprep.mubr.f32.mxu0 %v15177_v3 }
  0x47   : > { %454 = vmatmul.mubr.f32.gmra.mrb[20].mxu1 %v15477_v2  ;;  %v15515_v43 = vsub.f32 %v263_v16, %v15501_v57  ;;  %v496_v37 = vsub.f32 %v15499_v32, %v15512_v29  ;;  %v15533_v16 = vsub.f32 %v15281_v36, %v15304_v45 }
  0x48   : > { %459 = vmatprep.mubr.f32.mxu1 %v15177_v3 }
  0x49   : > { %821 = vmatmul.mubr.f32.gmra.mrb[12].mxu0 %v15345_v60  ;;  %v15521_v60 = vand.u32 4294901760, %v485_v13  ;;  %v15526_v28 = vand.u32 4294901760, %v15515_v43  ;;  %v15536_v13 = vand.u32 4294901760, %v496_v37 }
  0x4a   : > { %826 = vmatprep.mubr.f32.mxu0 %v15177_v3 }
  0x4b   : > { %465 = vmatmul.mubr.f32.gmra.mrb[22].mxu1 %v15494_v27 }
  0x4c   : > { %470 = vmatprep.mubr.f32.mxu1 %v15177_v3 }
  0x4d   : > { %829 = vmatmul.mubr.f32.gmra.mrb[14].mxu0 %v15371_v12  ;;  %v507_v12 = vsub.f32 %v15515_v43, %v15526_v28 }
  0x4e   : > { %834 = vmatprep.mubr.f32.mxu0 %v15177_v3 }
  0x4f   : > { %476 = vmatmul.mubr.f32.gmra.mrb[24].mxu1 %v15507_v49  ;;  %v15547_v36 = vand.u32 4294901760, %v507_v12  ;;  %v17540_v12 = vand.u32 4294901760, %v15220_v7  ;;  %v17543_v7 = vld [vmem:[#allocation4_spill] sm:$0xff] }
  0x50   : > { %481 = vmatprep.mubr.f32.mxu1 %v15177_v3 }
  0x51   : > { %837 = vmatmul.mubr.f32.gmra.mrb[16].mxu0 %v15389_v22  ;;  %v15544_v22 = vand.u32 4294901760, %v15533_v16 }
  0x52   : > { %842 = vmatprep.mubr.f32.mxu0 %v15177_v3 }
  0x53   : > { %487 = vmatmul.mubr.f32.gmra.mrb[26].mxu1 %v15521_v60  ;;  %v1702_v37 = vsub.f32 %v15533_v16, %v15544_v22 }
  0x54   : > { %492 = vmatprep.mubr.f32.mxu1 %v15177_v3 }
  0x55   : > { %845 = vmatmul.mubr.f32.gmra.mrb[18].mxu0 %v15411_v39  ;;  %v1703_v39 = vand.u32 4294901760, %v1702_v37 }
  0x56   : > { %850 = vmatprep.mubr.f32.mxu0 %v15177_v3 }
  0x57   : > { %498 = vmatmul.mubr.f32.gmra.mrb[28].mxu1 %v15536_v13 }
  0x58   : > { %503 = vmatprep.mubr.f32.mxu1 %v15177_v3 }
  0x59   : > { %853 = vmatmul.mubr.f32.gmra.mrb[20].mxu0 %v15431_v55 }
  0x5a   : > { %858 = vmatprep.mubr.f32.mxu0 %v15177_v3 }
  0x5b   : > { %509 = vmatmul.mubr.f32.gmra.mrb[30].mxu1 %v15547_v36 }
  0x5c   : > { %624 = vmatprep.mubr.f32.mxu1 %v15177_v3 }
  0x5d   : > { %861 = vmatmul.mubr.f32.gmra.mrb[22].mxu0 %v15449_v15 }
  0x5e   : > { %866 = vmatprep.mubr.f32.mxu0 %v15177_v3 }
  0x5f   : > { %626 = vmatmul.mubr.f32.vlgmr.msra.gmra.mrb[10].mxu1 %v15306_v46 }
  0x60   : > { %631 = vmatprep.mubr.f32.mxu1 %v15177_v3  ;;  %12874 = vmatpush3.msra.mxu1 %v15304_v45 }
  0x61   : > { %869 = vmatmul.mubr.f32.gmra.mrb[24].mxu0 %v15466_v31  ;;  %12899 = vmatprep.subr.mxu1 %v1703_v39 }
  0x62   : > { %874 = vmatprep.mubr.f32.mxu0 %v15177_v3 }
  0x63   : > { %633 = vmatmul.mubr.f32.gmra.mrb[12].mxu1 %v15325_v53 }
  0x64   : > { %638 = vmatprep.mubr.f32.mxu1 %v15177_v3 }
  0x65   : > { %877 = vmatmul.mubr.f32.gmra.mrb[26].mxu0 %v15474_v58 }
  0x66   : > { %882 = vmatprep.mubr.f32.mxu0 %v15177_v3 }
  0x67   : > { %640 = vmatmul.mubr.f32.gmra.mrb[14].mxu1 %v15355_v0 }
  0x68   : > { %645 = vmatprep.mubr.f32.mxu1 %v15177_v3 }
  0x69   : > { %885 = vmatmul.mubr.f32.gmra.mrb[28].mxu0 %v15499_v32 }
  0x6a   : > { %890 = vmatprep.mubr.f32.mxu0 %v15177_v3 }
  0x6b   : > { %647 = vmatmul.mubr.f32.gmra.mrb[16].mxu1 %v15373_v14 }
  0x6c   : > { %652 = vmatprep.mubr.f32.mxu1 %v15177_v3 }
  0x6d   : > { %893 = vmatmul.mubr.f32.gmra.mrb[30].mxu0 %v15515_v43 }
  0x6e   : > { %965 = vmatprep.mubr.f32.mxu0 %v15177_v3 }
  0x6f   : > { %654 = vmatmul.mubr.f32.gmra.mrb[18].mxu1 %v15391_v23 }
  0x70   : > { %659 = vmatprep.mubr.f32.mxu1 %v15177_v3 }
  0x71   : > { %969 = vmatmul.mubr.f32.vlgmr.msra.gmra.mrb[0].mxu0 %v15275_v34 }
  0x72   : > { %974 = vmatprep.mubr.f32.mxu0 %v15177_v3  ;;  %1117 = vmatpush1.msra.mxu0 %v17540_v12 }
  0x73   : > { %1294 = vmatprep.subr.mxu0 %v15217_v6  ;;  %661 = vmatmul.mubr.f32.gmra.mrb[20].mxu1 %v15413_v40  ;;  %v17542_v6 = vld [vmem:[#allocation3_spill] sm:$0xff] }
  0x74   : > { %666 = vmatprep.mubr.f32.mxu1 %v15177_v3 }
  0x75   : > { %978 = vmatmul.mubr.f32.gmra.mrb[2].mxu0 %v15278_v35 }
  0x76   : > { %983 = vmatprep.mubr.f32.mxu0 %v15177_v3 }
  0x77   : > { %668 = vmatmul.mubr.f32.gmra.mrb[22].mxu1 %v15419_v8 }
  0x78   : > { %673 = vmatprep.mubr.f32.mxu1 %v15177_v3 }
  0x79   : > { %987 = vmatmul.mubr.f32.gmra.mrb[4].mxu0 %v15292_v41 }
  0x7a   : > { %992 = vmatprep.mubr.f32.mxu0 %v15177_v3 }
  0x7b   : > { %675 = vmatmul.mubr.f32.gmra.mrb[24].mxu1 %v15437_v59 }
  0x7c   : > { %680 = vmatprep.mubr.f32.mxu1 %v15177_v3 }
  0x7d   : > { %996 = vmatmul.mubr.f32.gmra.mrb[6].mxu0 %v15316_v50 }
  0x7e   : > { %1001 = vmatprep.mubr.f32.mxu0 %v15177_v3 }
  0x7f   : > { %682 = vmatmul.mubr.f32.gmra.mrb[26].mxu1 %v15455_v17 }
  0x80   : > { %687 = vmatprep.mubr.f32.mxu1 %v15177_v3 }
  0x81   : > { %1005 = vmatmul.mubr.f32.gmra.mrb[8].mxu0 %v15334_v56 }
  0x82   : > { %1010 = vmatprep.mubr.f32.mxu0 %v15177_v3 }
  0x83   : > { %689 = vmatmul.mubr.f32.gmra.mrb[28].mxu1 %v15484_v51 }
  0x84   : > { %694 = vmatprep.mubr.f32.mxu1 %v15177_v3 }
  0x85   : > { %1014 = vmatmul.mubr.f32.gmra.mrb[10].mxu0 %v15353_v63 }
  0x86   : > { %1019 = vmatprep.mubr.f32.mxu0 %v15177_v3 }
  0x87   : > { %696 = vmatmul.mubr.f32.gmra.mrb[30].mxu1 %v15501_v57 }
  0x88   : > { %12875 = vmatprep.mubr.f32.mxu1 %v15299_v44  ;;  %v17544_v44 = vld [vmem:[#allocation5_spill] sm:$0xff] }
  0x89   : > { %1023 = vmatmul.mubr.f32.gmra.mrb[12].mxu0 %v15363_v5 }
  0x8a   : > { %1028 = vmatprep.mubr.f32.mxu0 %v15177_v3 }
  0x8b   : > { %12876 = vmatmul.mubr.f32.vlgmr.msra.gmra.mrb[32].mxu1 %v15311_v48  ;;  %v17545_v48 = vld [vmem:[#allocation6_spill] sm:$0xff] }
  0x8c   : > { %12878 = vmatprep.mubr.f32.mxu1 %v15329_v54  ;;  %12900 = vmatpush3.msra.mxu1 %v1703_v39  ;;  %v17546_v54 = vld [vmem:[#allocation7_spill] sm:$0xff] }
  0x8d   : > { %1032 = vmatmul.mubr.f32.gmra.mrb[14].mxu0 %v15386_v21  ;;  %12925 = vmatprep.subr.mxu1 %v15533_v16 }
  0x8e   : > { %1037 = vmatprep.mubr.f32.mxu0 %v15177_v3 }
  0x8f   : > { %12879 = vmatmul.mubr.f32.gmra.mrb[34].mxu1 %v15348_v61  ;;  %v17548_v61 = vld [vmem:[#allocation9_spill] sm:$0xff] }
  0x90   : > { %12881 = vmatprep.mubr.f32.mxu1 %v15366_v10  ;;  %v17549_v10 = vld [vmem:[#allocation10_spill] sm:$0xff] }
  0x91   : > { %1041 = vmatmul.mubr.f32.gmra.mrb[16].mxu0 %v15408_v38 }
  0x92   : > { %1046 = vmatprep.mubr.f32.mxu0 %v15177_v3 }
  0x93   : > { %12882 = vmatmul.mubr.f32.gmra.mrb[36].mxu1 %v15383_v20  ;;  %v17550_v20 = vld [vmem:[#allocation11_spill] sm:$0xff] }
  0x94   : > { %12884 = vmatprep.mubr.f32.mxu1 %v15399_v30 }
  0x95   : > { %1050 = vmatmul.mubr.f32.gmra.mrb[18].mxu0 %v15428_v52 }
  0x96   : > { %1055 = vmatprep.mubr.f32.mxu0 %v15177_v3 }
  0x97   : > { %12885 = vmatmul.mubr.f32.gmra.mrb[38].mxu1 %v15423_v47 }
  0x98   : > { %12887 = vmatprep.mubr.f32.mxu1 %v15441_v1 }
  0x99   : > { %1059 = vmatmul.mubr.f32.gmra.mrb[20].mxu0 %v15446_v11 }
  0x9a   : > { %1064 = vmatprep.mubr.f32.mxu0 %v15177_v3 }
  0x9b   : > { %12888 = vmatmul.mubr.f32.gmra.mrb[40].mxu1 %v15458_v26 }
  0x9c   : > { %12890 = vmatprep.mubr.f32.mxu1 %v15477_v2 }
  0x9d   : > { %1068 = vmatmul.mubr.f32.gmra.mrb[22].mxu0 %v15463_v33 }
  0x9e   : > { %1073 = vmatprep.mubr.f32.mxu0 %v15177_v3 }
  0x9f   : > { %12891 = vmatmul.mubr.f32.gmra.mrb[42].mxu1 %v15494_v27 }
  0xa0   : > { %12893 = vmatprep.mubr.f32.mxu1 %v15507_v49 }
  0xa1   : > { %1077 = vmatmul.mubr.f32.gmra.mrb[24].mxu0 %v15482_v9 }
  0xa2   : > { %1082 = vmatprep.mubr.f32.mxu0 %v15177_v3 }
  0xa3   : > { %12894 = vmatmul.mubr.f32.gmra.mrb[44].mxu1 %v15521_v60  ;;  %v17547_v60 = vld [vmem:[#allocation8_spill] sm:$0xff] }
  0xa4   : > { %12896 = vmatprep.mubr.f32.mxu1 %v15536_v13 }
  0xa5   : > { %1086 = vmatmul.mubr.f32.gmra.mrb[26].mxu0 %v15491_v62 }
  0xa6   : > { %1091 = vmatprep.mubr.f32.mxu0 %v15177_v3 }
  0xa7   : > { %12897 = vmatmul.mubr.f32.gmra.mrb[46].mxu1 %v15547_v36 }
  0xa8   : > { %12901 = vmatprep.mubr.f32.mxu1 %v15246_v18 }
  0xa9   : > { %1095 = vmatmul.mubr.f32.gmra.mrb[28].mxu0 %v15512_v29 }
  0xaa   : > { %1100 = vmatprep.mubr.f32.mxu0 %v15177_v3 }
  0xab   : > { %12902 = vmatmul.mubr.f32.vlgmr.msra.gmra.mrb[32].mxu1 %v15248_v19 }
  0xac   : > { %12904 = vmatprep.mubr.f32.mxu1 %v15256_v24  ;;  %12926 = vmatpush3.msra.mxu1 %v15533_v16 }
  0xad   : > { %1104 = vmatmul.mubr.f32.gmra.mrb[30].mxu0 %v15526_v28  ;;  %12951 = vmatprep.subr.mxu1 %v15304_v45 }
  0xae   : > { %1180 = vmatprep.mubr.f32.mxu0 %v15177_v3 }
  0xaf   : > { %12905 = vmatmul.mubr.f32.gmra.mrb[34].mxu1 %v15258_v25 }
  0xb0   : > { %12907 = vmatprep.mubr.f32.mxu1 %v15294_v42 }
  0xb1   : > { %1182 = vmatmul.mubr.f32.vlgmr.msra.gmra.mrb[0].mxu0 %v15246_v18 }
  0xb2   : > { %1187 = vmatprep.mubr.f32.mxu0 %v15177_v3  ;;  %1296 = vmatpush1.msra.mxu0 %v15212_v4  ;;  %v17541_v4 = vld [vmem:[#allocation2_spill] sm:$0xff] }
  0xb3   : > { %12908 = vmatmul.mubr.f32.gmra.mrb[36].mxu1 %v15306_v46 }
  0xb4   : > { %12910 = vmatprep.mubr.f32.mxu1 %v15325_v53 }
  0xb5   : > { %1189 = vmatmul.mubr.f32.gmra.mrb[2].mxu0 %v15248_v19 }
  0xb6   : > { %1194 = vmatprep.mubr.f32.mxu0 %v15177_v3 }
  0xb7   : > { %12911 = vmatmul.mubr.f32.gmra.mrb[38].mxu1 %v15355_v0 }
  0xb8   : > { %12913 = vmatprep.mubr.f32.mxu1 %v15373_v14 }
  0xb9   : > { %1196 = vmatmul.mubr.f32.gmra.mrb[4].mxu0 %v15256_v24 }
  0xba   : > { %1201 = vmatprep.mubr.f32.mxu0 %v15177_v3 }
  0xbb   : > { %12914 = vmatmul.mubr.f32.gmra.mrb[40].mxu1 %v15391_v23 }
  0xbc   : > { %12916 = vmatprep.mubr.f32.mxu1 %v15413_v40 }
  0xbd   : > { %1203 = vmatmul.mubr.f32.gmra.mrb[6].mxu0 %v15258_v25 }
  0xbe   : > { %1208 = vmatprep.mubr.f32.mxu0 %v15177_v3 }
  0xbf   : > { %12917 = vmatmul.mubr.f32.gmra.mrb[42].mxu1 %v15419_v8 }
  0xc0   : > { %12919 = vmatprep.mubr.f32.mxu1 %v15437_v59 }
  0xc1   : > { %1210 = vmatmul.mubr.f32.gmra.mrb[8].mxu0 %v15294_v42 }
  0xc2   : > { %1215 = vmatprep.mubr.f32.mxu0 %v15177_v3 }
  0xc3   : > { %12920 = vmatmul.mubr.f32.gmra.mrb[44].mxu1 %v15455_v17 }
  0xc4   : > { %12922 = vmatprep.mubr.f32.mxu1 %v15484_v51 }
  0xc5   : > { %1217 = vmatmul.mubr.f32.gmra.mrb[10].mxu0 %v15306_v46 }
  0xc6   : > { %1222 = vmatprep.mubr.f32.mxu0 %v15177_v3 }
  0xc7   : > { %12923 = vmatmul.mubr.f32.gmra.mrb[46].mxu1 %v15501_v57 }
  0xc8   : > { %12927 = vmatprep.mubr.f32.mxu1 %v17541_v4 }
  0xc9   : > { %1224 = vmatmul.mubr.f32.gmra.mrb[12].mxu0 %v15325_v53 }
  0xca   : > { %1229 = vmatprep.mubr.f32.mxu0 %v15177_v3 }
  0xcb   : > { %12928 = vmatmul.mubr.f32.vlgmr.msra.gmra.mrb[32].mxu1 %v17542_v6 }
  0xcc   : > { %12930 = vmatprep.mubr.f32.mxu1 %v17543_v7  ;;  %12952 = vmatpush3.msra.mxu1 %v15304_v45 }
  0xcd   : > { %1231 = vmatmul.mubr.f32.gmra.mrb[14].mxu0 %v15355_v0  ;;  %12977 = vmatprep.subr.mxu1 %v15544_v22 }
  0xce   : > { %1236 = vmatprep.mubr.f32.mxu0 %v15177_v3 }
  0xcf   : > { %12931 = vmatmul.mubr.f32.gmra.mrb[34].mxu1 %v17544_v44 }
  0xd0   : > { %12933 = vmatprep.mubr.f32.mxu1 %v17545_v48 }
  0xd1   : > { %1238 = vmatmul.mubr.f32.gmra.mrb[16].mxu0 %v15373_v14 }
  0xd2   : > { %1243 = vmatprep.mubr.f32.mxu0 %v15177_v3 }
  0xd3   : > { %12934 = vmatmul.mubr.f32.gmra.mrb[36].mxu1 %v17546_v54 }
  0xd4   : > { %12936 = vmatprep.mubr.f32.mxu1 %v17547_v60 }
  0xd5   : > { %1245 = vmatmul.mubr.f32.gmra.mrb[18].mxu0 %v15391_v23 }
  0xd6   : > { %1250 = vmatprep.mubr.f32.mxu0 %v15177_v3 }
  0xd7   : > { %12937 = vmatmul.mubr.f32.gmra.mrb[38].mxu1 %v17548_v61 }
  0xd8   : > { %12939 = vmatprep.mubr.f32.mxu1 %v17549_v10 }
  0xd9   : > { %1252 = vmatmul.mubr.f32.gmra.mrb[20].mxu0 %v15413_v40 }
  0xda   : > { %1257 = vmatprep.mubr.f32.mxu0 %v15177_v3 }
  0xdb   : > { %12940 = vmatmul.mubr.f32.gmra.mrb[40].mxu1 %v17550_v20 }
  0xdc   : > { %12942 = vmatprep.mubr.f32.mxu1 %v15431_v55 }
  0xdd   : > { %1259 = vmatmul.mubr.f32.gmra.mrb[22].mxu0 %v15419_v8 }
  0xde   : > { %1264 = vmatprep.mubr.f32.mxu0 %v15177_v3 }
  0xdf   : > { %12943 = vmatmul.mubr.f32.gmra.mrb[42].mxu1 %v15449_v15 }
  0xe0   : > { %12945 = vmatprep.mubr.f32.mxu1 %v15466_v31 }
  0xe1   : > { %1266 = vmatmul.mubr.f32.gmra.mrb[24].mxu0 %v15437_v59 }
  0xe2   : > { %1271 = vmatprep.mubr.f32.mxu0 %v15177_v3 }
  0xe3   : > { %12946 = vmatmul.mubr.f32.gmra.mrb[44].mxu1 %v15474_v58 }
  0xe4   : > { %12948 = vmatprep.mubr.f32.mxu1 %v15499_v32 }
  0xe5   : > { %1273 = vmatmul.mubr.f32.gmra.mrb[26].mxu0 %v15455_v17 }
  0xe6   : > { %1278 = vmatprep.mubr.f32.mxu0 %v15177_v3 }
  0xe7   : > { %12949 = vmatmul.mubr.f32.gmra.mrb[46].mxu1 %v15515_v43 }
  0xe8   : > { %12953 = vmatprep.mubr.f32.mxu1 %v15275_v34 }
  0xe9   : > { %1280 = vmatmul.mubr.f32.gmra.mrb[28].mxu0 %v15484_v51 }
  0xea   : > { %1285 = vmatprep.mubr.f32.mxu0 %v15177_v3 }
  0xeb   : > { %12954 = vmatmul.mubr.f32.vlgmr.msra.gmra.mrb[32].mxu1 %v15278_v35 }
  0xec   : > { %12956 = vmatprep.mubr.f32.mxu1 %v15292_v41  ;;  %12978 = vmatpush3.msra.mxu1 %v15544_v22 }
  0xed   : > { %1287 = vmatmul.mubr.f32.gmra.mrb[30].mxu0 %v15501_v57  ;;  %13003 = vmatprep.subr.mxu1 %v15304_v45 }
  0xee   : > { %1359 = vmatprep.mubr.f32.mxu0 %v15177_v3 }
  0xef   : > { %12957 = vmatmul.mubr.f32.gmra.mrb[34].mxu1 %v15316_v50 }
  0xf0   : > { %12959 = vmatprep.mubr.f32.mxu1 %v15334_v56 }
  0xf1   : > { %1361 = vmatmul.mubr.f32.vlgmr.msra.gmra.mrb[0].mxu0 %v15246_v18 }
  0xf2   : > { %1366 = vmatprep.mubr.f32.mxu0 %v15177_v3  ;;  %v15718_v32 = vpop.f32.mrb[0].mxu1 }
  0xf3   : > { %12960 = vmatmul.mubr.f32.gmra.mrb[36].mxu1 %v15353_v63  ;;  %v15721_v34 = vpop.f32.mrb[1].mxu1 }
  0xf4   : > { %12962 = vmatprep.mubr.f32.mxu1 %v15363_v5 }
  0xf5   : > { %1368 = vmatmul.mubr.f32.gmra.mrb[2].mxu0 %v15248_v19 }
  0xf6   : > { %1373 = vmatprep.mubr.f32.mxu0 %v15177_v3  ;;  %v15726_v35 = vpop.f32.mrb[2].mxu1 }
  0xf7   : > { %12963 = vmatmul.mubr.f32.gmra.mrb[38].mxu1 %v15386_v21  ;;  %v15729_v41 = vpop.f32.mrb[3].mxu1 }
  0xf8   : > { %12965 = vmatprep.mubr.f32.mxu1 %v15408_v38 }
  0xf9   : > { %1375 = vmatmul.mubr.f32.gmra.mrb[4].mxu0 %v15256_v24 }
  0xfa   : > { %1380 = vmatprep.mubr.f32.mxu0 %v15177_v3  ;;  %v15734_v50 = vpop.f32.mrb[4].mxu1 }
  0xfb   : > { %12966 = vmatmul.mubr.f32.gmra.mrb[40].mxu1 %v15428_v52  ;;  %v15737_v56 = vpop.f32.mrb[5].mxu1 }
  0xfc   : > { %12968 = vmatprep.mubr.f32.mxu1 %v15446_v11 }
  0xfd   : > { %1382 = vmatmul.mubr.f32.gmra.mrb[6].mxu0 %v15258_v25 }
  0xfe   : > { %1387 = vmatprep.mubr.f32.mxu0 %v15177_v3  ;;  %v15742_v63 = vpop.f32.mrb[6].mxu1 }
  0xff   : > { %12969 = vmatmul.mubr.f32.gmra.mrb[42].mxu1 %v15463_v33  ;;  %v15745_v5 = vpop.f32.mrb[7].mxu1 }
 0x100   : > { %12971 = vmatprep.mubr.f32.mxu1 %v15482_v9 }
 0x101   : > { %1389 = vmatmul.mubr.f32.gmra.mrb[8].mxu0 %v15294_v42 }
 0x102   : > { %1394 = vmatprep.mubr.f32.mxu0 %v15177_v3  ;;  %v15750_v21 = vpop.f32.mrb[8].mxu1 }
 0x103   : > { %12972 = vmatmul.mubr.f32.gmra.mrb[44].mxu1 %v15491_v62  ;;  %v15753_v22 = vpop.f32.mrb[9].mxu1 }
 0x104   : > { %12974 = vmatprep.mubr.f32.mxu1 %v15512_v29 }
 0x105   : > { %1396 = vmatmul.mubr.f32.gmra.mrb[10].mxu0 %v15306_v46 }
 0x106   : > { %1401 = vmatprep.mubr.f32.mxu0 %v15177_v3 }
 0x107   : > { %12975 = vmatmul.mubr.f32.gmra.mrb[46].mxu1 %v15526_v28 }
 0x108   : > { %12979 = vmatprep.mubr.f32.mxu1 %v15246_v18 }
 0x109   : > { %1403 = vmatmul.mubr.f32.gmra.mrb[12].mxu0 %v15325_v53 }
 0x10a   : > { %1408 = vmatprep.mubr.f32.mxu0 %v15177_v3 }
 0x10b   : > { %12980 = vmatmul.mubr.f32.vlgmr.msra.gmra.mrb[32].mxu1 %v15248_v19 }
 0x10c   : > { %12982 = vmatprep.mubr.f32.mxu1 %v15256_v24  ;;  %13004 = vmatpush3.msra.mxu1 %v15304_v45 }
 0x10d   : > { %1410 = vmatmul.mubr.f32.gmra.mrb[14].mxu0 %v15355_v0 }
 0x10e   : > { %1415 = vmatprep.mubr.f32.mxu0 %v15177_v3 }
 0x10f   : > { %12983 = vmatmul.mubr.f32.gmra.mrb[34].mxu1 %v15258_v25 }
 0x110   : > { %12985 = vmatprep.mubr.f32.mxu1 %v15294_v42 }
 0x111   : > { %1417 = vmatmul.mubr.f32.gmra.mrb[16].mxu0 %v15373_v14 }
 0x112   : > { %1422 = vmatprep.mubr.f32.mxu0 %v15177_v3 }
 0x113   : > { %12986 = vmatmul.mubr.f32.gmra.mrb[36].mxu1 %v15306_v46 }
 0x114   : > { %12988 = vmatprep.mubr.f32.mxu1 %v15325_v53 }
 0x115   : > { %1424 = vmatmul.mubr.f32.gmra.mrb[18].mxu0 %v15391_v23 }
 0x116   : > { %1429 = vmatprep.mubr.f32.mxu0 %v15177_v3 }
 0x117   : > { %12989 = vmatmul.mubr.f32.gmra.mrb[38].mxu1 %v15355_v0 }
 0x118   : > { %12991 = vmatprep.mubr.f32.mxu1 %v15373_v14 }
 0x119   : > { %1431 = vmatmul.mubr.f32.gmra.mrb[20].mxu0 %v15413_v40 }
 0x11a   : > { %1436 = vmatprep.mubr.f32.mxu0 %v15177_v3 }
 0x11b   : > { %12992 = vmatmul.mubr.f32.gmra.mrb[40].mxu1 %v15391_v23 }
 0x11c   : > { %12994 = vmatprep.mubr.f32.mxu1 %v15413_v40 }
 0x11d   : > { %1438 = vmatmul.mubr.f32.gmra.mrb[22].mxu0 %v15419_v8 }
 0x11e   : > { %1443 = vmatprep.mubr.f32.mxu0 %v15177_v3 }
 0x11f   : > { %12995 = vmatmul.mubr.f32.gmra.mrb[42].mxu1 %v15419_v8 }
 0x120   : > { %12997 = vmatprep.mubr.f32.mxu1 %v15437_v59 }
 0x121   : > { %1445 = vmatmul.mubr.f32.gmra.mrb[24].mxu0 %v15437_v59 }
 0x122   : > { %1450 = vmatprep.mubr.f32.mxu0 %v15177_v3 }
 0x123   : > { %12998 = vmatmul.mubr.f32.gmra.mrb[44].mxu1 %v15455_v17 }
 0x124   : > { %13000 = vmatprep.mubr.f32.mxu1 %v15484_v51 }
 0x125   : > { %1452 = vmatmul.mubr.f32.gmra.mrb[26].mxu0 %v15455_v17 }
 0x126   : > { %1457 = vmatprep.mubr.f32.mxu0 %v15177_v3 }
 0x127   : > { %13001 = vmatmul.mubr.f32.gmra.mrb[46].mxu1 %v15501_v57 }
 0x128   : > { %13005 = vmatprep.mubr.f32.mxu1 %v15246_v18 }
 0x129   : > { %1459 = vmatmul.mubr.f32.gmra.mrb[28].mxu0 %v15484_v51 }
 0x12a   : > { %1464 = vmatprep.mubr.f32.mxu0 %v15177_v3 }
 0x12b   : > { %13006 = vmatmul.mubr.f32.vlgmr.msra.gmra.mrb[32].mxu1 %v15248_v19 }
 0x12c   : > { %13008 = vmatprep.mubr.f32.mxu1 %v15256_v24 }
 0x12d   : > { %1466 = vmatmul.mubr.f32.gmra.mrb[30].mxu0 %v15501_v57 }
 0x12f   : > { %13009 = vmatmul.mubr.f32.gmra.mrb[34].mxu1 %v15258_v25 }
 0x130   : > { %13011 = vmatprep.mubr.f32.mxu1 %v15294_v42 }
 0x132   : > { %v15800_v9 = vpop.f32.mrb[10].mxu1 }
 0x133   : > { %13012 = vmatmul.mubr.f32.gmra.mrb[36].mxu1 %v15306_v46  ;;  %v15803_v28 = vpop.f32.mrb[11].mxu1 }
 0x134   : > { %13014 = vmatprep.mubr.f32.mxu1 %v15325_v53 }
 0x136   : > { %v15806_v18 = vpop.f32.mrb[12].mxu1 }
 0x137   : > { %13015 = vmatmul.mubr.f32.gmra.mrb[38].mxu1 %v15355_v0  ;;  %v15809_v3 = vpop.f32.mrb[13].mxu1 }
 0x138   : > { %13017 = vmatprep.mubr.f32.mxu1 %v15373_v14 }
 0x13a   : > { %v15812_v19 = vpop.f32.mrb[14].mxu1 }
 0x13b   : > { %13018 = vmatmul.mubr.f32.gmra.mrb[40].mxu1 %v15391_v23  ;;  %v15815_v24 = vpop.f32.mrb[15].mxu1 }
 0x13c   : > { %13020 = vmatprep.mubr.f32.mxu1 %v15413_v40 }
 0x13e   : > { %v15818_v25 = vpop.f32.mrb[16].mxu1 }
 0x13f   : > { %13021 = vmatmul.mubr.f32.gmra.mrb[42].mxu1 %v15419_v8  ;;  %v15821_v29 = vpop.f32.mrb[17].mxu1 }
 0x140   : > { %13023 = vmatprep.mubr.f32.mxu1 %v15437_v59 }
 0x142   : > { %v15824_v42 = vpop.f32.mrb[18].mxu1 }
 0x143   : > { %13024 = vmatmul.mubr.f32.gmra.mrb[44].mxu1 %v15455_v17  ;;  %v15827_v45 = vpop.f32.mrb[19].mxu1 }
 0x144   : > { %13026 = vmatprep.mubr.f32.mxu1 %v15484_v51 }
 0x146   : > { %v15830_v46 = vpop.f32.mrb[20].mxu1 }
 0x147   : > { %13027 = vmatmul.mubr.f32.gmra.mrb[46].mxu1 %v15501_v57  ;;  %v15833_v53 = vpop.f32.mrb[21].mxu1 }
 0x14a   : > { %v15835_v0 = vpop.f32.mrb[22].mxu1 }
 0x14b   : > { %v15837_v14 = vpop.f32.mrb[23].mxu1 }
 0x14e   : > { %v15839_v23 = vpop.f32.mrb[24].mxu1 }
 0x14f   : > { %v15841_v30 = vpop.f32.mrb[25].mxu1 }
 0x152   : > { %v15843_v38 = vpop.f32.mrb[26].mxu1 }
 0x153   : > { %v15845_v39 = vpop.f32.mrb[27].mxu1 }
 0x156   : > { %v15847_v40 = vpop.f32.mrb[28].mxu1 }
 0x157   : > { %v15849_v51 = vpop.f32.mrb[29].mxu1 }
 0x15a   : > { %v15851_v8 = vpop.f32.mrb[30].mxu1 }
 0x15b   : > { %v15853_v57 = vpop.f32.mrb[31].mxu1 }
 0x1c4   : > { %v1362_v47 = vpop.f32.mrb[0].mxu0 }
 0x1c5   : > { %v14615_v52 = vadd.f32 %v1362_v47, %v15718_v32  ;;  %v1364_v55 = vpop.f32.mrb[1].mxu0 }
 0x1c6   : > { %v14616_v59 = vadd.f32 %v1364_v55, %v15721_v34 }
 0x1c7   : > { %v15857_v1 = vand.u32 4294901760, %v14615_v52 }
 0x1c8   : > { %v2564_v11 = vand.u32 4294901760, %v14616_v59  ;;  %v1369_v15 = vpop.f32.mrb[2].mxu0 }
 0x1c9   : > { %v15860_v17 = vsub.f32 %v14615_v52, %v15857_v1  ;;  %v14617_v26 = vadd.f32 %v1369_v15, %v15726_v35  ;;  %v1371_v33 = vpop.f32.mrb[3].mxu0 }
 0x1ca   : > { %v2652_v31 = vsub.f32 %v14616_v59, %v2564_v11  ;;  %v14618_v58 = vadd.f32 %v1371_v33, %v15729_v41 }
 0x1cb   : > { %v15864_v2 = vand.u32 4294901760, %v14617_v26  ;;  %v2632_v62 = vand.u32 4294901760, %v15860_v17 }
 0x1cc   : > { %v2653_v27 = vand.u32 4294901760, %v2652_v31  ;;  %v2567_v49 = vand.u32 4294901760, %v14618_v58  ;;  %v1376_v43 = vpop.f32.mrb[4].mxu0 }
 0x1cd   : > { %v15868_v16 = vsub.f32 %v14617_v26, %v15864_v2  ;;  %v15871_v13 = vadd.f32 %v1376_v43, %v15734_v50  ;;  %v1378_v36 = vpop.f32.mrb[5].mxu0  ;;  %v2633_v37 = vsub.f32 %v15860_v17, %v2632_v62 }
 0x1ce   : > { %v15876_v12 = vpack.c.bf16 %v2567_v49, %v2564_v11  ;;  %v2659_v4 = vsub.f32 %v14618_v58, %v2567_v49  ;;  %v14620_v6 = vadd.f32 %v1378_v36, %v15737_v56  ;;  %v2654_v61 = vsub.f32 %v2652_v31, %v2653_v27 }
 0x1cf   : > { %v2642_v7 = vand.u32 4294901760, %v15868_v16  ;;  %v2634_v44 = vand.u32 4294901760, %v2633_v37 }
 0x1d0   : > { %v2660_v48 = vand.u32 4294901760, %v2659_v4  ;;  %v3066_v54 = vand.u32 4294901760, %v14620_v6  ;;  %v1383_v60 = vpop.f32.mrb[6].mxu0  ;;  %14038 = vmatprep.subr.bf16.mxu1 %v15876_v12  ;;  %v14045_v10 = vpack.c.bf16 %v2659_v4, %v2652_v31  ;;  %v2655_v59 = vand.u32 4294901760, %v2654_v61 }
 0x1d1   : > { %v2643_v20 = vsub.f32 %v15868_v16, %v2642_v7  ;;  %v15885_v32 = vadd.f32 %v1383_v60, %v15742_v63  ;;  %v1385_v34 = vpop.f32.mrb[7].mxu0  ;;  %14040 = vmatpush3.bf16.xpose.msra.mxu1 %v15876_v12  ;;  %13033 = vmatprep.mubr.f32.mxu1 %v2634_v44 }
 0x1d2   : > { %v3154_v35 = vsub.f32 %v14620_v6, %v3066_v54  ;;  %v14622_v41 = vadd.f32 %v1385_v34, %v15745_v5  ;;  %v2661_v50 = vsub.f32 %v2659_v4, %v2660_v48  ;;  %v15889_v56 = vpack.c.bf16 %v2660_v48, %v2653_v27 }
 0x1d3   : > { %v2644_v15 = vand.u32 4294901760, %v2643_v20 }
 0x1d4   : > { %v3155_v47 = vand.u32 4294901760, %v3154_v35  ;;  %v3069_v52 = vand.u32 4294901760, %v14622_v41  ;;  %v1390_v55 = vpop.f32.mrb[8].mxu0  ;;  %v2662_v11 = vand.u32 4294901760, %v2661_v50 }
 0x1d5   : > { %v15892_v26 = vadd.f32 %v1390_v55, %v15750_v21  ;;  %v1392_v63 = vpop.f32.mrb[9].mxu0 }
 0x1d6   : > { %v15894_v33 = vpack.c.bf16 %v3069_v52, %v3066_v54  ;;  %v3161_v31 = vsub.f32 %v14622_v41, %v3069_v52  ;;  %v14624_v58 = vadd.f32 %v1392_v63, %v15753_v22  ;;  %v14041_v49 = vpack.c.bf16 %v2662_v11, %v2655_v59 }
 0x1d7   : > { %v3156_v36 = vsub.f32 %v3154_v35, %v3155_v47 }
 0x1d8   : > { %v3162_v5 = vand.u32 4294901760, %v3161_v31  ;;  %v3568_v43 = vand.u32 4294901760, %v14624_v58  ;;  %v1397_v27 = vpop.f32.mrb[10].mxu0  ;;  %13034 = vmatmul.mubr.f32.vlgmr.msra.gmra.mrb[48].mxu1 %v2644_v15  ;;  %14042 = vmatprep.subr.bf16.mxu1 %v14041_v49  ;;  %v15897_v37 = vpack.c.bf16 %v3161_v31, %v3154_v35 }
 0x1d9   : > { %v15900_v4 = vadd.f32 %v1397_v27, %v15800_v9  ;;  %v1399_v21 = vpop.f32.mrb[11].mxu0  ;;  %14044 = vmatpush3.bf16.xpose.msra.mxu1 %v14041_v49  ;;  %13040 = vmatprep.mubr.f32.mxu1 %v15857_v1  ;;  %v3157_v20 = vand.u32 4294901760, %v3156_v36 }
 0x1da   : > { %v3656_v6 = vsub.f32 %v14624_v58, %v3568_v43  ;;  %v14626_v44 = vadd.f32 %v1399_v21, %v15803_v28  ;;  %14046 = vmatprep.subr.bf16.mxu1 %v14045_v10  ;;  %v3163_v22 = vsub.f32 %v3161_v31, %v3162_v5  ;;  %v15904_v48 = vpack.c.bf16 %v3162_v5, %v3155_v47 }
 0x1dc   : > { %v3657_v54 = vand.u32 4294901760, %v3656_v6  ;;  %v3571_v60 = vand.u32 4294901760, %v14626_v44  ;;  %v1404_v61 = vpop.f32.mrb[12].mxu0  ;;  %v3164_v34 = vand.u32 4294901760, %v3163_v22 }
 0x1dd   : > { %v15907_v35 = vadd.f32 %v1404_v61, %v15806_v18  ;;  %v1406_v9 = vpop.f32.mrb[13].mxu0 }
 0x1de   : > { %v15909_v41 = vpack.c.bf16 %v3571_v60, %v3568_v43  ;;  %v3663_v50 = vsub.f32 %v14626_v44, %v3571_v60  ;;  %v14628_v52 = vadd.f32 %v1406_v9, %v15809_v3  ;;  %v15912_v55 = vpack.c.bf16 %v3164_v34, %v3157_v20 }
 0x1df   : > { %v3658_v11 = vsub.f32 %v3656_v6, %v3657_v54 }
 0x1e0   : > { %v3664_v28 = vand.u32 4294901760, %v3663_v50  ;;  %v4070_v59 = vand.u32 4294901760, %v14628_v52  ;;  %v1411_v47 = vpop.f32.mrb[14].mxu0  ;;  %13041 = vmatmul.mubr.f32.vlgmr.msra.gmra.mrb[48].mxu1 %v15864_v2  ;;  %v15915_v15 = vpack.c.bf16 %v3663_v50, %v3656_v6 }
 0x1e1   : > { %v15918_v63 = vadd.f32 %v1411_v47, %v15812_v19  ;;  %v1413_v18 = vpop.f32.mrb[15].mxu0  ;;  %14048 = vmatpush3.bf16.xpose.msra.mxu1 %v14045_v10  ;;  %13047 = vmatprep.mubr.f32.mxu1 %v15860_v17  ;;  %v3659_v27 = vand.u32 4294901760, %v3658_v11 }
 0x1e2   : > { %v4158_v31 = vsub.f32 %v14628_v52, %v4070_v59  ;;  %v14630_v3 = vadd.f32 %v1413_v18, %v15815_v24  ;;  %14050 = vmatprep.subr.bf16.mxu1 %v15876_v12  ;;  %v3665_v58 = vsub.f32 %v3663_v50, %v3664_v28  ;;  %v15923_v49 = vpack.c.bf16 %v3664_v28, %v3657_v54 }
 0x1e4   : > { %v4073_v5 = vand.u32 4294901760, %v14630_v3  ;;  %v1418_v43 = vpop.f32.mrb[16].mxu0  ;;  %v3666_v36 = vand.u32 4294901760, %v3665_v58  ;;  %v4159_v21 = vand.u32 4294901760, %v4158_v31 }
 0x1e5   : > { %v14631_v19 = vadd.f32 %v1418_v43, %v15818_v25  ;;  %v1420_v6 = vpop.f32.mrb[17].mxu0 }
 0x1e6   : > { %v15926_v44 = vpack.c.bf16 %v4073_v5, %v4070_v59  ;;  %v4165_v10 = vsub.f32 %v14630_v3, %v4073_v5  ;;  %v14632_v22 = vadd.f32 %v1420_v6, %v15821_v29  ;;  %v15929_v60 = vpack.c.bf16 %v3666_v36, %v3659_v27 }
 0x1e7   : > { %v15931_v24 = vand.u32 4294901760, %v14631_v19  ;;  %v4160_v29 = vsub.f32 %v4158_v31, %v4159_v21 }
 0x1e8   : > { %17551 = vst [vmem:[#allocation2_spill] sm:$0xff] %v15926_v44  ;;  %v4166_v61 = vand.u32 4294901760, %v4165_v10  ;;  %v4572_v54 = vand.u32 4294901760, %v14632_v22  ;;  %v1425_v20 = vpop.f32.mrb[18].mxu0  ;;  %13048 = vmatmul.mubr.f32.vlgmr.msra.gmra.mrb[48].mxu1 %v15868_v16  ;;  %v15934_v34 = vpack.c.bf16 %v4165_v10, %v4158_v31 }
 0x1e9   : > { %v15937_v9 = vsub.f32 %v14631_v19, %v15931_v24  ;;  %v14633_v25 = vadd.f32 %v1425_v20, %v15824_v42  ;;  %v1427_v50 = vpop.f32.mrb[19].mxu0  ;;  %14052 = vmatpush3.bf16.xpose.msra.mxu1 %v15876_v12  ;;  %13054 = vmatprep.mubr.f32.mxu1 %v2632_v62  ;;  %v4161_v43 = vand.u32 4294901760, %v4160_v29  ;;  %v15963_v19 = vand.u32 4294901760, %v15871_v13 }
 0x1ea   : > { %17552 = vst [vmem:[#allocation3_spill] sm:$0xff] %v15934_v34  ;;  %v4660_v52 = vsub.f32 %v14632_v22, %v4572_v54  ;;  %v14634_v28 = vadd.f32 %v1427_v50, %v15827_v45  ;;  %14054 = vmatprep.subr.bf16.mxu1 %v15889_v56  ;;  %v4167_v59 = vsub.f32 %v4165_v10, %v4166_v61 }
 0x1eb   : > { %v15945_v47 = vpack.c.bf16 %v4166_v61, %v4159_v21  ;;  %v15947_v11 = vand.u32 4294901760, %v14633_v25  ;;  %v17458_v18 = vand.u32 4294901760, %v15937_v9 }
 0x1ec   : > { %v4661_v42 = vand.u32 4294901760, %v4660_v52  ;;  %v4575_v3 = vand.u32 4294901760, %v14634_v28  ;;  %v1432_v58 = vpop.f32.mrb[20].mxu0  ;;  %v4168_v5 = vand.u32 4294901760, %v4167_v59 }
 0x1ed   : > { %17553 = vst [vmem:[#allocation4_spill] sm:$0xff] %v15945_v47  ;;  %v15951_v17 = vsub.f32 %v14633_v25, %v15947_v11  ;;  %v15954_v62 = vadd.f32 %v1432_v58, %v15830_v46  ;;  %v1434_v45 = vpop.f32.mrb[21].mxu0  ;;  %v4641_v31 = vsub.f32 %v15937_v9, %v17458_v18 }
 0x1ee   : > { %v15959_v27 = vpack.c.bf16 %v4575_v3, %v4572_v54  ;;  %v4667_v36 = vsub.f32 %v14634_v28, %v4575_v3  ;;  %v14636_v21 = vadd.f32 %v1434_v45, %v15833_v53  ;;  %v15966_v22 = vpack.c.bf16 %v4168_v5, %v4161_v43 }
 0x1ef   : > { %17554 = vst [vmem:[#allocation5_spill] sm:$0xff] %v15954_v62  ;;  %v17455_v6 = vand.u32 4294901760, %v15951_v17  ;;  %v4642_v10 = vand.u32 4294901760, %v4641_v31  ;;  %v4662_v54 = vsub.f32 %v4660_v52, %v4661_v42  ;;  %v15974_v53 = vand.u32 4294901760, %v15885_v32 }
 0x1f0   : > { %17555 = vst [vmem:[#allocation6_spill] sm:$0xff] %v15966_v22  ;;  %v4668_v46 = vand.u32 4294901760, %v4667_v36  ;;  %v5074_v61 = vand.u32 4294901760, %v14636_v21  ;;  %v1439_v20 = vpop.f32.mrb[22].mxu0  ;;  %13055 = vmatmul.mubr.f32.vlgmr.msra.gmra.mrb[48].mxu1 %v2642_v7  ;;  %14134 = vmatprep.subr.bf16.mxu0 %v15959_v27  ;;  %v15971_v25 = vpack.c.bf16 %v4667_v36, %v4660_v52 }
 0x1f1   : > { %v15977_v50 = vadd.f32 %v1439_v20, %v15835_v0  ;;  %v1441_v29 = vpop.f32.mrb[23].mxu0  ;;  %14056 = vmatpush3.bf16.xpose.msra.mxu1 %v15889_v56  ;;  %13061 = vmatprep.mubr.f32.mxu1 %v15857_v1  ;;  %v4651_v52 = vsub.f32 %v15951_v17, %v17455_v6  ;;  %v15991_v56 = vsub.f32 %v15871_v13, %v15963_v19  ;;  %v4663_v58 = vand.u32 4294901760, %v4662_v54 }
 0x1f2   : > { %v5162_v28 = vsub.f32 %v14636_v21, %v5074_v61  ;;  %v14638_v16 = vadd.f32 %v1441_v29, %v15837_v14  ;;  %14136 = vmatpush3.bf16.xpose.msra.mxu0 %v15959_v27  ;;  %13201 = vmatprep.mubr.f32.mxu0 %v4642_v10  ;;  %v4669_v7 = vsub.f32 %v4667_v36, %v4668_v46 }
 0x1f3   : > { %17556 = vst [vmem:[#allocation7_spill] sm:$0xff] %v15977_v50  ;;  %14058 = vmatprep.subr.bf16.mxu1 %v15876_v12  ;;  %v15987_v0 = vpack.c.bf16 %v4668_v46, %v4661_v42  ;;  %v15995_v5 = vsub.f32 %v15885_v32, %v15974_v53  ;;  %v4652_v13 = vand.u32 4294901760, %v4651_v52  ;;  %v17454_v32 = vand.u32 4294901760, %v15991_v56 }
 0x1f4   : > { %v5077_v59 = vand.u32 4294901760, %v14638_v16  ;;  %v1446_v3 = vpop.f32.mrb[24].mxu0  ;;  %v4670_v14 = vand.u32 4294901760, %v4669_v7  ;;  %v5163_v45 = vand.u32 4294901760, %v5162_v28 }
 0x1f5   : > { %v14639_v31 = vadd.f32 %v1446_v3, %v15839_v23  ;;  %v1448_v43 = vpop.f32.mrb[25].mxu0  ;;  %v17453_v23 = vand.u32 4294901760, %v15995_v5 }
 0x1f6   : > { %v15998_v36 = vpack.c.bf16 %v5077_v59, %v5074_v61  ;;  %v5169_v42 = vsub.f32 %v14638_v16, %v5077_v59  ;;  %v14640_v21 = vadd.f32 %v1448_v43, %v15841_v30  ;;  %v14137_v10 = vpack.c.bf16 %v4670_v14, %v4663_v58 }
 0x1f7   : > { %v5164_v30 = vsub.f32 %v5162_v28, %v5163_v45  ;;  %v16012_v3 = vand.u32 4294901760, %v14639_v31 }
 0x1f8   : > { %17557 = vst [vmem:[#allocation8_spill] sm:$0xff] %v15998_v36  ;;  %v5170_v46 = vand.u32 4294901760, %v5169_v42  ;;  %v5576_v20 = vand.u32 4294901760, %v14640_v21  ;;  %v1453_v29 = vpop.f32.mrb[26].mxu0  ;;  %13062 = vmatmul.mubr.f32.vlgmr.msra.gmra.mrb[48].mxu1 %v15864_v2  ;;  %14138 = vmatprep.subr.bf16.mxu0 %v14137_v10  ;;  %v16003_v54 = vpack.c.bf16 %v5169_v42, %v5162_v28 }
 0x1f9   : > { %v14641_v61 = vadd.f32 %v1453_v29, %v15843_v38  ;;  %13202 = vmatmul.mubr.f32.vlgmr.msra.gmra.mrb[32].mxu0 %v4652_v13  ;;  %v1455_v16 = vpop.f32.mrb[27].mxu0  ;;  %14060 = vmatpush3.bf16.xpose.msra.mxu1 %v15876_v12 }
 0x1fa   : > { %17558 = vst [vmem:[#allocation9_spill] sm:$0xff] %v16003_v54  ;;  %v16008_v7 = vsub.f32 %v14640_v21, %v5576_v20  ;;  %v14642_v52 = vadd.f32 %v1455_v16, %v15845_v39  ;;  %13068 = vmatprep.mubr.f32.mxu1 %v15857_v1  ;;  %14140 = vmatpush3.bf16.xpose.msra.mxu0 %v14137_v10 }
 0x1fb   : > { %v5171_v59 = vsub.f32 %v5169_v42, %v5170_v46  ;;  %13208 = vmatprep.mubr.f32.mxu0 %v15931_v24  ;;  %14062 = vmatprep.subr.bf16.mxu1 %v15894_v33  ;;  %v16016_v38 = vpack.c.bf16 %v5170_v46, %v5163_v45  ;;  %v3135_v39 = vsub.f32 %v15991_v56, %v17454_v32  ;;  %v5165_v42 = vand.u32 4294901760, %v5164_v30 }
 0x1fc   : > { %v5579_v58 = vand.u32 4294901760, %v14642_v52  ;;  %14142 = vmatprep.subr.bf16.mxu0 %v15971_v25  ;;  %v1460_v12 = vpop.f32.mrb[28].mxu0  ;;  %v3145_v1 = vsub.f32 %v15995_v5, %v17453_v23  ;;  %v17457_v45 = vand.u32 4294901760, %v16008_v7  ;;  %v16035_v46 = vsub.f32 %v14639_v31, %v16012_v3 }
 0x1fd   : > { %17559 = vst [vmem:[#allocation10_spill] sm:$0xff] %v16016_v38  ;;  %v5172_v28 = vand.u32 4294901760, %v5171_v59  ;;  %v16026_v14 = vadd.f32 %v1460_v12, %v15847_v40  ;;  %v1462_v43 = vpop.f32.mrb[29].mxu0  ;;  %v16039_v59 = vand.u32 4294901760, %v14641_v61  ;;  %v16090_v38 = vand.u32 4294901760, %v15892_v26 }
 0x1fe   : > { %v16029_v21 = vpack.c.bf16 %v5579_v58, %v5576_v20  ;;  %v16031_v10 = vsub.f32 %v14642_v52, %v5579_v58  ;;  %v14644_v13 = vadd.f32 %v1462_v43, %v15849_v51  ;;  %v13007_v29 = vpop.f32.mrb[32].mxu1  ;;  %v3136_v20 = vand.u32 4294901760, %v3135_v39 }
 0x1ff   : > { %17560 = vst [vmem:[#allocation11_spill] sm:$0xff] %v16026_v14  ;;  %v16037_v16 = vpack.c.bf16 %v5172_v28, %v5165_v42  ;;  %v6766_v12 = vand.u32 4294901760, %v13007_v29  ;;  %v2469_v23 = vpop.f32.mrb[33].mxu1  ;;  %v3146_v42 = vand.u32 4294901760, %v3145_v1 }
 0x200   : > { %v17456_v40 = vand.u32 4294901760, %v16031_v10  ;;  %v1467_v30 = vpop.f32.mrb[30].mxu0  ;;  %13069 = vmatmul.mubr.f32.vlgmr.msra.gmra.mrb[48].mxu1 %v15864_v2  ;;  %v6078_v52 = vand.u32 4294901760, %v14644_v13  ;;  %v6763_v51 = vand.u32 4294901760, %v2469_v23  ;;  %v5666_v2 = vsub.f32 %v16008_v7, %v17457_v45 }
 0x201   : > { %17561 = vst [vmem:[#allocation12_spill] sm:$0xff] %v16037_v16  ;;  %v16044_v58 = vadd.f32 %v1467_v30, %v15851_v8  ;;  %13209 = vmatmul.mubr.f32.vlgmr.msra.gmra.mrb[32].mxu0 %v15947_v11  ;;  %v1469_v31 = vpop.f32.mrb[31].mxu0  ;;  %14064 = vmatpush3.bf16.xpose.msra.mxu1 %v15894_v33  ;;  %v16048_v28 = vsub.f32 %v13007_v29, %v6766_v12 }
 0x202   : > { %v14646_v43 = vadd.f32 %v1469_v31, %v15853_v57  ;;  %13075 = vmatprep.mubr.f32.mxu1 %v3136_v20  ;;  %14144 = vmatpush3.bf16.xpose.msra.mxu0 %v15971_v25  ;;  %v16055_v8 = vpack.c.bf16 %v6766_v12, %v6763_v51  ;;  %v16057_v39 = vsub.f32 %v2469_v23, %v6763_v51  ;;  %v13010_v29 = vpop.f32.mrb[34].mxu1  ;;  %v5667_v18 = vand.u32 4294901760, %v5666_v2 }
 0x203   : > { %17562 = vst [vmem:[#allocation13_spill] sm:$0xff] %v16044_v58  ;;  %13215 = vmatprep.mubr.f32.mxu0 %v15937_v9  ;;  %14066 = vmatprep.subr.bf16.mxu1 %v15912_v55  ;;  %v5673_v57 = vsub.f32 %v16031_v10, %v17456_v40  ;;  %v16066_v25 = vsub.f32 %v14641_v61, %v16039_v59  ;;  %v17462_v1 = vand.u32 4294901760, %v16048_v28  ;;  %v7274_v23 = vand.u32 4294901760, %v13010_v29  ;;  %v2481_v20 = vpop.f32.mrb[35].mxu1 }
 0x204   : > { %v6081_v12 = vand.u32 4294901760, %v14646_v43  ;;  %14146 = vmatprep.subr.bf16.mxu0 %v15959_v27  ;;  %v16070_v51 = vsub.f32 %v14644_v13, %v6078_v52  ;;  %v17463_v31 = vand.u32 4294901760, %v16057_v39  ;;  %v7271_v32 = vand.u32 4294901760, %v2481_v20 }
 0x205   : > { %v5674_v6 = vand.u32 4294901760, %v5673_v57  ;;  %v6860_v40 = vsub.f32 %v16048_v28, %v17462_v1  ;;  %v16083_v58 = vsub.f32 %v13010_v29, %v7274_v23 }
 0x206   : > { %v16076_v45 = vpack.c.bf16 %v6081_v12, %v6078_v52  ;;  %v16078_v61 = vsub.f32 %v14646_v43, %v6081_v12  ;;  %v6853_v30 = vsub.f32 %v16057_v39, %v17463_v31  ;;  %v16085_v13 = vpack.c.bf16 %v7274_v23, %v7271_v32  ;;  %v13013_v57 = vpop.f32.mrb[36].mxu1 }
 0x207   : > { %v16087_v14 = vsub.f32 %v2481_v20, %v7271_v32  ;;  %v7782_v1 = vand.u32 4294901760, %v13013_v57  ;;  %v2493_v52 = vpop.f32.mrb[37].mxu1  ;;  %v17565_v43 = vand.u32 4294901760, %v16035_v46  ;;  %v16097_v12 = vpack.c.bf16 %v5674_v6, %v5667_v18 }
 0x208   : > { %17563 = vst [vmem:[#allocation14_spill] sm:$0xff] %v16076_v45  ;;  %17564 = vst [vmem:[#allocation15_spill] sm:$0xff] %v16085_v13  ;;  %13076 = vmatmul.mubr.f32.vlgmr.msra.gmra.mrb[50].mxu1 %v3146_v42  ;;  %v7779_v20 = vand.u32 4294901760, %v2493_v52  ;;  %v16111_v18 = vpack.c.bf16 %v16031_v10, %v16008_v7  ;;  %v6854_v6 = vand.u32 4294901760, %v6853_v30  ;;  %v6861_v42 = vand.u32 4294901760, %v6860_v40 }
 0x209   : > { %v16095_v2 = vsub.f32 %v16035_v46, %v17565_v43  ;;  %13216 = vmatmul.mubr.f32.vlgmr.msra.gmra.mrb[32].mxu0 %v15951_v17  ;;  %14068 = vmatpush3.bf16.xpose.msra.mxu1 %v15912_v55  ;;  %v16105_v31 = vsub.f32 %v13013_v57, %v7782_v1  ;;  %v17567_v55 = vand.u32 4294901760, %v15937_v9  ;;  %v17570_v40 = vand.u32 4294901760, %v16070_v51 }
 0x20a   : > { %13082 = vmatprep.mubr.f32.mxu1 %v15963_v19  ;;  %14148 = vmatpush3.bf16.xpose.msra.mxu0 %v15959_v27  ;;  %v16114_v32 = vpack.c.bf16 %v7782_v1, %v7779_v20  ;;  %v16116_v29 = vsub.f32 %v2493_v52, %v7779_v20  ;;  %v13016_v57 = vpop.f32.mrb[38].mxu1  ;;  %v17568_v1 = vand.u32 4294901760, %v16008_v7  ;;  %v17569_v52 = vand.u32 4294901760, %v16031_v10 }
 0x20b   : > { %13222 = vmatprep.mubr.f32.mxu0 %v17567_v55  ;;  %14070 = vmatprep.subr.bf16.mxu1 %v15897_v37  ;;  %v8290_v13 = vand.u32 4294901760, %v13016_v57  ;;  %v2505_v45 = vpop.f32.mrb[39].mxu1  ;;  %v16131_v43 = vpack.c.bf16 %v6861_v42, %v6854_v6  ;;  %v6168_v23 = vsub.f32 %v16070_v51, %v17570_v40  ;;  %v17572_v7 = vand.u32 4294901760, %v16087_v14 }
 0x20c   : > { %17566 = vst [vmem:[#allocation16_spill] sm:$0xff] %v16114_v32  ;;  %14150 = vmatprep.subr.bf16.mxu0 %v15987_v0  ;;  %v16128_v20 = vpack.c.bf16 %v17569_v52, %v17568_v1  ;;  %v8287_v55 = vand.u32 4294901760, %v2505_v45  ;;  %v17571_v32 = vand.u32 4294901760, %v16066_v25  ;;  %v17573_v52 = vand.u32 4294901760, %v16078_v61 }
 0x20d   : > { %v7361_v10 = vsub.f32 %v16087_v14, %v17572_v7  ;;  %v16144_v1 = vsub.f32 %v13016_v57, %v8290_v13  ;;  %v17574_v6 = vand.u32 4294901760, %v16083_v58  ;;  %v17575_v40 = vand.u32 4294901760, %v16105_v31 }
 0x20e   : > { %v16139_v54 = vsub.f32 %v16066_v25, %v17571_v32  ;;  %v6175_v42 = vsub.f32 %v16078_v61, %v17573_v52  ;;  %v16155_v32 = vpack.c.bf16 %v8290_v13, %v8287_v55  ;;  %v16157_v16 = vsub.f32 %v2505_v45, %v8287_v55  ;;  %v13019_v36 = vpop.f32.mrb[40].mxu1 }
 0x20f   : > { %v7368_v30 = vsub.f32 %v16083_v58, %v17574_v6  ;;  %v7876_v9 = vsub.f32 %v16105_v31, %v17575_v40  ;;  %v17474_v57 = vand.u32 4294901760, %v16144_v1  ;;  %v8798_v7 = vand.u32 4294901760, %v13019_v36  ;;  %v2517_v50 = vpop.f32.mrb[41].mxu1 }
 0x210   : > { %17576 = vst [vmem:[#allocation17_spill] sm:$0xff] %v16155_v32  ;;  %13083 = vmatmul.mubr.f32.vlgmr.msra.gmra.mrb[50].mxu1 %v15974_v53  ;;  %v6169_v52 = vand.u32 4294901760, %v6168_v23  ;;  %v6176_v62 = vand.u32 4294901760, %v6175_v42  ;;  %v17577_v47 = vand.u32 4294901760, %v16116_v29  ;;  %v17476_v34 = vand.u32 4294901760, %v16157_v16 }
 0x211   : > { %v8795_v40 = vand.u32 4294901760, %v2517_v50  ;;  %v17578_v13 = vand.u32 4294901760, %v15951_v17  ;;  %14072 = vmatpush3.bf16.xpose.msra.mxu1 %v15897_v37  ;;  %v16170_v45 = vpack.c.bf16 %v16078_v61, %v16070_v51  ;;  %v8384_v23 = vsub.f32 %v16144_v1, %v17474_v57  ;;  %13089 = vmatprep.mubr.f32.mxu1 %v15991_v56 }
 0x212   : > { %v7869_v6 = vsub.f32 %v16116_v29, %v17577_v47  ;;  %v16175_v55 = vsub.f32 %v13019_v36, %v8798_v7  ;;  %v16179_v47 = vpack.c.bf16 %v6176_v62, %v6169_v52  ;;  %v7362_v17 = vand.u32 4294901760, %v7361_v10  ;;  %14074 = vmatprep.subr.bf16.mxu1 %v15894_v33  ;;  %v13022_v36 = vpop.f32.mrb[42].mxu1 }
 0x213   : > { %13223 = vmatmul.mubr.f32.vlgmr.msra.gmra.mrb[32].mxu0 %v17578_v13  ;;  %17579 = vst [vmem:[#allocation18_spill] sm:$0xff] %v16170_v45  ;;  %v8377_v37 = vsub.f32 %v16157_v16, %v17476_v34  ;;  %v16184_v42 = vpack.c.bf16 %v8798_v7, %v8795_v40  ;;  %v16186_v13 = vsub.f32 %v2517_v50, %v8795_v40  ;;  %v7369_v57 = vand.u32 4294901760, %v7368_v30 }
 0x214   : > { %14152 = vmatpush3.bf16.xpose.msra.mxu0 %v15987_v0  ;;  %17580 = vst [vmem:[#allocation19_spill] sm:$0xff] %v16179_v47  ;;  %13229 = vmatprep.mubr.f32.mxu0 %v15931_v24  ;;  %v8891_v32 = vand.u32 4294901760, %v16175_v55  ;;  %v9306_v62 = vand.u32 4294901760, %v13022_v36  ;;  %v2529_v0 = vpop.f32.mrb[43].mxu1  ;;  %v17582_v10 = vand.u32 4294901760, %v16070_v51  ;;  %v17583_v52 = vand.u32 4294901760, %v16078_v61 }
 0x215   : > { %17581 = vst [vmem:[#allocation20_spill] sm:$0xff] %v16184_v42  ;;  %14154 = vmatprep.subr.bf16.mxu0 %v15959_v27  ;;  %v16200_v50 = vpack.c.bf16 %v16048_v28, %v16057_v39  ;;  %v8884_v40 = vand.u32 4294901760, %v16186_v13  ;;  %v9303_v34 = vand.u32 4294901760, %v2529_v0  ;;  %v16203_v30 = vpack.c.bf16 %v7369_v57, %v7362_v17 }
 0x216   : > { %v16196_v7 = vpack.c.bf16 %v17583_v52, %v17582_v10  ;;  %v17586_v42 = vand.u32 4294901760, %v16057_v39  ;;  %v17587_v45 = vand.u32 4294901760, %v16048_v28  ;;  %v8892_v51 = vsub.f32 %v16175_v55, %v8891_v32  ;;  %v13025_v44 = vpop.f32.mrb[44].mxu1 }
 0x217   : > { %17585 = vst [vmem:[#allocation22_spill] sm:$0xff] %v16200_v50  ;;  %v16212_v61 = vsub.f32 %v13022_v36, %v9306_v62  ;;  %v7870_v10 = vand.u32 4294901760, %v7869_v6  ;;  %v7877_v52 = vand.u32 4294901760, %v7876_v9  ;;  %v16215_v50 = vpack.c.bf16 %v9306_v62, %v9303_v34 }
 0x218   : > { %17584 = vst [vmem:[#allocation21_spill] sm:$0xff] %v16196_v7  ;;  %v16209_v47 = vpack.c.bf16 %v17587_v45, %v17586_v42  ;;  %v8885_v7 = vsub.f32 %v16186_v13, %v8884_v40  ;;  %v9391_v22 = vsub.f32 %v2529_v0, %v9303_v34  ;;  %v16219_v57 = vpack.c.bf16 %v16083_v58, %v16087_v14  ;;  %v2541_v45 = vpop.f32.mrb[45].mxu1 }
 0x219   : > { %17588 = vst [vmem:[#allocation23_spill] sm:$0xff] %v16215_v50  ;;  %v9399_v28 = vand.u32 4294901760, %v16212_v61  ;;  %v9814_v39 = vand.u32 4294901760, %v13025_v44  ;;  %13090 = vmatmul.mubr.f32.vlgmr.msra.gmra.mrb[50].mxu1 %v15995_v5  ;;  %v16223_v17 = vpack.c.bf16 %v7877_v52, %v7870_v10  ;;  %v17590_v9 = vand.u32 4294901760, %v16087_v14 }
 0x21a   : > { %17589 = vst [vmem:[#allocation24_spill] sm:$0xff] %v16219_v57  ;;  %v17591_v6 = vand.u32 4294901760, %v16083_v58  ;;  %v9392_v34 = vand.u32 4294901760, %v9391_v22  ;;  %v9811_v36 = vand.u32 4294901760, %v2541_v45  ;;  %14076 = vmatpush3.bf16.xpose.msra.mxu1 %v15894_v33  ;;  %v8378_v62 = vand.u32 4294901760, %v8377_v37 }
 0x21b   : > { %13230 = vmatmul.mubr.f32.vlgmr.msra.gmra.mrb[32].mxu0 %v15947_v11  ;;  %v8385_v0 = vand.u32 4294901760, %v8384_v23  ;;  %v9400_v50 = vsub.f32 %v16212_v61, %v9399_v28  ;;  %v9906_v57 = vsub.f32 %v13025_v44, %v9814_v39  ;;  %v17593_v10 = vand.u32 4294901760, %v15991_v56  ;;  %14078 = vmatprep.subr.bf16.mxu1 %v15904_v48  ;;  %v13028_v23 = vpop.f32.mrb[46].mxu1 }
 0x21c   : > { %v16229_v42 = vpack.c.bf16 %v17591_v6, %v17590_v9  ;;  %14156 = vmatpush3.bf16.xpose.msra.mxu0 %v15959_v27  ;;  %v16239_v14 = vpack.c.bf16 %v16105_v31, %v16116_v29  ;;  %v8886_v58 = vand.u32 4294901760, %v8885_v7  ;;  %v9393_v52 = vsub.f32 %v9391_v22, %v9392_v34  ;;  %13236 = vmatprep.mubr.f32.mxu0 %v15931_v24  ;;  %v2553_v27 = vpop.f32.mrb[47].mxu1 }
 0x21d   : > { %13096 = vmatprep.mubr.f32.mxu1 %v17593_v10  ;;  %v16241_v9 = vpack.c.bf16 %v9814_v39, %v9811_v36  ;;  %v9899_v6 = vsub.f32 %v2541_v45, %v9811_v36  ;;  %v8893_v44 = vand.u32 4294901760, %v8892_v51  ;;  %v9907_v37 = vand.u32 4294901760, %v9906_v57  ;;  %14182 = vmatprep.subr.bf16.mxu0 %v16029_v21 }
 0x21e   : > { %17592 = vst [vmem:[#allocation25_spill] sm:$0xff] %v16229_v42  ;;  %17594 = vst [vmem:[#allocation26_spill] sm:$0xff] %v16239_v14  ;;  %v10322_v56 = vand.u32 4294901760, %v13028_v23  ;;  %v16246_v10 = vpack.c.bf16 %v8385_v0, %v8378_v62  ;;  %v17596_v14 = vand.u32 4294901760, %v16116_v29  ;;  %v17597_v7 = vand.u32 4294901760, %v16105_v31 }
 0x21f   : > { %17595 = vst [vmem:[#allocation27_spill] sm:$0xff] %v16241_v9  ;;  %v9900_v45 = vand.u32 4294901760, %v9899_v6  ;;  %v10319_v36 = vand.u32 4294901760, %v2553_v27  ;;  %v16254_v24 = vpack.c.bf16 %v8893_v44, %v8886_v58  ;;  %v16258_v51 = vpack.c.bf16 %v16144_v1, %v16157_v16 }
 0x220   : > { %v16252_v39 = vpack.c.bf16 %v17597_v7, %v17596_v14  ;;  %v9908_v9 = vsub.f32 %v9906_v57, %v9907_v37  ;;  %v10414_v42 = vsub.f32 %v13028_v23, %v10322_v56  ;;  %v16262_v62 = vpack.c.bf16 %v16175_v55, %v16186_v13 }
 0x221   : > { %17599 = vst [vmem:[#allocation29_spill] sm:$0xff] %v16254_v24  ;;  %17600 = vst [vmem:[#allocation30_spill] sm:$0xff] %v16258_v51  ;;  %v17601_v29 = vand.u32 4294901760, %v16157_v16  ;;  %v17602_v31 = vand.u32 4294901760, %v16144_v1  ;;  %v9901_v14 = vsub.f32 %v9899_v6, %v9900_v45  ;;  %v16270_v7 = vpack.c.bf16 %v10322_v56, %v10319_v36 }
 0x222   : > { %17598 = vst [vmem:[#allocation28_spill] sm:$0xff] %v16252_v39  ;;  %v10407_v58 = vsub.f32 %v2553_v27, %v10319_v36  ;;  %v16272_v44 = vpack.c.bf16 %v8891_v32, %v8884_v40  ;;  %v10415_v24 = vand.u32 4294901760, %v10414_v42  ;;  %v17603_v51 = vand.u32 4294901760, %v15995_v5  ;;  %v17612_v36 = vld [vmem:[#allocation7_spill] sm:$0xff] }
 0x223   : > { %v16268_v0 = vpack.c.bf16 %v17602_v31, %v17601_v29  ;;  %v9394_v23 = vand.u32 4294901760, %v9393_v52  ;;  %v9401_v39 = vand.u32 4294901760, %v9400_v50  ;;  %v9909_v55 = vand.u32 4294901760, %v9908_v9  ;;  %13237 = vmatmul.mubr.f32.vlgmr.msra.gmra.mrb[32].mxu0 %v15947_v11  ;;  %v17613_v31 = vld [vmem:[#allocation8_spill] sm:$0xff] }
 0x224   : > { %13097 = vmatmul.mubr.f32.vlgmr.msra.gmra.mrb[50].mxu1 %v17603_v51  ;;  %v10408_v13 = vand.u32 4294901760, %v10407_v58  ;;  %v9902_v16 = vand.u32 4294901760, %v9901_v14  ;;  %v16279_v1 = vpack.c.bf16 %v16212_v61, %v9391_v22  ;;  %v16281_v56 = vpack.c.bf16 %v9906_v57, %v9899_v6  ;;  %14184 = vmatpush3.bf16.xpose.msra.mxu0 %v16029_v21 }
 0x225   : > { %14080 = vmatpush3.bf16.xpose.msra.mxu1 %v15904_v48  ;;  %v10416_v32 = vsub.f32 %v10414_v42, %v10415_v24  ;;  %13103 = vmatprep.mubr.f32.mxu1 %v15963_v19  ;;  %v16285_v5 = vpack.c.bf16 %v9401_v39, %v9394_v23  ;;  %v16287_v50 = vpack.c.bf16 %v9399_v28, %v9392_v34  ;;  %v17604_v11 = vand.u32 4294901760, %v16095_v2 }
 0x226   : > { %v10409_v40 = vsub.f32 %v10407_v58, %v10408_v13  ;;  %14082 = vmatprep.subr.bf16.mxu1 %v15894_v33  ;;  %v16292_v48 = vpack.c.bf16 %v9909_v55, %v9902_v16  ;;  %v16294_v22 = vpack.c.bf16 %v9907_v37, %v9900_v45  ;;  %v3635_v61 = vsub.f32 %v15892_v26, %v16090_v38 }
 0x227   : > { %13285 = vmatprep.mubr.f32.mxu0 %v17604_v11  ;;  %14186 = vmatprep.subr.bf16.mxu0 %v16097_v12  ;;  %v10417_v57 = vand.u32 4294901760, %v10416_v32  ;;  %v16299_v52 = vpack.c.bf16 %v10414_v42, %v10407_v58  ;;  %v16301_v28 = vpack.c.bf16 %v10415_v24, %v10408_v13  ;;  %v16304_v2 = vand.u32 4294901760, %v15900_v4  ;;  %v17614_v13 = vld [vmem:[#allocation12_spill] sm:$0xff]  ;;  %v17615_v32 = vld [vmem:[#allocation9_spill] sm:$0xff]  ;;  %v17617_v11 = vld [vmem:[#allocation11_spill] sm:$0xff] }
 0x228   : > { %v10410_v34 = vand.u32 4294901760, %v10409_v40  ;;  %v5656_v9 = vand.u32 4294901760, %v16139_v54  ;;  %v3636_v37 = vand.u32 4294901760, %v3635_v61  ;;  %v5150_v24 = vand.u32 4294901760, %v17612_v36  ;;  %v17616_v40 = vld [vmem:[#allocation10_spill] sm:$0xff] }
 0x229   : > { %v3645_v26 = vsub.f32 %v15900_v4, %v16304_v2 }
 0x22a   : > { %v16307_v6 = vpack.c.bf16 %v10417_v57, %v10410_v34  ;;  %v3637_v54 = vsub.f32 %v3635_v61, %v3636_v37  ;;  %v5151_v29 = vsub.f32 %v17612_v36, %v5150_v24  ;;  %v17618_v34 = vld [vmem:[#allocation13_spill] sm:$0xff] }
 0x22b   : > { %13286 = vmatmul.mubr.f32.vlgmr.msra.gmra.mrb[34].mxu0 %v5656_v9  ;;  %v3646_v42 = vand.u32 4294901760, %v3645_v26 }
 0x22c   : > { %13104 = vmatmul.mubr.f32.vlgmr.msra.gmra.mrb[50].mxu1 %v15974_v53  ;;  %14188 = vmatpush3.bf16.xpose.msra.mxu0 %v16097_v12  ;;  %v3638_v27 = vand.u32 4294901760, %v3637_v54  ;;  %v5152_v58 = vand.u32 4294901760, %v5151_v29 }
 0x22d   : > { %14084 = vmatpush3.bf16.xpose.msra.mxu1 %v15894_v33  ;;  %13110 = vmatprep.mubr.f32.mxu1 %v15963_v19  ;;  %v3647_v33 = vsub.f32 %v3645_v26, %v3646_v42  ;;  %v17605_v19 = vand.u32 4294901760, %v16035_v46 }
 0x22e   : > { %13292 = vmatprep.mubr.f32.mxu0 %v16012_v3  ;;  %14086 = vmatprep.subr.bf16.mxu1 %v15909_v41  ;;  %v5153_v55 = vsub.f32 %v5151_v29, %v5152_v58 }
 0x22f   : > { %14190 = vmatprep.subr.bf16.mxu0 %v16111_v18  ;;  %v3648_v4 = vand.u32 4294901760, %v3647_v33 }
 0x230   : > { %v5154_v16 = vand.u32 4294901760, %v5153_v55 }
 0x233   : > { %13293 = vmatmul.mubr.f32.vlgmr.msra.gmra.mrb[34].mxu0 %v16039_v59 }
 0x234   : > { %13111 = vmatmul.mubr.f32.vlgmr.msra.gmra.mrb[50].mxu1 %v15974_v53  ;;  %14192 = vmatpush3.bf16.xpose.msra.mxu0 %v16111_v18  ;;  %v17606_v53 = vand.u32 4294901760, %v16066_v25  ;;  %v17608_v18 = vld [vmem:[#allocation6_spill] sm:$0xff] }
 0x235   : > { %14088 = vmatpush3.bf16.xpose.msra.mxu1 %v15909_v41  ;;  %13117 = vmatprep.mubr.f32.mxu1 %v3638_v27 }
 0x236   : > { %13299 = vmatprep.mubr.f32.mxu0 %v16035_v46  ;;  %14090 = vmatprep.subr.bf16.mxu1 %v15929_v60  ;;  %v17607_v46 = vld [vmem:[#allocation2_spill] sm:$0xff] }
 0x237   : > { %14194 = vmatprep.subr.bf16.mxu0 %v16029_v21 }
 0x23b   : > { %13300 = vmatmul.mubr.f32.vlgmr.msra.gmra.mrb[34].mxu0 %v16066_v25 }
 0x23c   : > { %13118 = vmatmul.mubr.f32.vlgmr.msra.gmra.mrb[52].mxu1 %v3648_v4  ;;  %14196 = vmatpush3.bf16.xpose.msra.mxu0 %v16029_v21  ;;  %v17620_v4 = vld [vmem:[#allocation19_spill] sm:$0xff] }
 0x23d   : > { %14092 = vmatpush3.bf16.xpose.msra.mxu1 %v15929_v60  ;;  %13124 = vmatprep.mubr.f32.mxu1 %v16090_v38 }
 0x23e   : > { %13306 = vmatprep.mubr.f32.mxu0 %v17605_v19  ;;  %14094 = vmatprep.subr.bf16.mxu1 %v15915_v15 }
 0x23f   : > { %14198 = vmatprep.subr.bf16.mxu0 %v16128_v20 }
 0x243   : > { %13307 = vmatmul.mubr.f32.vlgmr.msra.gmra.mrb[34].mxu0 %v17606_v53  ;;  %v17621_v53 = vld [vmem:[#allocation18_spill] sm:$0xff] }
 0x244   : > { %13125 = vmatmul.mubr.f32.vlgmr.msra.gmra.mrb[52].mxu1 %v16304_v2  ;;  %14200 = vmatpush3.bf16.xpose.msra.mxu0 %v16128_v20 }
 0x245   : > { %14096 = vmatpush3.bf16.xpose.msra.mxu1 %v15915_v15  ;;  %13131 = vmatprep.mubr.f32.mxu1 %v3635_v61  ;;  %v4136_v15 = vand.u32 4294901760, %v15907_v35  ;;  %v6144_v61 = vand.u32 4294901760, %v17617_v11 }
 0x246   : > { %13313 = vmatprep.mubr.f32.mxu0 %v16012_v3  ;;  %14098 = vmatprep.subr.bf16.mxu1 %v15909_v41 }
 0x247   : > { %14202 = vmatprep.subr.bf16.mxu0 %v16029_v21  ;;  %v4137_v60 = vsub.f32 %v15907_v35, %v4136_v15  ;;  %v6145_v57 = vsub.f32 %v17617_v11, %v6144_v61 }
 0x249   : > { %v6146_v9 = vand.u32 4294901760, %v6145_v57 }
 0x24b   : > { %13314 = vmatmul.mubr.f32.vlgmr.msra.gmra.mrb[34].mxu0 %v16039_v59  ;;  %v6147_v54 = vsub.f32 %v6145_v57, %v6146_v9 }
 0x24c   : > { %13132 = vmatmul.mubr.f32.vlgmr.msra.gmra.mrb[52].mxu1 %v3645_v26  ;;  %14204 = vmatpush3.bf16.xpose.msra.mxu0 %v16029_v21  ;;  %v4138_v21 = vand.u32 4294901760, %v4137_v60  ;;  %v17619_v26 = vld [vmem:[#allocation14_spill] sm:$0xff] }
 0x24d   : > { %14100 = vmatpush3.bf16.xpose.msra.mxu1 %v15909_v41  ;;  %13138 = vmatprep.mubr.f32.mxu1 %v3636_v37  ;;  %v6148_v27 = vand.u32 4294901760, %v6147_v54 }
 0x24e   : > { %13320 = vmatprep.mubr.f32.mxu0 %v16012_v3  ;;  %14102 = vmatprep.subr.bf16.mxu1 %v15923_v49  ;;  %v4146_v3 = vand.u32 4294901760, %v15918_v63 }
 0x24f   : > { %14230 = vmatprep.subr.bf16.mxu0 %v16055_v8 }
 0x253   : > { %13321 = vmatmul.mubr.f32.vlgmr.msra.gmra.mrb[34].mxu0 %v16039_v59  ;;  %v4139_v59 = vsub.f32 %v4137_v60, %v4138_v21 }
 0x254   : > { %13139 = vmatmul.mubr.f32.vlgmr.msra.gmra.mrb[52].mxu1 %v3646_v42  ;;  %14232 = vmatpush3.bf16.msra.mxu0 %v16055_v8 }
 0x255   : > { %14104 = vmatpush3.bf16.xpose.msra.mxu1 %v15923_v49  ;;  %13145 = vmatprep.mubr.f32.mxu1 %v16090_v38  ;;  %v4147_v49 = vsub.f32 %v15918_v63, %v4146_v3  ;;  %v4140_v35 = vand.u32 4294901760, %v4139_v59  ;;  %v17610_v63 = vld [vmem:[#allocation4_spill] sm:$0xff] }
 0x256   : > { %14106 = vmatprep.subr.bf16.mxu1 %v15909_v41  ;;  %14234 = vmatprep.subr.bf16.mxu0 %v16131_v43 }
 0x257   : > { %v4148_v25 = vand.u32 4294901760, %v4147_v49 }
 0x259   : > { %v4149_v12 = vsub.f32 %v4147_v49, %v4148_v25 }
 0x25b   : > { %v4150_v20 = vand.u32 4294901760, %v4149_v12 }
 0x25c   : > { %13146 = vmatmul.mubr.f32.vlgmr.msra.gmra.mrb[52].mxu1 %v16304_v2 }
 0x25d   : > { %14108 = vmatpush3.bf16.xpose.msra.mxu1 %v15909_v41  ;;  %13152 = vmatprep.mubr.f32.mxu1 %v16090_v38  ;;  %v17609_v41 = vld [vmem:[#allocation3_spill] sm:$0xff]  ;;  %v17611_v38 = vld [vmem:[#allocation5_spill] sm:$0xff] }
 0x25e   : > { %14110 = vmatprep.subr.bf16.mxu1 %v17607_v46  ;;  %v5140_v39 = vand.u32 4294901760, %v17611_v38 }
 0x260   : > { %v5141_v45 = vsub.f32 %v17611_v38, %v5140_v39 }
 0x262   : > { %v5142_v51 = vand.u32 4294901760, %v5141_v45 }
 0x264   : > { %13153 = vmatmul.mubr.f32.vlgmr.msra.gmra.mrb[52].mxu1 %v16304_v2  ;;  %v5143_v14 = vsub.f32 %v5141_v45, %v5142_v51  ;;  %v6154_v2 = vand.u32 4294901760, %v17618_v34 }
 0x265   : > { %14112 = vmatpush3.bf16.xpose.msra.mxu1 %v17607_v46  ;;  %13159 = vmatprep.mubr.f32.mxu1 %v4140_v35 }
 0x266   : > { %14114 = vmatprep.subr.bf16.mxu1 %v17608_v18  ;;  %v5144_v23 = vand.u32 4294901760, %v5143_v14  ;;  %v6155_v37 = vsub.f32 %v17618_v34, %v6154_v2 }
 0x268   : > { %v6156_v42 = vand.u32 4294901760, %v6155_v37 }
 0x26a   : > { %v6157_v33 = vsub.f32 %v6155_v37, %v6156_v42 }
 0x26c   : > { %13160 = vmatmul.mubr.f32.vlgmr.msra.gmra.mrb[54].mxu1 %v4150_v20  ;;  %v6158_v19 = vand.u32 4294901760, %v6157_v33 }
 0x26d   : > { %14116 = vmatpush3.bf16.xpose.msra.mxu1 %v17608_v18  ;;  %13166 = vmatprep.mubr.f32.mxu1 %v4136_v15 }
 0x26e   : > { %14118 = vmatprep.subr.bf16.mxu1 %v17609_v41 }
 0x274   : > { %13167 = vmatmul.mubr.f32.vlgmr.msra.gmra.mrb[54].mxu1 %v4146_v3 }
 0x275   : > { %14120 = vmatpush3.bf16.xpose.msra.mxu1 %v17609_v41  ;;  %13173 = vmatprep.mubr.f32.mxu1 %v4137_v60 }
 0x276   : > { %14122 = vmatprep.subr.bf16.mxu1 %v17607_v46 }
 0x27c   : > { %13174 = vmatmul.mubr.f32.vlgmr.msra.gmra.mrb[54].mxu1 %v4147_v49  ;;  %v17622_v49 = vld [vmem:[#allocation21_spill] sm:$0xff] }
 0x27d   : > { %14124 = vmatpush3.bf16.xpose.msra.mxu1 %v17607_v46  ;;  %13180 = vmatprep.mubr.f32.mxu1 %v4138_v21 }
 0x27e   : > { %14126 = vmatprep.subr.bf16.mxu1 %v17610_v63 }
 0x284   : > { %13181 = vmatmul.mubr.f32.vlgmr.msra.gmra.mrb[54].mxu1 %v4148_v25 }
 0x285   : > { %14128 = vmatpush3.bf16.xpose.msra.mxu1 %v17610_v63  ;;  %13187 = vmatprep.mubr.f32.mxu1 %v4136_v15 }
 0x286   : > { %14130 = vmatprep.subr.bf16.mxu1 %v17607_v46 }
 0x28c   : > { %13188 = vmatmul.mubr.f32.vlgmr.msra.gmra.mrb[54].mxu1 %v4146_v3 }
 0x28d   : > { %14132 = vmatpush3.bf16.xpose.msra.mxu1 %v17607_v46  ;;  %13194 = vmatprep.mubr.f32.mxu1 %v4136_v15  ;;  %v17623_v46 = vld [vmem:[#allocation15_spill] sm:$0xff] }
 0x28e   : > { %14158 = vmatprep.subr.bf16.mxu1 %v17613_v31 }
 0x294   : > { %13195 = vmatmul.mubr.f32.vlgmr.msra.gmra.mrb[54].mxu1 %v4146_v3 }
 0x295   : > { %14160 = vmatpush3.bf16.xpose.msra.mxu1 %v17613_v31  ;;  %13243 = vmatprep.mubr.f32.mxu1 %v5144_v23 }
 0x296   : > { %14162 = vmatprep.subr.bf16.mxu1 %v17614_v13 }
 0x29c   : > { %13244 = vmatmul.mubr.f32.vlgmr.msra.gmra.mrb[56].mxu1 %v5154_v16 }
 0x29d   : > { %14164 = vmatpush3.bf16.xpose.msra.mxu1 %v17614_v13  ;;  %13250 = vmatprep.mubr.f32.mxu1 %v5140_v39 }
 0x29e   : > { %14166 = vmatprep.subr.bf16.mxu1 %v17615_v32 }
 0x2a4   : > { %13251 = vmatmul.mubr.f32.vlgmr.msra.gmra.mrb[56].mxu1 %v5150_v24 }
 0x2a5   : > { %14168 = vmatpush3.bf16.xpose.msra.mxu1 %v17615_v32  ;;  %13257 = vmatprep.mubr.f32.mxu1 %v5141_v45 }
 0x2a6   : > { %14170 = vmatprep.subr.bf16.mxu1 %v17613_v31 }
 0x2ac   : > { %13258 = vmatmul.mubr.f32.vlgmr.msra.gmra.mrb[56].mxu1 %v5151_v29 }
 0x2ad   : > { %14172 = vmatpush3.bf16.xpose.msra.mxu1 %v17613_v31  ;;  %13264 = vmatprep.mubr.f32.mxu1 %v5142_v51 }
 0x2ae   : > { %14174 = vmatprep.subr.bf16.mxu1 %v17616_v40 }
 0x2b4   : > { %13265 = vmatmul.mubr.f32.vlgmr.msra.gmra.mrb[56].mxu1 %v5152_v58 }
 0x2b5   : > { %14176 = vmatpush3.bf16.xpose.msra.mxu1 %v17616_v40  ;;  %13271 = vmatprep.mubr.f32.mxu1 %v5140_v39 }
 0x2b6   : > { %14178 = vmatprep.subr.bf16.mxu1 %v17613_v31 }
 0x2bc   : > { %13272 = vmatmul.mubr.f32.vlgmr.msra.gmra.mrb[56].mxu1 %v5150_v24 }
 0x2bd   : > { %14180 = vmatpush3.bf16.xpose.msra.mxu1 %v17613_v31  ;;  %13278 = vmatprep.mubr.f32.mxu1 %v5140_v39 }
 0x2be   : > { %14206 = vmatprep.subr.bf16.mxu1 %v17619_v26 }
 0x2c4   : > { %13279 = vmatmul.mubr.f32.vlgmr.msra.gmra.mrb[56].mxu1 %v5150_v24 }
 0x2c5   : > { %14208 = vmatpush3.bf16.xpose.msra.mxu1 %v17619_v26  ;;  %13327 = vmatprep.mubr.f32.mxu1 %v6148_v27 }
 0x2c6   : > { %14210 = vmatprep.subr.bf16.mxu1 %v17620_v4 }
 0x2cc   : > { %13328 = vmatmul.mubr.f32.vlgmr.msra.gmra.mrb[58].mxu1 %v6158_v19 }
 0x2cd   : > { %14212 = vmatpush3.bf16.xpose.msra.mxu1 %v17620_v4  ;;  %13334 = vmatprep.mubr.f32.mxu1 %v6144_v61 }
 0x2ce   : > { %14214 = vmatprep.subr.bf16.mxu1 %v17621_v53 }
 0x2d3   : > { %v13070_v15 = vpop.f32.mrb[48].mxu1 }
 0x2d4   : > { %13335 = vmatmul.mubr.f32.vlgmr.msra.gmra.mrb[58].mxu1 %v6154_v2  ;;  %v3055_v60 = vpop.f32.mrb[49].mxu1  ;;  %v6583_v21 = vsel %vm6579_vm2, %v13070_v15, -inf }
 0x2d5   : > { %14216 = vmatpush3.bf16.xpose.msra.mxu1 %v17621_v53  ;;  %13341 = vmatprep.mubr.f32.mxu1 %v6145_v57  ;;  %v6580_v3 = vsel %vm6579_vm2, %v3055_v60, -inf }
 0x2d6   : > { %14218 = vmatprep.subr.bf16.mxu1 %v17619_v26  ;;  %6581 = vmax.xlane.f32.xlu0 %v6580_v3 }
 0x2da   : > { %6584 = vmax.xlane.f32.xlu0 %v6583_v21 }
 0x2dc   : > { %13342 = vmatmul.mubr.f32.vlgmr.msra.gmra.mrb[58].mxu1 %v6155_v37 }
 0x2dd   : > { %14220 = vmatpush3.bf16.xpose.msra.mxu1 %v17619_v26  ;;  %13348 = vmatprep.mubr.f32.mxu1 %v6146_v9 }
 0x2de   : > { %14222 = vmatprep.subr.bf16.mxu1 %v17622_v49 }
 0x2e4   : > { %13349 = vmatmul.mubr.f32.vlgmr.msra.gmra.mrb[58].mxu1 %v6156_v42 }
 0x2e5   : > { %14224 = vmatpush3.bf16.xpose.msra.mxu1 %v17622_v49  ;;  %13355 = vmatprep.mubr.f32.mxu1 %v6144_v61 }
 0x2e6   : > { %14226 = vmatprep.subr.bf16.mxu1 %v17619_v26 }
 0x2ec   : > { %13356 = vmatmul.mubr.f32.vlgmr.msra.gmra.mrb[58].mxu1 %v6154_v2 }
 0x2ed   : > { %14228 = vmatpush3.bf16.xpose.msra.mxu1 %v17619_v26  ;;  %13362 = vmatprep.mubr.f32.mxu1 %v6144_v61 }
 0x2ee   : > { %14254 = vmatprep.subr.bf16.mxu1 %v17623_v46 }
 0x2f4   : > { %13363 = vmatmul.mubr.f32.vlgmr.msra.gmra.mrb[58].mxu1 %v6154_v2 }
 0x2f5   : > { %14256 = vmatpush3.bf16.msra.mxu1 %v17623_v46 }
 0x2f6   : > { %14258 = vmatprep.subr.bf16.mxu1 %v16203_v30  ;;  %v16410_v59 = vpop.f32.mrb[32].mxu0 }
 0x2f7   : > { %v16412_v25 = vpop.f32.mrb[33].mxu0  ;;  %v6607_v40 = vsel %vm6579_vm2, %v16410_v59, -inf }
 0x2f8   : > { %v6604_v13 = vsel %vm6579_vm2, %v16412_v25, -inf }
 0x307   : > { %v13112_v35 = vpop.f32.mrb[50].mxu1 }
 0x308   : > { %v3557_v12 = vpop.f32.mrb[51].mxu1  ;;  %v6589_v20 = vsel %vm6579_vm2, %v13112_v35, -inf }
 0x309   : > { %v6586_v18 = vsel %vm6579_vm2, %v3557_v12, -inf }
 0x30a   : > { %6587 = vmax.xlane.f32.xlu1 %v6586_v18 }
 0x30e   : > { %6590 = vmax.xlane.f32.xlu1 %v6589_v20 }
 0x326   : > { %v16416_v41 = vpop.f32.mrb[34].mxu0 }
 0x327   : > { %v16418_v63 = vpop.f32.mrb[35].mxu0 }
 0x328   : > { %v6616_v53 = vsel %vm6579_vm2, %v16418_v63, -inf }
 0x337   : > { %v13154_v38 = vpop.f32.mrb[52].mxu1 }
 0x338   : > { %v4059_v39 = vpop.f32.mrb[53].mxu1  ;;  %v6595_v45 = vsel %vm6579_vm2, %v13154_v38, -inf }
 0x339   : > { %6596 = vmax.xlane.f32.xlu1 %v6595_v45  ;;  %v6592_v36 = vsel %vm6579_vm2, %v4059_v39, -inf }
 0x33a   : > { %6593 = vmax.xlane.f32.xlu0 %v6592_v36 }
 0x363   : > { %v6582_v24 = vpop.xlane.xlu0 %6581 }
 0x364   : > { %v6628_v58 = vsub.f32 %v3055_v60, %v6582_v24 }
 0x366   : > { %v6644_v16 = vmul.f32 1.442695, %v6628_v58 }
 0x367   : > { %v16422_v51 = vpop.f32.mrb[54].mxu1  ;;  %v6585_v23 = vpop.xlane.xlu0 %6584 }
 0x368   : > { %v16424_v29 = vpop.f32.mrb[55].mxu1  ;;  %v6601_v31 = vsel %vm6579_vm2, %v16422_v51, -inf  ;;  %v6629_v55 = vsub.f32 %v13070_v15, %v6585_v23  ;;  %v6619_v15 = vsel %vm6579_vm2, %v16416_v41, -inf }
 0x369   : > { %6602 = vmax.xlane.f32.xlu1 %v6601_v31  ;;  %v6598_v14 = vsel %vm6579_vm2, %v16424_v29, -inf }
 0x36a   : > { %6599 = vmax.xlane.f32.xlu0 %v6598_v14  ;;  %v6646_v32 = vmul.f32 1.442695, %v6629_v55 }
 0x36c   : > { %15105 = vpow2.f32 %v6646_v32 }
 0x36d   : > { %15107 = vpow2.f32 %v6644_v16 }
 0x36e   : > { %6605 = vmax.xlane.f32.xlu0 %v6604_v13 }
 0x372   : > { %6608 = vmax.xlane.f32.xlu0 %v6607_v40 }
 0x376   : > { %v16434_v11 = vpop.eup %15105 }
 0x377   : > { %v6679_v61 = vsel %vm6579_vm2, %v16434_v11, 0.0  ;;  %v16438_v57 = vpop.eup %15107 }
 0x378   : > { %6680 = vadd.xlane.f32.xlu1 %v6679_v61  ;;  %v6676_v34 = vsel %vm6579_vm2, %v16438_v57, 0.0 }
 0x37c   : > { %6677 = vadd.xlane.f32.xlu1 %v6676_v34 }
 0x397   : > { %v6588_v2 = vpop.xlane.xlu1 %6587  ;;  %v16442_v9 = vpop.f32.mrb[56].mxu1 }
 0x398   : > { %v6630_v37 = vsub.f32 %v3557_v12, %v6588_v2  ;;  %v16444_v26 = vpop.f32.mrb[57].mxu1  ;;  %v6613_v4 = vsel %vm6579_vm2, %v16442_v9, -inf }
 0x399   : > { %v6610_v54 = vsel %vm6579_vm2, %v16444_v26, -inf }
 0x39a   : > { %v6648_v42 = vmul.f32 1.442695, %v6630_v37  ;;  %6611 = vmax.xlane.f32.xlu0 %v6610_v54 }
 0x39b   : > { %v6591_v27 = vpop.xlane.xlu1 %6590 }
 0x39c   : > { %15109 = vpow2.f32 %v6648_v42  ;;  %v6631_v33 = vsub.f32 %v13112_v35, %v6591_v27 }
 0x39e   : > { %v6650_v19 = vmul.f32 1.442695, %v6631_v33  ;;  %6614 = vmax.xlane.f32.xlu0 %v6613_v4 }
 0x3a0   : > { %15111 = vpow2.f32 %v6650_v19 }
 0x3a2   : > { %6617 = vmax.xlane.f32.xlu0 %v6616_v53 }
 0x3a6   : > { %v16454_v60 = vpop.eup %15109  ;;  %6620 = vmax.xlane.f32.xlu0 %v6619_v15 }
 0x3a7   : > { %v6682_v3 = vsel %vm6579_vm2, %v16454_v60, 0.0 }
 0x3a8   : > { %6683 = vadd.xlane.f32.xlu1 %v6682_v3 }
 0x3aa   : > { %v16458_v21 = vpop.eup %15111 }
 0x3ab   : > { %v6685_v49 = vsel %vm6579_vm2, %v16458_v21, 0.0 }
 0x3ac   : > { %6686 = vadd.xlane.f32.xlu1 %v6685_v49 }
 0x3c6   : > { %v6597_v35 = vpop.xlane.xlu1 %6596 }
 0x3c7   : > { %v6633_v12 = vsub.f32 %v13154_v38, %v6597_v35  ;;  %v6594_v18 = vpop.xlane.xlu0 %6593  ;;  %v16462_v20 = vpop.f32.mrb[58].mxu1 }
 0x3c8   : > { %v6632_v45 = vsub.f32 %v4059_v39, %v6594_v18  ;;  %v16464_v36 = vpop.f32.mrb[59].mxu1  ;;  %v6625_v58 = vsel %vm6579_vm2, %v16462_v20, -inf }
 0x3c9   : > { %v6654_v24 = vmul.f32 1.442695, %v6633_v12  ;;  %v6622_v31 = vsel %vm6579_vm2, %v16464_v36, -inf }
 0x3ca   : > { %v6652_v14 = vmul.f32 1.442695, %v6632_v45  ;;  %6623 = vmax.xlane.f32.xlu0 %v6622_v31 }
 0x3cb   : > { %15113 = vpow2.f32 %v6654_v24 }
 0x3cc   : > { %15115 = vpow2.f32 %v6652_v14 }
 0x3ce   : > { %6626 = vmax.xlane.f32.xlu0 %v6625_v58 }
 0x3d5   : > { %v16470_v23 = vpop.eup %15113 }
 0x3d6   : > { %v6691_v38 = vsel %vm6579_vm2, %v16470_v23, 0.0  ;;  %v16474_v39 = vpop.eup %15115 }
 0x3d7   : > { %6692 = vadd.xlane.f32.xlu1 %v6691_v38  ;;  %v6688_v55 = vsel %vm6579_vm2, %v16474_v39, 0.0 }
 0x3db   : > { %6689 = vadd.xlane.f32.xlu1 %v6688_v55 }
 0x3f6   : > { %v6603_v13 = vpop.xlane.xlu1 %6602 }
 0x3f7   : > { %v6635_v16 = vsub.f32 %v16422_v51, %v6603_v13  ;;  %v6600_v32 = vpop.xlane.xlu0 %6599 }
 0x3f8   : > { %v6634_v40 = vsub.f32 %v16424_v29, %v6600_v32 }
 0x3f9   : > { %v6658_v61 = vmul.f32 1.442695, %v6635_v16 }
 0x3fa   : > { %v6656_v34 = vmul.f32 1.442695, %v6634_v40 }
 0x3fb   : > { %v6606_v2 = vpop.xlane.xlu0 %6605 }
 0x3fc   : > { %15117 = vpow2.f32 %v6656_v34  ;;  %v6636_v37 = vsub.f32 %v16412_v25, %v6606_v2  ;;  %v17624_v2 = vld [vmem:[#allocation22_spill] sm:$0xff] }
 0x3fd   : > { %15119 = vpow2.f32 %v6658_v61 }
 0x3fe   : > { %v6660_v54 = vmul.f32 1.442695, %v6636_v37 }
 0x3ff   : > { %v6609_v42 = vpop.xlane.xlu0 %6608 }
 0x400   : > { %15121 = vpow2.f32 %v6660_v54  ;;  %v6637_v27 = vsub.f32 %v16410_v59, %v6609_v42 }
 0x402   : > { %v6662_v33 = vmul.f32 1.442695, %v6637_v27 }
 0x404   : > { %15123 = vpow2.f32 %v6662_v33 }
 0x405   : > { %v6681_v19 = vpop.xlane.xlu1 %6680 }
 0x406   : > { %v16482_v4 = vpop.eup %15117  ;;  %15125 = vrcp.f32 %v6681_v19 }
 0x407   : > { %v6694_v51 = vsel %vm6579_vm2, %v16482_v4, 0.0  ;;  %v16486_v29 = vpop.eup %15119 }
 0x408   : > { %6695 = vadd.xlane.f32.xlu1 %v6694_v51  ;;  %v6697_v25 = vsel %vm6579_vm2, %v16486_v29, 0.0 }
 0x409   : > { %v6678_v15 = vpop.xlane.xlu1 %6677 }
 0x40a   : > { %v16488_v53 = vpop.eup %15121  ;;  %15127 = vrcp.f32 %v6678_v15 }
 0x40b   : > { %v6700_v59 = vsel %vm6579_vm2, %v16488_v53, 0.0 }
 0x40c   : > { %6698 = vadd.xlane.f32.xlu1 %v6697_v25  ;;  %6701 = vadd.xlane.f32.xlu0 %v6700_v59 }
 0x40e   : > { %v16494_v3 = vpop.eup %15123 }
 0x40f   : > { %v6703_v49 = vsel %vm6579_vm2, %v16494_v3, 0.0 }
 0x410   : > { %6704 = vadd.xlane.f32.xlu1 %v6703_v49  ;;  %v15126_v35 = vpop.eup %15125 }
 0x411   : > { %v6727_v12 = vmul.f32 %v15126_v35, %v16434_v11 }
 0x413   : > { %v6760_v18 = vsel %vm6579_vm2, %v6727_v12, 0 }
 0x414   : > { %v15128_v45 = vpop.eup %15127  ;;  %v16500_v24 = vand.u32 4294901760, %v6760_v18 }
 0x415   : > { %v6725_v31 = vmul.f32 %v15128_v45, %v16438_v57 }
 0x416   : > { %v6840_v14 = vsub.f32 %v6760_v18, %v16500_v24 }
 0x417   : > { %v6757_v58 = vsel %vm6579_vm2, %v6725_v31, 0 }
 0x418   : > { %v16505_v38 = vand.u32 4294901760, %v6757_v58  ;;  %v6841_v55 = vand.u32 4294901760, %v6840_v14 }
 0x41a   : > { %v6830_v13 = vsub.f32 %v6757_v58, %v16505_v38  ;;  %v6842_v32 = vsub.f32 %v6840_v14, %v6841_v55 }
 0x41c   : > { %v6831_v16 = vand.u32 4294901760, %v6830_v13  ;;  %v6843_v61 = vand.u32 4294901760, %v6842_v32 }
 0x41e   : > { %v6832_v40 = vsub.f32 %v6830_v13, %v6831_v16 }
 0x420   : > { %v6833_v11 = vand.u32 4294901760, %v6832_v40 }
 0x422   : > { %13369 = vmatprep.mubr.f32.mxu0 %v6833_v11  ;;  %v17625_v11 = vld [vmem:[#allocation16_spill] sm:$0xff] }
 0x423   : > { %13370 = vmatmul.mubr.f32.vlgmr.msra.gmra.mrb[36].mxu0 %v6843_v61 }
 0x424   : > { %14236 = vmatpush3.bf16.msra.mxu0 %v16131_v43  ;;  %13376 = vmatprep.mubr.f32.mxu0 %v16505_v38 }
 0x425   : > { %14238 = vmatprep.subr.bf16.mxu0 %v17624_v2 }
 0x427   : > { %v6612_v34 = vpop.xlane.xlu0 %6611 }
 0x428   : > { %v6638_v57 = vsub.f32 %v16444_v26, %v6612_v34 }
 0x42a   : > { %v6664_v37 = vmul.f32 1.442695, %v6638_v57 }
 0x42b   : > { %v6615_v54 = vpop.xlane.xlu0 %6614  ;;  %13377 = vmatmul.mubr.f32.vlgmr.msra.gmra.mrb[36].mxu0 %v16500_v24 }
 0x42c   : > { %15129 = vpow2.f32 %v6664_v37  ;;  %v6639_v42 = vsub.f32 %v16442_v9, %v6615_v54  ;;  %14240 = vmatpush3.bf16.msra.mxu0 %v17624_v2  ;;  %13383 = vmatprep.mubr.f32.mxu0 %v6830_v13 }
 0x42d   : > { %14242 = vmatprep.subr.bf16.mxu0 %v16055_v8 }
 0x42e   : > { %v6666_v27 = vmul.f32 1.442695, %v6639_v42 }
 0x42f   : > { %v6618_v33 = vpop.xlane.xlu0 %6617 }
 0x430   : > { %15131 = vpow2.f32 %v6666_v27  ;;  %v6640_v43 = vsub.f32 %v16418_v63, %v6618_v33 }
 0x432   : > { %v6668_v26 = vmul.f32 1.442695, %v6640_v43 }
 0x433   : > { %v6621_v51 = vpop.xlane.xlu0 %6620  ;;  %13384 = vmatmul.mubr.f32.vlgmr.msra.gmra.mrb[36].mxu0 %v6840_v14 }
 0x434   : > { %15133 = vpow2.f32 %v6668_v26  ;;  %v6641_v19 = vsub.f32 %v16416_v41, %v6621_v51  ;;  %14244 = vmatpush3.bf16.msra.mxu0 %v16055_v8  ;;  %13390 = vmatprep.mubr.f32.mxu0 %v6831_v16 }
 0x435   : > { %v6684_v25 = vpop.xlane.xlu1 %6683  ;;  %14246 = vmatprep.subr.bf16.mxu0 %v16209_v47 }
 0x436   : > { %v16518_v59 = vpop.eup %15129  ;;  %v6670_v9 = vmul.f32 1.442695, %v6641_v19  ;;  %15135 = vrcp.f32 %v6684_v25 }
 0x437   : > { %v6706_v15 = vsel %vm6579_vm2, %v16518_v59, 0.0 }
 0x438   : > { %15137 = vpow2.f32 %v6670_v9  ;;  %6707 = vadd.xlane.f32.xlu0 %v6706_v15 }
 0x439   : > { %v6687_v63 = vpop.xlane.xlu1 %6686 }
 0x43a   : > { %v16524_v49 = vpop.eup %15131  ;;  %15139 = vrcp.f32 %v6687_v63 }
 0x43b   : > { %v6709_v41 = vsel %vm6579_vm2, %v16524_v49, 0.0  ;;  %13391 = vmatmul.mubr.f32.vlgmr.msra.gmra.mrb[36].mxu0 %v6841_v55 }
 0x43c   : > { %6710 = vadd.xlane.f32.xlu1 %v6709_v41  ;;  %14248 = vmatpush3.bf16.msra.mxu0 %v16209_v47 }
 0x43d   : > { %13397 = vmatprep.mubr.f32.mxu0 %v16505_v38  ;;  %14250 = vmatprep.subr.bf16.mxu0 %v16055_v8 }
 0x43e   : > { %v16528_v35 = vpop.eup %15133 }
 0x43f   : > { %v6712_v12 = vsel %vm6579_vm2, %v16528_v35, 0.0 }
 0x440   : > { %v15136_v18 = vpop.eup %15135  ;;  %6713 = vadd.xlane.f32.xlu0 %v6712_v12 }
 0x441   : > { %v6729_v45 = vmul.f32 %v15136_v18, %v16454_v60  ;;  %v17628_v18 = vld [vmem:[#allocation17_spill] sm:$0xff] }
 0x442   : > { %v16536_v31 = vpop.eup %15137 }
 0x443   : > { %v6715_v14 = vsel %vm6579_vm2, %v16536_v31, 0.0  ;;  %v7265_v58 = vsel %vm6579_vm2, %v6729_v45, 0  ;;  %13398 = vmatmul.mubr.f32.vlgmr.msra.gmra.mrb[36].mxu0 %v16500_v24 }
 0x444   : > { %v15140_v55 = vpop.eup %15139  ;;  %6716 = vadd.xlane.f32.xlu1 %v6715_v14  ;;  %v7337_v13 = vand.u32 4294901760, %v7265_v58  ;;  %14252 = vmatpush3.bf16.msra.mxu0 %v16055_v8  ;;  %v17626_v8 = vld [vmem:[#allocation24_spill] sm:$0xff] }
 0x445   : > { %v6731_v16 = vmul.f32 %v15140_v55, %v16458_v21  ;;  %13404 = vmatprep.mubr.f32.mxu0 %v16505_v38  ;;  %14278 = vmatprep.subr.bf16.mxu0 %v17625_v11 }
 0x446   : > { %v7338_v47 = vsub.f32 %v7265_v58, %v7337_v13 }
 0x447   : > { %v7268_v60 = vsel %vm6579_vm2, %v6731_v16, 0 }
 0x448   : > { %v7339_v32 = vand.u32 4294901760, %v7338_v47  ;;  %v7347_v40 = vand.u32 4294901760, %v7268_v60 }
 0x44a   : > { %v7340_v61 = vsub.f32 %v7338_v47, %v7339_v32  ;;  %v7348_v34 = vsub.f32 %v7268_v60, %v7347_v40 }
 0x44b   : > { %13405 = vmatmul.mubr.f32.vlgmr.msra.gmra.mrb[36].mxu0 %v16500_v24 }
 0x44c   : > { %v7341_v57 = vand.u32 4294901760, %v7340_v61  ;;  %v7349_v2 = vand.u32 4294901760, %v7348_v34  ;;  %14280 = vmatpush3.bf16.msra.mxu0 %v17625_v11 }
 0x44d   : > { %14282 = vmatprep.subr.bf16.mxu0 %v16223_v17 }
 0x44e   : > { %13411 = vmatprep.mubr.f32.mxu1 %v7341_v57  ;;  %v7350_v37 = vsub.f32 %v7348_v34, %v7349_v2 }
 0x450   : > { %v7351_v21 = vand.u32 4294901760, %v7350_v37 }
 0x452   : > { %13412 = vmatmul.mubr.f32.vlgmr.msra.gmra.mrb[60].mxu1 %v7351_v21 }
 0x453   : > { %14260 = vmatpush3.bf16.msra.mxu1 %v16203_v30  ;;  %13418 = vmatprep.mubr.f32.mxu1 %v7337_v13  ;;  %v17627_v30 = vld [vmem:[#allocation25_spill] sm:$0xff] }
 0x454   : > { %14262 = vmatprep.subr.bf16.mxu1 %v17626_v8 }
 0x457   : > { %v6624_v38 = vpop.xlane.xlu0 %6623 }
 0x458   : > { %v6642_v54 = vsub.f32 %v16464_v36, %v6624_v38 }
 0x45a   : > { %v6672_v42 = vmul.f32 1.442695, %v6642_v54  ;;  %13419 = vmatmul.mubr.f32.vlgmr.msra.gmra.mrb[60].mxu1 %v7347_v40 }
 0x45b   : > { %14264 = vmatpush3.bf16.msra.mxu1 %v17626_v8  ;;  %13425 = vmatprep.mubr.f32.mxu1 %v7338_v47  ;;  %v6627_v24 = vpop.xlane.xlu0 %6626  ;;  %v17631_v8 = vld [vmem:[#allocation20_spill] sm:$0xff] }
 0x45c   : > { %15141 = vpow2.f32 %v6672_v42  ;;  %14266 = vmatprep.subr.bf16.mxu1 %v17623_v46  ;;  %v6643_v27 = vsub.f32 %v16462_v20, %v6627_v24 }
 0x45e   : > { %v6674_v33 = vmul.f32 1.442695, %v6643_v27 }
 0x460   : > { %15143 = vpow2.f32 %v6674_v33 }
 0x462   : > { %13426 = vmatmul.mubr.f32.vlgmr.msra.gmra.mrb[60].mxu1 %v7348_v34 }
 0x463   : > { %14268 = vmatpush3.bf16.msra.mxu1 %v17623_v46  ;;  %13432 = vmatprep.mubr.f32.mxu1 %v7339_v32  ;;  %v17630_v32 = vld [vmem:[#allocation28_spill] sm:$0xff] }
 0x464   : > { %14270 = vmatprep.subr.bf16.mxu1 %v17627_v30  ;;  %v6693_v36 = vpop.xlane.xlu1 %6692 }
 0x465   : > { %15145 = vrcp.f32 %v6693_v36 }
 0x466   : > { %v16558_v43 = vpop.eup %15141 }
 0x467   : > { %v6718_v26 = vsel %vm6579_vm2, %v16558_v43, 0.0 }
 0x468   : > { %v6690_v51 = vpop.xlane.xlu1 %6689  ;;  %6719 = vadd.xlane.f32.xlu0 %v6718_v26 }
 0x469   : > { %15147 = vrcp.f32 %v6690_v51 }
 0x46a   : > { %v16562_v19 = vpop.eup %15143  ;;  %13433 = vmatmul.mubr.f32.vlgmr.msra.gmra.mrb[60].mxu1 %v7349_v2 }
 0x46b   : > { %14272 = vmatpush3.bf16.msra.mxu1 %v17627_v30  ;;  %13439 = vmatprep.mubr.f32.mxu1 %v7337_v13  ;;  %v6721_v20 = vsel %vm6579_vm2, %v16562_v19, 0.0 }
 0x46c   : > { %14274 = vmatprep.subr.bf16.mxu1 %v17623_v46  ;;  %6722 = vadd.xlane.f32.xlu1 %v6721_v20 }
 0x46f   : > { %v15146_v25 = vpop.eup %15145 }
 0x470   : > { %v6735_v9 = vmul.f32 %v15146_v25, %v16470_v23 }
 0x472   : > { %13440 = vmatmul.mubr.f32.vlgmr.msra.gmra.mrb[60].mxu1 %v7347_v40  ;;  %v7776_v15 = vsel %vm6579_vm2, %v6735_v9, 0  ;;  %v17632_v9 = vld [vmem:[#allocation29_spill] sm:$0xff] }
 0x473   : > { %v15148_v63 = vpop.eup %15147  ;;  %14276 = vmatpush3.bf16.msra.mxu1 %v17623_v46  ;;  %13446 = vmatprep.mubr.f32.mxu1 %v7337_v13  ;;  %v7855_v41 = vand.u32 4294901760, %v7776_v15 }
 0x474   : > { %v6733_v12 = vmul.f32 %v15148_v63, %v16474_v39  ;;  %14302 = vmatprep.subr.bf16.mxu1 %v17628_v18  ;;  %v17629_v39 = vld [vmem:[#allocation26_spill] sm:$0xff] }
 0x475   : > { %v7856_v45 = vsub.f32 %v7776_v15, %v7855_v41 }
 0x476   : > { %v7773_v14 = vsel %vm6579_vm2, %v6733_v12, 0 }
 0x477   : > { %v7845_v58 = vand.u32 4294901760, %v7773_v14  ;;  %v7857_v55 = vand.u32 4294901760, %v7856_v45 }
 0x479   : > { %v7846_v16 = vsub.f32 %v7773_v14, %v7845_v58  ;;  %v7858_v47 = vsub.f32 %v7856_v45, %v7857_v55 }
 0x47a   : > { %13447 = vmatmul.mubr.f32.vlgmr.msra.gmra.mrb[60].mxu1 %v7347_v40 }
 0x47b   : > { %14304 = vmatpush3.bf16.msra.mxu1 %v17628_v18  ;;  %v7847_v23 = vand.u32 4294901760, %v7846_v16  ;;  %v7859_v60 = vand.u32 4294901760, %v7858_v47  ;;  %v17633_v47 = vld [vmem:[#allocation30_spill] sm:$0xff] }
 0x47c   : > { %14306 = vmatprep.subr.bf16.mxu1 %v16246_v10 }
 0x47d   : > { %v7848_v46 = vsub.f32 %v7846_v16, %v7847_v23 }
 0x47f   : > { %v7849_v13 = vand.u32 4294901760, %v7848_v46 }
 0x481   : > { %13453 = vmatprep.mubr.f32.mxu0 %v7849_v13 }
 0x482   : > { %13454 = vmatmul.mubr.f32.vlgmr.msra.gmra.mrb[38].mxu0 %v7859_v60 }
 0x483   : > { %14284 = vmatpush3.bf16.msra.mxu0 %v16223_v17  ;;  %13460 = vmatprep.mubr.f32.mxu0 %v7845_v58 }
 0x484   : > { %14286 = vmatprep.subr.bf16.mxu0 %v17629_v39 }
 0x48a   : > { %13461 = vmatmul.mubr.f32.vlgmr.msra.gmra.mrb[38].mxu0 %v7855_v41 }
 0x48b   : > { %14288 = vmatpush3.bf16.msra.mxu0 %v17629_v39  ;;  %13467 = vmatprep.mubr.f32.mxu0 %v7846_v16 }
 0x48c   : > { %14290 = vmatprep.subr.bf16.mxu0 %v17625_v11 }
 0x492   : > { %13468 = vmatmul.mubr.f32.vlgmr.msra.gmra.mrb[38].mxu0 %v7856_v45 }
 0x493   : > { %14292 = vmatpush3.bf16.msra.mxu0 %v17625_v11  ;;  %13474 = vmatprep.mubr.f32.mxu0 %v7847_v23 }
 0x494   : > { %14294 = vmatprep.subr.bf16.mxu0 %v17630_v32 }
 0x495   : > { %v6696_v40 = vpop.xlane.xlu1 %6695 }
 0x496   : > { %15149 = vrcp.f32 %v6696_v40  ;;  %v17634_v40 = vld [vmem:[#allocation23_spill] sm:$0xff] }
 0x499   : > { %v6699_v61 = vpop.xlane.xlu1 %6698  ;;  %v6702_v34 = vpop.xlane.xlu0 %6701 }
 0x49a   : > { %15151 = vrcp.f32 %v6699_v61  ;;  %13475 = vmatmul.mubr.f32.vlgmr.msra.gmra.mrb[38].mxu0 %v7857_v55 }
 0x49b   : > { %15153 = vrcp.f32 %v6702_v34  ;;  %14296 = vmatpush3.bf16.msra.mxu0 %v17630_v32  ;;  %13481 = vmatprep.mubr.f32.mxu0 %v7845_v58 }
 0x49c   : > { %14298 = vmatprep.subr.bf16.mxu0 %v17625_v11 }
 0x49d   : > { %v6705_v17 = vpop.xlane.xlu1 %6704 }
 0x49e   : > { %15155 = vrcp.f32 %v6705_v17  ;;  %v17635_v17 = vld [vmem:[#allocation27_spill] sm:$0xff] }
 0x4a0   : > { %v15150_v57 = vpop.eup %15149 }
 0x4a1   : > { %v6737_v2 = vmul.f32 %v15150_v57, %v16482_v4 }
 0x4a2   : > { %13482 = vmatmul.mubr.f32.vlgmr.msra.gmra.mrb[38].mxu0 %v7855_v41 }
 0x4a3   : > { %14300 = vmatpush3.bf16.msra.mxu0 %v17625_v11  ;;  %13488 = vmatprep.mubr.f32.mxu0 %v7845_v58  ;;  %v8281_v37 = vsel %vm6579_vm2, %v6737_v2, 0 }
 0x4a4   : > { %v15152_v21 = vpop.eup %15151  ;;  %14326 = vmatprep.subr.bf16.mxu0 %v17631_v8  ;;  %v16588_v38 = vand.u32 4294901760, %v8281_v37 }
 0x4a5   : > { %v15154_v54 = vpop.eup %15153  ;;  %v6739_v42 = vmul.f32 %v15152_v21, %v16486_v29 }
 0x4a6   : > { %v6741_v24 = vmul.f32 %v15154_v54, %v16488_v53  ;;  %v8354_v27 = vsub.f32 %v8281_v37, %v16588_v38 }
 0x4a7   : > { %v8284_v4 = vsel %vm6579_vm2, %v6739_v42, 0 }
 0x4a8   : > { %v15156_v33 = vpop.eup %15155  ;;  %v8355_v30 = vand.u32 4294901760, %v8354_v27  ;;  %v16594_v11 = vand.u32 4294901760, %v8284_v4  ;;  %v8789_v36 = vsel %vm6579_vm2, %v6741_v24, 0 }
 0x4a9   : > { %v6743_v26 = vmul.f32 %v15156_v33, %v16494_v3  ;;  %v16598_v51 = vand.u32 4294901760, %v8789_v36 }
 0x4aa   : > { %13489 = vmatmul.mubr.f32.vlgmr.msra.gmra.mrb[38].mxu0 %v7855_v41  ;;  %v8356_v20 = vsub.f32 %v8354_v27, %v8355_v30  ;;  %v8364_v29 = vsub.f32 %v8284_v4, %v16594_v11 }
 0x4ab   : > { %14328 = vmatpush3.bf16.msra.mxu0 %v17631_v8  ;;  %v8862_v53 = vsub.f32 %v8789_v36, %v16598_v51  ;;  %v8792_v25 = vsel %vm6579_vm2, %v6743_v26, 0 }
 0x4ac   : > { %14330 = vmatprep.subr.bf16.mxu0 %v17632_v9  ;;  %v8357_v15 = vand.u32 4294901760, %v8356_v20  ;;  %v8365_v63 = vand.u32 4294901760, %v8364_v29  ;;  %v16605_v12 = vand.u32 4294901760, %v8792_v25 }
 0x4ad   : > { %v8863_v45 = vand.u32 4294901760, %v8862_v53 }
 0x4ae   : > { %13495 = vmatprep.mubr.f32.mxu1 %v8357_v15  ;;  %v8366_v3 = vsub.f32 %v8364_v29, %v8365_v63  ;;  %v8872_v41 = vsub.f32 %v8792_v25, %v16605_v12 }
 0x4af   : > { %v8864_v14 = vsub.f32 %v8862_v53, %v8863_v45 }
 0x4b0   : > { %v8367_v58 = vand.u32 4294901760, %v8366_v3  ;;  %v8873_v55 = vand.u32 4294901760, %v8872_v41 }
 0x4b1   : > { %v8865_v16 = vand.u32 4294901760, %v8864_v14 }
 0x4b2   : > { %13496 = vmatmul.mubr.f32.vlgmr.msra.gmra.mrb[62].mxu1 %v8367_v58  ;;  %v8874_v23 = vsub.f32 %v8872_v41, %v8873_v55 }
 0x4b3   : > { %14308 = vmatpush3.bf16.msra.mxu1 %v16246_v10  ;;  %13537 = vmatprep.mubr.f32.mxu0 %v8865_v16 }
 0x4b4   : > { %13502 = vmatprep.mubr.f32.mxu1 %v16588_v38  ;;  %14310 = vmatprep.subr.bf16.mxu1 %v17633_v47  ;;  %v8875_v46 = vand.u32 4294901760, %v8874_v23  ;;  %v16731_v23 = vld [vmem:[%s17440_s2 + $0x10] sm:$0xff] }
 0x4b6   : > { %13538 = vmatmul.mubr.f32.vlgmr.msra.gmra.mrb[40].mxu0 %v8875_v46 }
 0x4b7   : > { %14332 = vmatpush3.bf16.msra.mxu0 %v17632_v9  ;;  %13544 = vmatprep.mubr.f32.mxu0 %v16598_v51  ;;  %v16688_v9 = vld [vmem:[%s17440_s2] sm:$0xff] }
 0x4b8   : > { %14334 = vmatprep.subr.bf16.mxu0 %v16262_v62 }
 0x4ba   : > { %13503 = vmatmul.mubr.f32.vlgmr.msra.gmra.mrb[62].mxu1 %v16594_v11 }
 0x4bb   : > { %14312 = vmatpush3.bf16.msra.mxu1 %v17633_v47  ;;  %13509 = vmatprep.mubr.f32.mxu1 %v8354_v27  ;;  %v16736_v47 = vld [vmem:[%s17440_s2 + $0x18] sm:$0xff] }
 0x4bc   : > { %14314 = vmatprep.subr.bf16.mxu1 %v17628_v18 }
 0x4be   : > { %13545 = vmatmul.mubr.f32.vlgmr.msra.gmra.mrb[40].mxu0 %v16605_v12 }
 0x4bf   : > { %14336 = vmatpush3.bf16.msra.mxu0 %v16262_v62  ;;  %13551 = vmatprep.mubr.f32.mxu0 %v8862_v53 }
 0x4c0   : > { %14338 = vmatprep.subr.bf16.mxu0 %v17631_v8 }
 0x4c2   : > { %13510 = vmatmul.mubr.f32.vlgmr.msra.gmra.mrb[62].mxu1 %v8364_v29 }
 0x4c3   : > { %14316 = vmatpush3.bf16.msra.mxu1 %v17628_v18  ;;  %13516 = vmatprep.mubr.f32.mxu1 %v8355_v30 }
 0x4c4   : > { %14318 = vmatprep.subr.bf16.mxu1 %v16268_v0 }
 0x4c5   : > { %v6708_v10 = vpop.xlane.xlu0 %6707 }
 0x4c6   : > { %13552 = vmatmul.mubr.f32.vlgmr.msra.gmra.mrb[40].mxu0 %v8872_v41  ;;  %15157 = vrcp.f32 %v6708_v10 }
 0x4c7   : > { %14340 = vmatpush3.bf16.msra.mxu0 %v17631_v8  ;;  %13558 = vmatprep.mubr.f32.mxu0 %v8863_v45  ;;  %v10821_v45 = vand.u32 4294901760, %v16688_v9 }
 0x4c8   : > { %14342 = vmatprep.subr.bf16.mxu0 %v16272_v44 }
 0x4c9   : > { %v6711_v13 = vpop.xlane.xlu1 %6710 }
 0x4ca   : > { %15159 = vrcp.f32 %v6711_v13  ;;  %13517 = vmatmul.mubr.f32.vlgmr.msra.gmra.mrb[62].mxu1 %v8365_v63  ;;  %v10827_v13 = vand.u32 4294901760, %v16731_v23 }
 0x4cb   : > { %14320 = vmatpush3.bf16.msra.mxu1 %v16268_v0  ;;  %13523 = vmatprep.mubr.f32.mxu1 %v16588_v38 }
 0x4cc   : > { %14322 = vmatprep.subr.bf16.mxu1 %v17628_v18 }
 0x4cd   : > { %v6714_v62 = vpop.xlane.xlu0 %6713 }
 0x4ce   : > { %13559 = vmatmul.mubr.f32.vlgmr.msra.gmra.mrb[40].mxu0 %v8873_v55  ;;  %15161 = vrcp.f32 %v6714_v62  ;;  %v10830_v62 = vand.u32 4294901760, %v16736_v47 }
 0x4cf   : > { %14344 = vmatpush3.bf16.msra.mxu0 %v16272_v44  ;;  %13565 = vmatprep.mubr.f32.mxu0 %v16598_v51 }
 0x4d0   : > { %14346 = vmatprep.subr.bf16.mxu0 %v17631_v8  ;;  %v15158_v60 = vpop.eup %15157 }
 0x4d1   : > { %v6717_v39 = vpop.xlane.xlu1 %6716  ;;  %v6745_v32 = vmul.f32 %v15158_v60, %v16518_v59  ;;  %v16749_v60 = vld [vmem:[%s17440_s2 + $0x20] sm:$0xff] }
 0x4d2   : > { %15163 = vrcp.f32 %v6717_v39  ;;  %13524 = vmatmul.mubr.f32.vlgmr.msra.gmra.mrb[62].mxu1 %v16594_v11  ;;  %v16754_v39 = vld [vmem:[%s17440_s2 + $0x28] sm:$0xff] }
 0x4d3   : > { %14324 = vmatpush3.bf16.msra.mxu1 %v17628_v18  ;;  %13530 = vmatprep.mubr.f32.mxu1 %v16588_v38  ;;  %v9297_v44 = vsel %vm6579_vm2, %v6745_v32, 0 }
 0x4d4   : > { %v15160_v0 = vpop.eup %15159  ;;  %14350 = vmatprep.subr.bf16.mxu1 %v17634_v40  ;;  %v16637_v34 = vand.u32 4294901760, %v9297_v44 }
 0x4d5   : > { %v6747_v61 = vmul.f32 %v15160_v0, %v16524_v49 }
 0x4d6   : > { %13566 = vmatmul.mubr.f32.vlgmr.msra.gmra.mrb[40].mxu0 %v16605_v12  ;;  %v9370_v59 = vsub.f32 %v9297_v44, %v16637_v34  ;;  %v10836_v44 = vand.u32 4294901760, %v16754_v39 }
 0x4d7   : > { %14348 = vmatpush3.bf16.msra.mxu0 %v17631_v8  ;;  %13572 = vmatprep.mubr.f32.mxu0 %v16598_v51  ;;  %v9300_v18 = vsel %vm6579_vm2, %v6747_v61, 0  ;;  %v16765_v61 = vpack.c.bf16 %v10830_v62, %v10827_v13 }
 0x4d8   : > { %14374 = vmatprep.subr.bf16.mxu0 %v17635_v17  ;;  %v16645_v57 = vand.u32 4294901760, %v9300_v18  ;;  %v15162_v2 = vpop.eup %15161  ;;  %v9371_v37 = vand.u32 4294901760, %v9370_v59 }
 0x4d9   : > { %v6749_v49 = vmul.f32 %v15162_v2, %v16528_v35  ;;  %v16799_v2 = vld [vmem:[%s17440_s2 + $0x48] sm:$0xff] }
 0x4da   : > { %13531 = vmatmul.mubr.f32.vlgmr.msra.gmra.mrb[62].mxu1 %v16594_v11  ;;  %v9380_v21 = vsub.f32 %v9300_v18, %v16645_v57  ;;  %v9372_v8 = vsub.f32 %v9370_v59, %v9371_v37 }
 0x4db   : > { %14352 = vmatpush3.bf16.msra.mxu1 %v17634_v40  ;;  %v9805_v42 = vsel %vm6579_vm2, %v6749_v49, 0  ;;  %v10848_v49 = vand.u32 4294901760, %v16799_v2 }
 0x4dc   : > { %v15164_v38 = vpop.eup %15163  ;;  %14354 = vmatprep.subr.bf16.mxu1 %v16285_v5  ;;  %v9381_v54 = vand.u32 4294901760, %v9380_v21  ;;  %v9373_v27 = vand.u32 4294901760, %v9372_v8  ;;  %v16654_v4 = vand.u32 4294901760, %v9805_v42  ;;  %v16815_v8 = vld [vmem:[%s17440_s2 + $0x50] sm:$0xff] }
 0x4dd   : > { %v6751_v24 = vmul.f32 %v15164_v38, %v16536_v31  ;;  %v16820_v38 = vld [vmem:[%s17440_s2 + $0x58] sm:$0xff] }
 0x4de   : > { %13573 = vmatmul.mubr.f32.vlgmr.msra.gmra.mrb[40].mxu0 %v16605_v12  ;;  %v9382_v35 = vsub.f32 %v9380_v21, %v9381_v54  ;;  %13579 = vmatprep.mubr.f32.mxu1 %v9373_v27  ;;  %v9878_v33 = vsub.f32 %v9805_v42, %v16654_v4  ;;  %v10851_v42 = vand.u32 4294901760, %v16815_v8  ;;  %v16843_v27 = vld [vmem:[%s17440_s2 + $0x68] sm:$0xff] }
 0x4df   : > { %14376 = vmatpush3.bf16.msra.mxu0 %v17635_v17  ;;  %v9808_v30 = vsel %vm6579_vm2, %v6751_v24, 0  ;;  %v10854_v24 = vand.u32 4294901760, %v16820_v38 }
 0x4e0   : > { %14378 = vmatprep.subr.bf16.mxu0 %v16292_v48  ;;  %v9383_v11 = vand.u32 4294901760, %v9382_v35  ;;  %v16661_v36 = vand.u32 4294901760, %v9808_v30  ;;  %v9879_v26 = vand.u32 4294901760, %v9878_v33  ;;  %v10860_v35 = vand.u32 4294901760, %v16843_v27 }
 0x4e2   : > { %13580 = vmatmul.mubr.f32.vlgmr.msra.gmra.mrb[64].mxu1 %v9383_v11  ;;  %v9888_v31 = vsub.f32 %v9808_v30, %v16661_v36  ;;  %v9880_v51 = vsub.f32 %v9878_v33, %v9879_v26  ;;  %v16859_v11 = vld [vmem:[%s17440_s2 + $0x70] sm:$0xff] }
 0x4e3   : > { %14356 = vmatpush3.bf16.msra.mxu1 %v16285_v5  ;;  %13586 = vmatprep.mubr.f32.mxu1 %v16637_v34 }
 0x4e4   : > { %14358 = vmatprep.subr.bf16.mxu1 %v16279_v1  ;;  %v9889_v20 = vand.u32 4294901760, %v9888_v31  ;;  %v9881_v29 = vand.u32 4294901760, %v9880_v51 }
 0x4e6   : > { %v9890_v53 = vsub.f32 %v9888_v31, %v9889_v20  ;;  %13621 = vmatprep.mubr.f32.mxu0 %v9881_v29 }
 0x4e8   : > { %v9891_v25 = vand.u32 4294901760, %v9890_v53  ;;  %v10863_v53 = vand.u32 4294901760, %v16859_v11 }
 0x4ea   : > { %13587 = vmatmul.mubr.f32.vlgmr.msra.gmra.mrb[64].mxu1 %v16645_v57  ;;  %13622 = vmatmul.mubr.f32.vlgmr.msra.gmra.mrb[42].mxu0 %v9891_v25 }
 0x4eb   : > { %14360 = vmatpush3.bf16.msra.mxu1 %v16279_v1  ;;  %14380 = vmatpush3.bf16.msra.mxu0 %v16292_v48 }
 0x4ec   : > { %13593 = vmatprep.mubr.f32.mxu1 %v9370_v59  ;;  %14362 = vmatprep.subr.bf16.mxu1 %v17634_v40  ;;  %v16776_v59 = vld [vmem:[%s17440_s2 + $0x38] sm:$0xff] }
 0x4ed   : > { %13628 = vmatprep.mubr.f32.mxu0 %v16654_v4  ;;  %14382 = vmatprep.subr.bf16.mxu0 %v16281_v56 }
 0x4f2   : > { %13594 = vmatmul.mubr.f32.vlgmr.msra.gmra.mrb[64].mxu1 %v9380_v21  ;;  %13629 = vmatmul.mubr.f32.vlgmr.msra.gmra.mrb[42].mxu0 %v16661_v36 }
 0x4f3   : > { %14364 = vmatpush3.bf16.msra.mxu1 %v17634_v40  ;;  %14384 = vmatpush3.bf16.msra.mxu0 %v16281_v56 }
 0x4f4   : > { %13600 = vmatprep.mubr.f32.mxu1 %v9371_v37  ;;  %14366 = vmatprep.subr.bf16.mxu1 %v16287_v50 }
 0x4f5   : > { %13635 = vmatprep.mubr.f32.mxu0 %v9878_v33  ;;  %14386 = vmatprep.subr.bf16.mxu0 %v17635_v17  ;;  %v6720_v1 = vpop.xlane.xlu0 %6719  ;;  %v16853_v33 = vpack.c.bf16 %v10854_v24, %v10851_v42 }
 0x4f6   : > { %15165 = vrcp.f32 %v6720_v1 }
 0x4f9   : > { %v6723_v5 = vpop.xlane.xlu1 %6722 }
 0x4fa   : > { %15167 = vrcp.f32 %v6723_v5  ;;  %13601 = vmatmul.mubr.f32.vlgmr.msra.gmra.mrb[64].mxu1 %v9381_v54  ;;  %13636 = vmatmul.mubr.f32.vlgmr.msra.gmra.mrb[42].mxu0 %v9888_v31 }
 0x4fb   : > { %14368 = vmatpush3.bf16.msra.mxu1 %v16287_v50  ;;  %14388 = vmatpush3.bf16.msra.mxu0 %v17635_v17  ;;  %v16693_v50 = vld [vmem:[%s17440_s2 + $0x8] sm:$0xff] }
 0x4fc   : > { %13607 = vmatprep.mubr.f32.mxu1 %v16637_v34  ;;  %14370 = vmatprep.subr.bf16.mxu1 %v17634_v40  ;;  %v10824_v3 = vand.u32 4294901760, %v16693_v50 }
 0x4fd   : > { %13642 = vmatprep.mubr.f32.mxu0 %v9879_v26  ;;  %14390 = vmatprep.subr.bf16.mxu0 %v16294_v22 }
 0x500   : > { %v15166_v56 = vpop.eup %15165 }
 0x501   : > { %v6753_v48 = vmul.f32 %v15166_v56, %v16558_v43 }
 0x502   : > { %13608 = vmatmul.mubr.f32.vlgmr.msra.gmra.mrb[64].mxu1 %v16645_v57  ;;  %13643 = vmatmul.mubr.f32.vlgmr.msra.gmra.mrb[42].mxu0 %v9889_v20 }
 0x503   : > { %14372 = vmatpush3.bf16.msra.mxu1 %v17634_v40  ;;  %14392 = vmatpush3.bf16.msra.mxu0 %v16294_v22  ;;  %v10313_v15 = vsel %vm6579_vm2, %v6753_v48, 0  ;;  %v10833_v40 = vand.u32 4294901760, %v16749_v60 }
 0x504   : > { %v15168_v43 = vpop.eup %15167  ;;  %13614 = vmatprep.mubr.f32.mxu1 %v16637_v34  ;;  %13649 = vmatprep.mubr.f32.mxu0 %v16654_v4  ;;  %v16700_v63 = vand.u32 4294901760, %v10313_v15  ;;  %v16771_v34 = vld [vmem:[%s17440_s2 + $0x30] sm:$0xff] }
 0x505   : > { %v6755_v12 = vmul.f32 %v15168_v43, %v16562_v19  ;;  %14394 = vmatprep.subr.bf16.mxu0 %v17635_v17  ;;  %14398 = vmatprep.subr.bf16.mxu1 %v16270_v7  ;;  %v16718_v19 = vpack.c.bf16 %v10824_v3, %v10821_v45  ;;  %v16786_v18 = vpack.c.bf16 %v10836_v44, %v10833_v40 }
 0x506   : > { %v16708_v22 = vsub.f32 %v10313_v15, %v16700_v63 }
 0x507   : > { %v10316_v41 = vsel %vm6579_vm2, %v6755_v12, 0 }
 0x508   : > { %v16711_v14 = vand.u32 4294901760, %v10316_v41  ;;  %v10387_v58 = vand.u32 4294901760, %v16708_v22 }
 0x50a   : > { %13615 = vmatmul.mubr.f32.vlgmr.msra.gmra.mrb[64].mxu1 %v16645_v57  ;;  %13650 = vmatmul.mubr.f32.vlgmr.msra.gmra.mrb[42].mxu0 %v16661_v36  ;;  %v10388_v55 = vsub.f32 %v16708_v22, %v10387_v58  ;;  %v16726_v16 = vsub.f32 %v10316_v41, %v16711_v14  ;;  %v10842_v57 = vand.u32 4294901760, %v16776_v59 }
 0x50b   : > { %14396 = vmatpush3.bf16.msra.mxu0 %v17635_v17  ;;  %14400 = vmatpush3.bf16.msra.mxu1 %v16270_v7  ;;  %v10839_v17 = vand.u32 4294901760, %v16771_v34 }
 0x50c   : > { %13656 = vmatprep.mubr.f32.mxu0 %v16654_v4  ;;  %14402 = vmatprep.subr.bf16.mxu1 %v16307_v6  ;;  %v10389_v46 = vand.u32 4294901760, %v10388_v55  ;;  %v10397_v10 = vand.u32 4294901760, %v16726_v16 }
 0x50d   : > { %14422 = vmatprep.subr.bf16.mxu0 %v16718_v19  ;;  %v16809_v21 = vpack.c.bf16 %v10842_v57, %v10839_v17 }
 0x50e   : > { %13663 = vmatprep.mubr.f32.mxu1 %v10389_v46  ;;  %v10398_v32 = vsub.f32 %v16726_v16, %v10397_v10 }
 0x510   : > { %v10399_v0 = vand.u32 4294901760, %v10398_v32 }
 0x512   : > { %13657 = vmatmul.mubr.f32.vlgmr.msra.gmra.mrb[42].mxu0 %v16661_v36  ;;  %13664 = vmatmul.mubr.f32.vlgmr.msra.gmra.mrb[66].mxu1 %v10399_v0  ;;  %v16864_v36 = vld [vmem:[%s17440_s2 + $0x78] sm:$0xff] }
 0x513   : > { %14404 = vmatpush3.bf16.msra.mxu1 %v16307_v6  ;;  %14424 = vmatpush3.bf16.msra.mxu0 %v16718_v19  ;;  %v16794_v6 = vld [vmem:[%s17440_s2 + $0x40] sm:$0xff]  ;;  %v10866_v25 = vand.u32 4294901760, %v16864_v36 }
 0x514   : > { %13670 = vmatprep.mubr.f32.mxu1 %v16700_v63  ;;  %14406 = vmatprep.subr.bf16.mxu1 %v16299_v52  ;;  %v10845_v37 = vand.u32 4294901760, %v16794_v6 }
 0x515   : > { %14426 = vmatprep.subr.bf16.mxu0 %v16765_v61  ;;  %v16898_v48 = vpack.c.bf16 %v10866_v25, %v10863_v53 }
 0x516   : > { %v16830_v54 = vpack.c.bf16 %v10848_v49, %v10845_v37 }
 0x517   : > { %14428 = vmatpush3.bf16.msra.mxu0 %v16765_v61 }
 0x518   : > { %14430 = vmatprep.subr.bf16.mxu0 %v16786_v18 }
 0x51a   : > { %13671 = vmatmul.mubr.f32.vlgmr.msra.gmra.mrb[66].mxu1 %v16711_v14 }
 0x51b   : > { %14408 = vmatpush3.bf16.msra.mxu1 %v16299_v52  ;;  %14432 = vmatpush3.bf16.msra.mxu0 %v16786_v18  ;;  %v16838_v52 = vld [vmem:[%s17440_s2 + $0x60] sm:$0xff] }
 0x51c   : > { %13677 = vmatprep.mubr.f32.mxu1 %v16708_v22  ;;  %14410 = vmatprep.subr.bf16.mxu1 %v16270_v7  ;;  %v10857_v4 = vand.u32 4294901760, %v16838_v52 }
 0x51d   : > { %14434 = vmatprep.subr.bf16.mxu0 %v16809_v21 }
 0x51e   : > { %v13406_v30 = vpop.f32.mrb[36].mxu0  ;;  %v16879_v20 = vpack.c.bf16 %v10860_v35, %v10857_v4 }
 0x51f   : > { %14436 = vmatpush3.bf16.msra.mxu0 %v16809_v21  ;;  %v16866_v26 = vand.u32 4294901760, %v13406_v30  ;;  %v7254_v31 = vpop.f32.mrb[37].mxu0 }
 0x520   : > { %14438 = vmatprep.subr.bf16.mxu0 %v16830_v54  ;;  %v16870_v51 = vand.u32 4294901760, %v7254_v31 }
 0x521   : > { %v16882_v29 = vsub.f32 %v13406_v30, %v16866_v26  ;;  %v16939_v30 = vsub.f32 %v16688_v9, %v10821_v45  ;;  %v16959_v9 = vsub.f32 %v16749_v60, %v10833_v40  ;;  %v16969_v45 = vsub.f32 %v16771_v34, %v10839_v17 }
 0x522   : > { %13678 = vmatmul.mubr.f32.vlgmr.msra.gmra.mrb[66].mxu1 %v16726_v16  ;;  %v16888_v1 = vsub.f32 %v7254_v31, %v16870_v51  ;;  %v16944_v31 = vsub.f32 %v16693_v50, %v10824_v3  ;;  %v16964_v50 = vsub.f32 %v16754_v39, %v10836_v44  ;;  %v16974_v3 = vsub.f32 %v16776_v59, %v10842_v57 }
 0x523   : > { %14412 = vmatpush3.bf16.msra.mxu1 %v16270_v7  ;;  %14440 = vmatpush3.bf16.msra.mxu0 %v16830_v54  ;;  %v17494_v5 = vand.u32 4294901760, %v16882_v29  ;;  %v17495_v60 = vand.u32 4294901760, %v16959_v9  ;;  %v17499_v40 = vand.u32 4294901760, %v16969_v45 }
 0x524   : > { %13684 = vmatprep.mubr.f32.mxu1 %v10387_v58  ;;  %14414 = vmatprep.subr.bf16.mxu1 %v16301_v28  ;;  %v17513_v56 = vand.u32 4294901760, %v16888_v1  ;;  %v17497_v39 = vand.u32 4294901760, %v16964_v50  ;;  %v17509_v44 = vand.u32 4294901760, %v16974_v3 }
 0x525   : > { %14442 = vmatprep.subr.bf16.mxu0 %v16853_v33  ;;  %v10914_v43 = vsub.f32 %v16882_v29, %v17494_v5 }
 0x526   : > { %v10904_v15 = vsub.f32 %v16888_v1, %v17513_v56 }
 0x527   : > { %14444 = vmatpush3.bf16.msra.mxu0 %v16853_v33  ;;  %v10915_v22 = vand.u32 4294901760, %v10914_v43  ;;  %v16954_v43 = vsub.f32 %v16736_v47, %v10830_v62  ;;  %v17514_v47 = vand.u32 4294901760, %v16944_v31 }
 0x528   : > { %14446 = vmatprep.subr.bf16.mxu0 %v16879_v20  ;;  %v10905_v12 = vand.u32 4294901760, %v10904_v15  ;;  %v16949_v15 = vsub.f32 %v16731_v23, %v10827_v13  ;;  %v17515_v23 = vand.u32 4294901760, %v16939_v30 }
 0x529   : > { %v17496_v62 = vand.u32 4294901760, %v16954_v43  ;;  %v11072_v59 = vsub.f32 %v16944_v31, %v17514_v47 }
 0x52a   : > { %13685 = vmatmul.mubr.f32.vlgmr.msra.gmra.mrb[66].mxu1 %v10397_v10  ;;  %13733 = vmatprep.mubr.f32.mxu0 %v10905_v12  ;;  %v17498_v13 = vand.u32 4294901760, %v16949_v15  ;;  %v11065_v34 = vsub.f32 %v16939_v30, %v17515_v23  ;;  %v11093_v12 = vsub.f32 %v16959_v9, %v17495_v60 }
 0x52b   : > { %14416 = vmatpush3.bf16.msra.mxu1 %v16301_v28  ;;  %14448 = vmatpush3.bf16.msra.mxu0 %v16879_v20  ;;  %v11086_v57 = vsub.f32 %v16954_v43, %v17496_v62 }
 0x52c   : > { %13691 = vmatprep.mubr.f32.mxu1 %v16700_v63  ;;  %14418 = vmatprep.subr.bf16.mxu1 %v16270_v7  ;;  %v11079_v17 = vsub.f32 %v16949_v15, %v17498_v13  ;;  %v11094_v5 = vand.u32 4294901760, %v11093_v12 }
 0x52d   : > { %14450 = vmatprep.subr.bf16.mxu0 %v16898_v48 }
 0x52f   : > { %14452 = vmatpush3.bf16.msra.mxu0 %v16898_v48 }
 0x532   : > { %13734 = vmatmul.mubr.f32.vlgmr.msra.gmra.mrb[44].mxu0 %v10915_v22  ;;  %13692 = vmatmul.mubr.f32.vlgmr.msra.gmra.mrb[66].mxu1 %v16711_v14  ;;  %v11100_v22 = vsub.f32 %v16964_v50, %v17497_v39 }
 0x533   : > { %14420 = vmatpush3.bf16.msra.mxu1 %v16270_v7  ;;  %13698 = vmatprep.mubr.f32.mxu1 %v16700_v63 }
 0x534   : > { %v11101_v60 = vand.u32 4294901760, %v11100_v22 }
 0x53a   : > { %13699 = vmatmul.mubr.f32.vlgmr.msra.gmra.mrb[66].mxu1 %v16711_v14 }
 0x54d   : > { %v13448_v28 = vpop.f32.mrb[60].mxu1 }
 0x54e   : > { %v16918_v41 = vand.u32 4294901760, %v13448_v28  ;;  %v7762_v58 = vpop.f32.mrb[61].mxu1 }
 0x54f   : > { %v16920_v55 = vand.u32 4294901760, %v7762_v58 }
 0x550   : > { %v16923_v16 = vsub.f32 %v13448_v28, %v16918_v41  ;;  %v11066_v28 = vand.u32 4294901760, %v11065_v34 }
 0x551   : > { %v16926_v46 = vsub.f32 %v7762_v58, %v16920_v55  ;;  %v11073_v58 = vand.u32 4294901760, %v11072_v59  ;;  %v14461_v59 = vpack.c.bf16 %v11101_v60, %v11094_v5 }
 0x552   : > { %v17492_v10 = vand.u32 4294901760, %v16923_v16 }
 0x553   : > { %v17493_v7 = vand.u32 4294901760, %v16926_v46 }
 0x554   : > { %v10934_v63 = vsub.f32 %v16923_v16, %v17492_v10  ;;  %v14453_v10 = vpack.c.bf16 %v11073_v58, %v11066_v28 }
 0x555   : > { %v10924_v14 = vsub.f32 %v16926_v46, %v17493_v7 }
 0x556   : > { %v10935_v0 = vand.u32 4294901760, %v10934_v63  ;;  %v11080_v63 = vand.u32 4294901760, %v11079_v17  ;;  %14454 = vmatprep.subr.bf16.mxu0 %v14453_v10 }
 0x557   : > { %v10925_v32 = vand.u32 4294901760, %v10924_v14  ;;  %v11087_v14 = vand.u32 4294901760, %v11086_v57  ;;  %14456 = vmatpush3.bf16.msra.mxu0 %v14453_v10 }
 0x559   : > { %13736 = vmatprep.mubr.f32.mxu0 %v10925_v32  ;;  %v11107_v32 = vsub.f32 %v16969_v45, %v17499_v40  ;;  %v14457_v7 = vpack.c.bf16 %v11087_v14, %v11080_v63  ;;  %v17034_v63 = vsub.f32 %v16799_v2, %v10848_v49  ;;  %v17039_v14 = vsub.f32 %v16815_v8, %v10851_v42 }
 0x55a   : > { %13737 = vmatmul.mubr.f32.gmra.mrb[46].mxu0 %v10935_v0  ;;  %v11114_v0 = vsub.f32 %v16974_v3, %v17509_v44  ;;  %v17054_v2 = vsub.f32 %v16843_v27, %v10860_v35 }
 0x55b   : > { %14458 = vmatprep.subr.bf16.mxu0 %v14457_v7  ;;  %v11108_v17 = vand.u32 4294901760, %v11107_v32  ;;  %17637 = vst [vmem:[#allocation6_spill] sm:$0xff] %v17034_v63  ;;  %17638 = vst [vmem:[#allocation3_spill] sm:$0xff] %v17039_v14  ;;  %v17044_v32 = vsub.f32 %v16820_v38, %v10854_v24  ;;  %v17506_v49 = vand.u32 4294901760, %v17034_v63  ;;  %v17505_v8 = vand.u32 4294901760, %v17039_v14 }
 0x55c   : > { %v11115_v57 = vand.u32 4294901760, %v11114_v0  ;;  %14460 = vmatpush3.bf16.msra.mxu0 %v14457_v7  ;;  %v17029_v7 = vsub.f32 %v16794_v6, %v10845_v37  ;;  %v17049_v6 = vsub.f32 %v16838_v52, %v10857_v4  ;;  %17641 = vst [vmem:[#allocation7_spill] sm:$0xff] %v17054_v2  ;;  %v17502_v24 = vand.u32 4294901760, %v17054_v2 }
 0x55d   : > { %14462 = vmatprep.subr.bf16.mxu0 %v14461_v59  ;;  %17639 = vst [vmem:[#allocation4_spill] sm:$0xff] %v17044_v32  ;;  %v17501_v42 = vand.u32 4294901760, %v17044_v32  ;;  %v11128_v27 = vsub.f32 %v17034_v63, %v17506_v49  ;;  %v11135_v4 = vsub.f32 %v17039_v14, %v17505_v8 }
 0x55e   : > { %v14465_v10 = vpack.c.bf16 %v11115_v57, %v11108_v17  ;;  %17636 = vst [vmem:[#allocation2_spill] sm:$0xff] %v17029_v7  ;;  %17640 = vst [vmem:[#allocation5_spill] sm:$0xff] %v17049_v6  ;;  %v17507_v37 = vand.u32 4294901760, %v17029_v7  ;;  %v17500_v38 = vand.u32 4294901760, %v17049_v6 }
 0x55f   : > { %v11142_v35 = vsub.f32 %v17044_v32, %v17501_v42  ;;  %v11129_v17 = vand.u32 4294901760, %v11128_v27  ;;  %v11136_v57 = vand.u32 4294901760, %v11135_v4  ;;  %v17100_v4 = vpack.c.bf16 %v16954_v43, %v16949_v15 }
 0x560   : > { %14464 = vmatpush3.bf16.msra.mxu0 %v14461_v59  ;;  %v11121_v52 = vsub.f32 %v17029_v7, %v17507_v37  ;;  %v11149_v0 = vsub.f32 %v17049_v6, %v17500_v38  ;;  %v17154_v37 = vpack.c.bf16 %v17054_v2, %v17049_v6 }
 0x561   : > { %14466 = vmatprep.subr.bf16.mxu0 %v14465_v10 }
 0x562   : > { %v11122_v59 = vand.u32 4294901760, %v11121_v52  ;;  %v11150_v38 = vand.u32 4294901760, %v11149_v0  ;;  %v17104_v0 = vpack.c.bf16 %v16964_v50, %v16959_v9 }
 0x564   : > { %14468 = vmatpush3.bf16.msra.mxu0 %v14465_v10  ;;  %v11143_v10 = vand.u32 4294901760, %v11142_v35 }
 0x57d   : > { %v13490_v62 = vpop.f32.mrb[38].mxu0 }
 0x57e   : > { %v17008_v39 = vand.u32 4294901760, %v13490_v62  ;;  %v8270_v34 = vpop.f32.mrb[39].mxu0 }
 0x57f   : > { %v17010_v13 = vand.u32 4294901760, %v8270_v34 }
 0x580   : > { %v17013_v40 = vsub.f32 %v13490_v62, %v17008_v39 }
 0x581   : > { %v17016_v28 = vsub.f32 %v8270_v34, %v17010_v13  ;;  %v11156_v34 = vsub.f32 %v17054_v2, %v17502_v24 }
 0x582   : > { %v17508_v12 = vand.u32 4294901760, %v17013_v40 }
 0x583   : > { %v17512_v22 = vand.u32 4294901760, %v17016_v28  ;;  %v11157_v42 = vand.u32 4294901760, %v11156_v34  ;;  %v17108_v34 = vpack.c.bf16 %v16944_v31, %v16939_v30 }
 0x584   : > { %v10954_v5 = vsub.f32 %v17013_v40, %v17508_v12 }
 0x585   : > { %v10944_v60 = vsub.f32 %v17016_v28, %v17512_v22 }
 0x586   : > { %v10955_v58 = vand.u32 4294901760, %v10954_v5  ;;  %v17083_v5 = vsub.f32 %v16859_v11, %v10863_v53 }
 0x587   : > { %v10945_v62 = vand.u32 4294901760, %v10944_v60  ;;  %v17088_v60 = vsub.f32 %v16864_v36, %v10866_v25  ;;  %v14477_v36 = vpack.c.bf16 %v11157_v42, %v11150_v38  ;;  %v17112_v42 = vpack.c.bf16 %v16974_v3, %v16969_v45 }
 0x588   : > { %17642 = vst [vmem:[#allocation8_spill] sm:$0xff] %v17083_v5  ;;  %v17504_v24 = vand.u32 4294901760, %v17083_v5 }
 0x589   : > { %13739 = vmatprep.mubr.f32.mxu0 %v10945_v62  ;;  %17643 = vst [vmem:[#allocation12_spill] sm:$0xff] %v17088_v60  ;;  %v14469_v62 = vpack.c.bf16 %v11129_v17, %v11122_v59  ;;  %v17503_v52 = vand.u32 4294901760, %v17088_v60 }
 0x58a   : > { %13740 = vmatmul.mubr.f32.gmra.mrb[48].mxu0 %v10955_v58  ;;  %v14473_v58 = vpack.c.bf16 %v11143_v10, %v11136_v57  ;;  %v11163_v11 = vsub.f32 %v17083_v5, %v17504_v24  ;;  %v17119_v57 = vpack.c.bf16 %v17034_v63, %v17029_v7 }
 0x58b   : > { %14470 = vmatprep.subr.bf16.mxu0 %v14469_v62  ;;  %v11170_v53 = vsub.f32 %v17088_v60, %v17503_v52 }
 0x58c   : > { %14472 = vmatpush3.bf16.msra.mxu0 %v14469_v62  ;;  %v11164_v25 = vand.u32 4294901760, %v11163_v11 }
 0x58d   : > { %14474 = vmatprep.subr.bf16.mxu0 %v14473_v58  ;;  %v11171_v27 = vand.u32 4294901760, %v11170_v53 }
 0x58f   : > { %v14481_v35 = vpack.c.bf16 %v11171_v27, %v11164_v25  ;;  %v17134_v27 = vpack.c.bf16 %v17044_v32, %v17039_v14 }
 0x590   : > { %14476 = vmatpush3.bf16.msra.mxu0 %v14473_v58 }
 0x591   : > { %14478 = vmatprep.subr.bf16.mxu0 %v14477_v36 }
 0x594   : > { %14480 = vmatpush3.bf16.msra.mxu0 %v14477_v36 }
 0x595   : > { %14482 = vmatprep.subr.bf16.mxu0 %v14481_v35 }
 0x598   : > { %14484 = vmatpush3.bf16.msra.mxu0 %v14481_v35 }
 0x599   : > { %14486 = vmatprep.subr.bf16.mxu0 %v17108_v34 }
 0x5ad   : > { %v13532_v38 = vpop.f32.mrb[62].mxu1 }
 0x5ae   : > { %v17115_v59 = vand.u32 4294901760, %v13532_v38  ;;  %v8778_v17 = vpop.f32.mrb[63].mxu1 }
 0x5af   : > { %v17121_v10 = vand.u32 4294901760, %v8778_v17 }
 0x5b0   : > { %v17124_v62 = vsub.f32 %v13532_v38, %v17115_v59 }
 0x5b1   : > { %v17127_v58 = vsub.f32 %v8778_v17, %v17121_v10  ;;  %v13574_v11 = vpop.f32.mrb[40].mxu0 }
 0x5b2   : > { %v17510_v53 = vand.u32 4294901760, %v17124_v62  ;;  %v17130_v36 = vand.u32 4294901760, %v13574_v11  ;;  %v9286_v25 = vpop.f32.mrb[41].mxu0 }
 0x5b3   : > { %v17511_v35 = vand.u32 4294901760, %v17127_v58  ;;  %v17137_v52 = vand.u32 4294901760, %v9286_v25 }
 0x5b4   : > { %v17140_v38 = vsub.f32 %v13574_v11, %v17130_v36  ;;  %v10974_v17 = vsub.f32 %v17124_v62, %v17510_v53 }
 0x5b5   : > { %v17146_v24 = vsub.f32 %v9286_v25, %v17137_v52  ;;  %v10964_v8 = vsub.f32 %v17127_v58, %v17511_v35  ;;  %v17165_v35 = vpack.c.bf16 %v17088_v60, %v17083_v5 }
 0x5b6   : > { %v17516_v49 = vand.u32 4294901760, %v17140_v38  ;;  %v10975_v44 = vand.u32 4294901760, %v10974_v17 }
 0x5b7   : > { %v17517_v11 = vand.u32 4294901760, %v17146_v24  ;;  %v10965_v12 = vand.u32 4294901760, %v10964_v8 }
 0x5b8   : > { %v10994_v53 = vsub.f32 %v17140_v38, %v17516_v49 }
 0x5b9   : > { %13742 = vmatprep.mubr.f32.mxu0 %v10965_v12  ;;  %v10984_v25 = vsub.f32 %v17146_v24, %v17517_v11 }
 0x5ba   : > { %13743 = vmatmul.mubr.f32.gmra.mrb[50].mxu0 %v10975_v44  ;;  %v10995_v56 = vand.u32 4294901760, %v10994_v53 }
 0x5bb   : > { %v10985_v22 = vand.u32 4294901760, %v10984_v25 }
 0x5bd   : > { %13745 = vmatprep.mubr.f32.mxu0 %v10985_v22 }
 0x5be   : > { %13746 = vmatmul.mubr.f32.gmra.mrb[52].mxu0 %v10995_v56 }
 0x5dd   : > { %v13616_v8 = vpop.f32.mrb[64].mxu1 }
 0x5de   : > { %v17167_v17 = vand.u32 4294901760, %v13616_v8  ;;  %v9794_v47 = vpop.f32.mrb[65].mxu1 }
 0x5df   : > { %v17169_v23 = vand.u32 4294901760, %v9794_v47 }
 0x5e0   : > { %v17172_v12 = vsub.f32 %v13616_v8, %v17167_v17 }
 0x5e1   : > { %v17175_v49 = vsub.f32 %v9794_v47, %v17169_v23 }
 0x5e2   : > { %v17522_v44 = vand.u32 4294901760, %v17172_v12 }
 0x5e3   : > { %v17524_v11 = vand.u32 4294901760, %v17175_v49 }
 0x5e4   : > { %v11014_v56 = vsub.f32 %v17172_v12, %v17522_v44 }
 0x5e5   : > { %v13658_v22 = vpop.f32.mrb[42].mxu0  ;;  %v11004_v53 = vsub.f32 %v17175_v49, %v17524_v11 }
 0x5e6   : > { %v17185_v25 = vand.u32 4294901760, %v13658_v22  ;;  %v10302_v8 = vpop.f32.mrb[43].mxu0  ;;  %v11015_v2 = vand.u32 4294901760, %v11014_v56 }
 0x5e7   : > { %v17187_v60 = vand.u32 4294901760, %v10302_v8  ;;  %v11005_v47 = vand.u32 4294901760, %v11004_v53 }
 0x5e8   : > { %v17190_v5 = vsub.f32 %v13658_v22, %v17185_v25 }
 0x5e9   : > { %v17193_v6 = vsub.f32 %v10302_v8, %v17187_v60  ;;  %13748 = vmatprep.mubr.f32.mxu0 %v11005_v47 }
 0x5ea   : > { %v17528_v44 = vand.u32 4294901760, %v17190_v5  ;;  %13749 = vmatmul.mubr.f32.gmra.mrb[54].mxu0 %v11015_v2 }
 0x5eb   : > { %v17529_v32 = vand.u32 4294901760, %v17193_v6 }
 0x5ec   : > { %v11034_v11 = vsub.f32 %v17190_v5, %v17528_v44 }
 0x5ed   : > { %v11024_v53 = vsub.f32 %v17193_v6, %v17529_v32 }
 0x5ee   : > { %v11035_v14 = vand.u32 4294901760, %v11034_v11 }
 0x5ef   : > { %v11025_v22 = vand.u32 4294901760, %v11024_v53 }
 0x5f1   : > { %13751 = vmatprep.mubr.f32.mxu0 %v11025_v22 }
 0x5f2   : > { %13752 = vmatmul.mubr.f32.gmra.mrb[56].mxu0 %v11035_v14 }
 0x60d   : > { %v13700_v56 = vpop.f32.mrb[66].mxu1 }
 0x60e   : > { %v17203_v8 = vand.u32 4294901760, %v13700_v56  ;;  %v10810_v47 = vpop.f32.mrb[67].mxu1 }
 0x60f   : > { %v17205_v63 = vand.u32 4294901760, %v10810_v47 }
 0x610   : > { %v17208_v2 = vsub.f32 %v13700_v56, %v17203_v8  ;;  %v17652_v56 = vand.u32 4294901760, %v16964_v50 }
 0x611   : > { %v17211_v7 = vsub.f32 %v10810_v47, %v17205_v63  ;;  %v17653_v47 = vand.u32 4294901760, %v16923_v16 }
 0x612   : > { %v11053_v44 = vand.u32 4294901760, %v17208_v2 }
 0x613   : > { %v11043_v32 = vand.u32 4294901760, %v17211_v7 }
 0x614   : > { %v11054_v14 = vsub.f32 %v17208_v2, %v11053_v44 }
 0x615   : > { %v11044_v11 = vsub.f32 %v17211_v7, %v11043_v32 }
 0x616   : > { %v11055_v22 = vand.u32 4294901760, %v11054_v14  ;;  %v17657_v14 = vand.u32 4294901760, %v17013_v40 }
 0x617   : > { %v11045_v53 = vand.u32 4294901760, %v11044_v11  ;;  %v17661_v11 = vld [vmem:[#allocation6_spill] sm:$0xff] }
 0x619   : > { %13754 = vmatprep.mubr.f32.mxu0 %v11045_v53 }
 0x61a   : > { %13755 = vmatmul.mubr.f32.gmra.mrb[58].mxu0 %v11055_v22  ;;  %v17663_v22 = vand.u32 4294901760, %v17124_v62 }
 0x61b   : > { %13789 = vmatprep.mubr.f32.mxu0 %v16870_v51 }
 0x61e   : > { %13790 = vmatmul.mubr.f32.vlgmr.msra.gmra.mrb[44].mxu0 %v16866_v26 }
 0x61f   : > { %13792 = vmatprep.mubr.f32.mxu0 %v16920_v55  ;;  %14488 = vmatpush3.bf16.msra.mxu0 %v17108_v34  ;;  %v17646_v34 = vand.u32 4294901760, %v16888_v1 }
 0x620   : > { %14490 = vmatprep.subr.bf16.mxu0 %v17100_v4 }
 0x622   : > { %13793 = vmatmul.mubr.f32.gmra.mrb[46].mxu0 %v16918_v41 }
 0x623   : > { %13795 = vmatprep.mubr.f32.mxu0 %v17010_v13  ;;  %14492 = vmatpush3.bf16.msra.mxu0 %v17100_v4  ;;  %v17645_v4 = vand.u32 4294901760, %v16944_v31  ;;  %v17651_v31 = vand.u32 4294901760, %v16959_v9  ;;  %v17658_v9 = vand.u32 4294901760, %v17127_v58 }
 0x624   : > { %14494 = vmatprep.subr.bf16.mxu0 %v17104_v0 }
 0x626   : > { %13796 = vmatmul.mubr.f32.gmra.mrb[48].mxu0 %v17008_v39 }
 0x627   : > { %13798 = vmatprep.mubr.f32.mxu0 %v17121_v10  ;;  %14496 = vmatpush3.bf16.msra.mxu0 %v17104_v0 }
 0x628   : > { %14498 = vmatprep.subr.bf16.mxu0 %v17112_v42 }
 0x62a   : > { %13799 = vmatmul.mubr.f32.gmra.mrb[50].mxu0 %v17115_v59 }
 0x62b   : > { %13801 = vmatprep.mubr.f32.mxu0 %v17137_v52  ;;  %14500 = vmatpush3.bf16.msra.mxu0 %v17112_v42  ;;  %v17647_v42 = vand.u32 4294901760, %v16949_v15  ;;  %v17654_v15 = vand.u32 4294901760, %v17016_v28 }
 0x62c   : > { %14502 = vmatprep.subr.bf16.mxu0 %v17119_v57 }
 0x62e   : > { %13802 = vmatmul.mubr.f32.gmra.mrb[52].mxu0 %v17130_v36 }
 0x62f   : > { %13804 = vmatprep.mubr.f32.mxu0 %v17169_v23  ;;  %14504 = vmatpush3.bf16.msra.mxu0 %v17119_v57  ;;  %v17648_v57 = vand.u32 4294901760, %v16954_v43 }
 0x630   : > { %14506 = vmatprep.subr.bf16.mxu0 %v17134_v27 }
 0x632   : > { %13805 = vmatmul.mubr.f32.gmra.mrb[54].mxu0 %v17167_v17 }
 0x633   : > { %13807 = vmatprep.mubr.f32.mxu0 %v17187_v60  ;;  %14508 = vmatpush3.bf16.msra.mxu0 %v17134_v27  ;;  %v14553_v27 = vpack.c.bf16 %v17648_v57, %v17647_v42  ;;  %v17673_v57 = vld [vmem:[#allocation7_spill] sm:$0xff] }
 0x634   : > { %14510 = vmatprep.subr.bf16.mxu0 %v17154_v37 }
 0x636   : > { %13808 = vmatmul.mubr.f32.gmra.mrb[56].mxu0 %v17185_v25 }
 0x637   : > { %13810 = vmatprep.mubr.f32.mxu0 %v17205_v63  ;;  %14512 = vmatpush3.bf16.msra.mxu0 %v17154_v37  ;;  %v17644_v37 = vand.u32 4294901760, %v16939_v30  ;;  %v17650_v30 = vand.u32 4294901760, %v16926_v46 }
 0x638   : > { %14514 = vmatprep.subr.bf16.mxu0 %v17165_v35 }
 0x639   : > { %v14549_v0 = vpack.c.bf16 %v17645_v4, %v17644_v37  ;;  %v17667_v37 = vld [vmem:[#allocation4_spill] sm:$0xff] }
 0x63a   : > { %13811 = vmatmul.mubr.f32.gmra.mrb[58].mxu0 %v17203_v8 }
 0x63b   : > { %14516 = vmatpush3.bf16.msra.mxu0 %v17165_v35  ;;  %13845 = vmatprep.mubr.f32.mxu0 %v16888_v1  ;;  %v17649_v35 = vand.u32 4294901760, %v16882_v29  ;;  %v14557_v1 = vpack.c.bf16 %v17652_v56, %v17651_v31  ;;  %v17679_v56 = vld [vmem:[#allocation12_spill] sm:$0xff] }
 0x63c   : > { %14518 = vmatprep.subr.bf16.mxu0 %v16718_v19 }
 0x63e   : > { %13846 = vmatmul.mubr.f32.vlgmr.msra.gmra.mrb[44].mxu0 %v16882_v29  ;;  %v17655_v29 = vand.u32 4294901760, %v16969_v45  ;;  %v17664_v45 = vand.u32 4294901760, %v17146_v24 }
 0x63f   : > { %13848 = vmatprep.mubr.f32.mxu0 %v16926_v46  ;;  %14520 = vmatpush3.bf16.msra.mxu0 %v16718_v19  ;;  %v17656_v46 = vand.u32 4294901760, %v16974_v3  ;;  %v17665_v3 = vld [vmem:[#allocation3_spill] sm:$0xff] }
 0x640   : > { %14522 = vmatprep.subr.bf16.mxu0 %v16765_v61 }
 0x641   : > { %v14561_v43 = vpack.c.bf16 %v17656_v46, %v17655_v29 }
 0x642   : > { %13849 = vmatmul.mubr.f32.gmra.mrb[46].mxu0 %v16923_v16  ;;  %v17659_v16 = vld [vmem:[#allocation2_spill] sm:$0xff] }
 0x643   : > { %13851 = vmatprep.mubr.f32.mxu0 %v17016_v28  ;;  %14524 = vmatpush3.bf16.msra.mxu0 %v16765_v61  ;;  %v17660_v50 = vand.u32 4294901760, %v17659_v16  ;;  %v17662_v28 = vand.u32 4294901760, %v17661_v11 }
 0x644   : > { %14526 = vmatprep.subr.bf16.mxu0 %v16786_v18 }
 0x645   : > { %v14565_v53 = vpack.c.bf16 %v17662_v28, %v17660_v50 }
 0x646   : > { %13852 = vmatmul.mubr.f32.gmra.mrb[48].mxu0 %v17013_v40  ;;  %v17666_v40 = vand.u32 4294901760, %v17665_v3 }
 0x647   : > { %13854 = vmatprep.mubr.f32.mxu0 %v17127_v58  ;;  %14528 = vmatpush3.bf16.msra.mxu0 %v16786_v18  ;;  %v17668_v58 = vand.u32 4294901760, %v17667_v37 }
 0x648   : > { %14530 = vmatprep.subr.bf16.mxu0 %v16809_v21 }
 0x649   : > { %v14569_v4 = vpack.c.bf16 %v17668_v58, %v17666_v40 }
 0x64a   : > { %13855 = vmatmul.mubr.f32.gmra.mrb[50].mxu0 %v17124_v62  ;;  %v17671_v62 = vld [vmem:[#allocation5_spill] sm:$0xff] }
 0x64b   : > { %13857 = vmatprep.mubr.f32.mxu0 %v17146_v24  ;;  %14532 = vmatpush3.bf16.msra.mxu0 %v16809_v21  ;;  %v17672_v42 = vand.u32 4294901760, %v17671_v62  ;;  %v17674_v24 = vand.u32 4294901760, %v17673_v57 }
 0x64c   : > { %14534 = vmatprep.subr.bf16.mxu0 %v16830_v54 }
 0x64e   : > { %13858 = vmatmul.mubr.f32.gmra.mrb[52].mxu0 %v17140_v38 }
 0x64f   : > { %13860 = vmatprep.mubr.f32.mxu0 %v17175_v49  ;;  %14536 = vmatpush3.bf16.msra.mxu0 %v16830_v54 }
 0x650   : > { %14538 = vmatprep.subr.bf16.mxu0 %v16853_v33 }
 0x652   : > { %13861 = vmatmul.mubr.f32.gmra.mrb[54].mxu0 %v17172_v12 }
 0x653   : > { %13863 = vmatprep.mubr.f32.mxu0 %v17193_v6  ;;  %14540 = vmatpush3.bf16.msra.mxu0 %v16853_v33 }
 0x654   : > { %14542 = vmatprep.subr.bf16.mxu0 %v16879_v20 }
 0x656   : > { %13864 = vmatmul.mubr.f32.gmra.mrb[56].mxu0 %v17190_v5 }
 0x657   : > { %13866 = vmatprep.mubr.f32.mxu0 %v17211_v7  ;;  %14544 = vmatpush3.bf16.msra.mxu0 %v16879_v20 }
 0x658   : > { %14546 = vmatprep.subr.bf16.mxu0 %v16898_v48 }
 0x65a   : > { %13867 = vmatmul.mubr.f32.gmra.mrb[58].mxu0 %v17208_v2 }
 0x65b   : > { %14548 = vmatpush3.bf16.msra.mxu0 %v16898_v48  ;;  %13901 = vmatprep.mubr.f32.mxu0 %v17646_v34  ;;  %v17670_v34 = vand.u32 4294901760, %v17175_v49  ;;  %v17680_v49 = vand.u32 4294901760, %v17679_v56 }
 0x65c   : > { %14550 = vmatprep.subr.bf16.mxu0 %v14549_v0 }
 0x65e   : > { %13902 = vmatmul.mubr.f32.vlgmr.msra.gmra.mrb[44].mxu0 %v17649_v35  ;;  %v17675_v35 = vand.u32 4294901760, %v17172_v12 }
 0x65f   : > { %13904 = vmatprep.mubr.f32.mxu0 %v17650_v30  ;;  %14552 = vmatpush3.bf16.msra.mxu0 %v14549_v0  ;;  %v17669_v0 = vand.u32 4294901760, %v17140_v38  ;;  %v17676_v30 = vand.u32 4294901760, %v17193_v6  ;;  %v17677_v38 = vld [vmem:[#allocation8_spill] sm:$0xff] }
 0x660   : > { %14554 = vmatprep.subr.bf16.mxu0 %v14553_v27  ;;  %v17678_v31 = vand.u32 4294901760, %v17677_v38 }
 0x662   : > { %13905 = vmatmul.mubr.f32.gmra.mrb[46].mxu0 %v17653_v47  ;;  %v17681_v47 = vand.u32 4294901760, %v17190_v5 }
 0x663   : > { %13907 = vmatprep.mubr.f32.mxu0 %v17654_v15  ;;  %14556 = vmatpush3.bf16.msra.mxu0 %v14553_v27  ;;  %v14573_v27 = vpack.c.bf16 %v17674_v24, %v17672_v42 }
 0x664   : > { %14558 = vmatprep.subr.bf16.mxu0 %v14557_v1 }
 0x666   : > { %13908 = vmatmul.mubr.f32.gmra.mrb[48].mxu0 %v17657_v14 }
 0x667   : > { %13910 = vmatprep.mubr.f32.mxu0 %v17658_v9  ;;  %14560 = vmatpush3.bf16.msra.mxu0 %v14557_v1  ;;  %v14577_v1 = vpack.c.bf16 %v17680_v49, %v17678_v31 }
 0x668   : > { %14562 = vmatprep.subr.bf16.mxu0 %v14561_v43 }
 0x66a   : > { %13911 = vmatmul.mubr.f32.gmra.mrb[50].mxu0 %v17663_v22 }
 0x66b   : > { %13913 = vmatprep.mubr.f32.mxu0 %v17664_v45  ;;  %14564 = vmatpush3.bf16.msra.mxu0 %v14561_v43 }
 0x66c   : > { %14566 = vmatprep.subr.bf16.mxu0 %v14565_v53 }
 0x66e   : > { %13914 = vmatmul.mubr.f32.gmra.mrb[52].mxu0 %v17669_v0 }
 0x66f   : > { %13916 = vmatprep.mubr.f32.mxu0 %v17670_v34  ;;  %14568 = vmatpush3.bf16.msra.mxu0 %v14565_v53 }
 0x670   : > { %14570 = vmatprep.subr.bf16.mxu0 %v14569_v4 }
 0x672   : > { %13917 = vmatmul.mubr.f32.gmra.mrb[54].mxu0 %v17675_v35 }
 0x673   : > { %13919 = vmatprep.mubr.f32.mxu0 %v17676_v30  ;;  %14572 = vmatpush3.bf16.msra.mxu0 %v14569_v4 }
 0x674   : > { %14574 = vmatprep.subr.bf16.mxu0 %v14573_v27 }
 0x676   : > { %13920 = vmatmul.mubr.f32.gmra.mrb[56].mxu0 %v17681_v47 }
 0x677   : > { %13922 = vmatprep.mubr.f32.mxu0 %v11043_v32  ;;  %14576 = vmatpush3.bf16.msra.mxu0 %v14573_v27 }
 0x678   : > { %14578 = vmatprep.subr.bf16.mxu0 %v14577_v1 }
 0x67a   : > { %13923 = vmatmul.mubr.f32.gmra.mrb[58].mxu0 %v11053_v44 }
 0x67b   : > { %14580 = vmatpush3.bf16.msra.mxu0 %v14577_v1  ;;  %13957 = vmatprep.mubr.f32.mxu0 %v16870_v51 }
 0x67c   : > { %14582 = vmatprep.subr.bf16.mxu0 %v16718_v19 }
 0x67e   : > { %13958 = vmatmul.mubr.f32.vlgmr.msra.gmra.mrb[44].mxu0 %v16866_v26 }
 0x67f   : > { %13960 = vmatprep.mubr.f32.mxu0 %v16920_v55  ;;  %14584 = vmatpush3.bf16.msra.mxu0 %v16718_v19 }
 0x680   : > { %14586 = vmatprep.subr.bf16.mxu0 %v16765_v61 }
 0x682   : > { %13961 = vmatmul.mubr.f32.gmra.mrb[46].mxu0 %v16918_v41 }
 0x683   : > { %13963 = vmatprep.mubr.f32.mxu0 %v17010_v13  ;;  %14588 = vmatpush3.bf16.msra.mxu0 %v16765_v61 }
 0x684   : > { %14590 = vmatprep.subr.bf16.mxu0 %v16786_v18 }
 0x686   : > { %13964 = vmatmul.mubr.f32.gmra.mrb[48].mxu0 %v17008_v39 }
 0x687   : > { %13966 = vmatprep.mubr.f32.mxu0 %v17121_v10  ;;  %14592 = vmatpush3.bf16.msra.mxu0 %v16786_v18 }
 0x688   : > { %14594 = vmatprep.subr.bf16.mxu0 %v16809_v21 }
 0x68a   : > { %13967 = vmatmul.mubr.f32.gmra.mrb[50].mxu0 %v17115_v59 }
 0x68b   : > { %13969 = vmatprep.mubr.f32.mxu0 %v17137_v52  ;;  %14596 = vmatpush3.bf16.msra.mxu0 %v16809_v21 }
 0x68c   : > { %14598 = vmatprep.subr.bf16.mxu0 %v16830_v54 }
 0x68e   : > { %13970 = vmatmul.mubr.f32.gmra.mrb[52].mxu0 %v17130_v36 }
 0x68f   : > { %13972 = vmatprep.mubr.f32.mxu0 %v17169_v23  ;;  %14600 = vmatpush3.bf16.msra.mxu0 %v16830_v54 }
 0x690   : > { %14602 = vmatprep.subr.bf16.mxu0 %v16853_v33 }
 0x692   : > { %13973 = vmatmul.mubr.f32.gmra.mrb[54].mxu0 %v17167_v17 }
 0x693   : > { %13975 = vmatprep.mubr.f32.mxu0 %v17187_v60  ;;  %14604 = vmatpush3.bf16.msra.mxu0 %v16853_v33 }
 0x694   : > { %14606 = vmatprep.subr.bf16.mxu0 %v16879_v20 }
 0x696   : > { %13976 = vmatmul.mubr.f32.gmra.mrb[56].mxu0 %v17185_v25 }
 0x697   : > { %13978 = vmatprep.mubr.f32.mxu0 %v17205_v63  ;;  %14608 = vmatpush3.bf16.msra.mxu0 %v16879_v20 }
 0x698   : > { %14610 = vmatprep.subr.bf16.mxu0 %v16898_v48 }
 0x69a   : > { %13979 = vmatmul.mubr.f32.gmra.mrb[58].mxu0 %v17203_v8 }
 0x69b   : > { %14612 = vmatpush3.bf16.msra.mxu0 %v16898_v48  ;;  %14013 = vmatprep.mubr.f32.mxu0 %v16870_v51 }
 0x69e   : > { %14014 = vmatmul.mubr.f32.vlgmr.msra.gmra.mrb[44].mxu0 %v16866_v26 }
 0x69f   : > { %14016 = vmatprep.mubr.f32.mxu0 %v16920_v55 }
 0x6a2   : > { %14017 = vmatmul.mubr.f32.gmra.mrb[46].mxu0 %v16918_v41 }
 0x6a3   : > { %14019 = vmatprep.mubr.f32.mxu0 %v17010_v13 }
 0x6a6   : > { %14020 = vmatmul.mubr.f32.gmra.mrb[48].mxu0 %v17008_v39 }
 0x6a7   : > { %14022 = vmatprep.mubr.f32.mxu0 %v17121_v10 }
 0x6aa   : > { %14023 = vmatmul.mubr.f32.gmra.mrb[50].mxu0 %v17115_v59 }
 0x6ab   : > { %14025 = vmatprep.mubr.f32.mxu0 %v17137_v52 }
 0x6ae   : > { %14026 = vmatmul.mubr.f32.gmra.mrb[52].mxu0 %v17130_v36 }
 0x6af   : > { %14028 = vmatprep.mubr.f32.mxu0 %v17169_v23 }
 0x6b2   : > { %14029 = vmatmul.mubr.f32.gmra.mrb[54].mxu0 %v17167_v17 }
 0x6b3   : > { %14031 = vmatprep.mubr.f32.mxu0 %v17187_v60 }
 0x6b6   : > { %14032 = vmatmul.mubr.f32.gmra.mrb[56].mxu0 %v17185_v25 }
 0x6b7   : > { %14034 = vmatprep.mubr.f32.mxu0 %v17205_v63 }
 0x6ba   : > { %14035 = vmatmul.mubr.f32.gmra.mrb[58].mxu0 %v17203_v8 }
 0x771   : > { %v14015_v19 = vpop.f32.mrb[44].mxu0 }
 0x772   : > { %12107 = vst.msk [vmem:[%s17401_s6 + $0x8] sm:$0xff] %vm216_vm1, %v14015_v19  ;;  %v12012_v61 = vpop.f32.mrb[45].mxu0 }
 0x773   : > { %12106 = vst.msk [vmem:[%s17401_s6] sm:$0xff] %vm216_vm1, %v12012_v61 }
 0x775   : > { %v14018_v18 = vpop.f32.mrb[46].mxu0 }
 0x776   : > { %12109 = vst.msk [vmem:[%s17401_s6 + $0x18] sm:$0xff] %vm216_vm1, %v14018_v18  ;;  %v12024_v21 = vpop.f32.mrb[47].mxu0 }
 0x777   : > { %12108 = vst.msk [vmem:[%s17401_s6 + $0x10] sm:$0xff] %vm216_vm1, %v12024_v21 }
 0x779   : > { %v14021_v54 = vpop.f32.mrb[48].mxu0 }
 0x77a   : > { %12111 = vst.msk [vmem:[%s17401_s6 + $0x28] sm:$0xff] %vm216_vm1, %v14021_v54  ;;  %v12036_v33 = vpop.f32.mrb[49].mxu0 }
 0x77b   : > { %12110 = vst.msk [vmem:[%s17401_s6 + $0x20] sm:$0xff] %vm216_vm1, %v12036_v33 }
 0x77d   : > { %v14024_v26 = vpop.f32.mrb[50].mxu0 }
 0x77e   : > { %12113 = vst.msk [vmem:[%s17401_s6 + $0x38] sm:$0xff] %vm216_vm1, %v14024_v26  ;;  %v12048_v51 = vpop.f32.mrb[51].mxu0 }
 0x77f   : > { %12112 = vst.msk [vmem:[%s17401_s6 + $0x30] sm:$0xff] %vm216_vm1, %v12048_v51 }
 0x781   : > { %v14027_v20 = vpop.f32.mrb[52].mxu0 }
 0x782   : > { %12115 = vst.msk [vmem:[%s17401_s6 + $0x48] sm:$0xff] %vm216_vm1, %v14027_v20  ;;  %v12060_v48 = vpop.f32.mrb[53].mxu0 }
 0x783   : > { %12114 = vst.msk [vmem:[%s17401_s6 + $0x40] sm:$0xff] %vm216_vm1, %v12060_v48 }
 0x785   : > { %v14030_v41 = vpop.f32.mrb[54].mxu0 }
 0x786   : > { %12117 = vst.msk [vmem:[%s17401_s6 + $0x58] sm:$0xff] %vm216_vm1, %v14030_v41  ;;  %v12072_v55 = vpop.f32.mrb[55].mxu0 }
 0x787   : > { %12116 = vst.msk [vmem:[%s17401_s6 + $0x50] sm:$0xff] %vm216_vm1, %v12072_v55 }
 0x789   : > { %v14033_v23 = vpop.f32.mrb[56].mxu0 }
 0x78a   : > { %12119 = vst.msk [vmem:[%s17401_s6 + $0x68] sm:$0xff] %vm216_vm1, %v14033_v23  ;;  %v12084_v13 = vpop.f32.mrb[57].mxu0 }
 0x78b   : > { %12118 = vst.msk [vmem:[%s17401_s6 + $0x60] sm:$0xff] %vm216_vm1, %v12084_v13 }
 0x78d   : > { %v14036_v39 = vpop.f32.mrb[58].mxu0 }
 0x78e   : > { %12121 = vst.msk [vmem:[%s17401_s6 + $0x78] sm:$0xff] %vm216_vm1, %v14036_v39  ;;  %v12096_v7 = vpop.f32.mrb[59].mxu0 }
 0x78f   : > { %12120 = vst.msk [vmem:[%s17401_s6 + $0x70] sm:$0xff] %vm216_vm1, %v12096_v7 }
 0x790 PF: > { %s13_s12 = sadd.s32 1, %s15175_s12  }
 0x791   : > { %p10_p4 = scmp.ge.s32.totalorder %s13_s12, 6  }
 0x793   :  { %12 = sbr.rel (!%p10_p4) target bundleno = 1 (0x1), region = 62 }

</bundles_post_ra>
